<compile_context>
chip_gen: v6e
topology: v6e:2x2x1
jax: 0.10.0
libtpu: 0.0.40
codegen_flags: <defaults>
</compile_context>

<pallas_src>
import functools

import jax
import jax.numpy as jnp
from jax.experimental import pallas as pl
from jax.experimental.pallas import tpu as pltpu


# ----------------------------------------------------------------------------
# tiling helpers / budgets
# ----------------------------------------------------------------------------
_TM = 256                        # rows per grid step, weight-resident linears
_TM_STREAM = 512                 # streamed-weight fallback tiles
_TN_STREAM = 512
_TK_STREAM = 512
_LN_TM = 512                     # LayerNorm rows per grid step
_RESIDENT_W_BYTES = 8 * 1024 * 1024   # bf16 weight kept fully VMEM-resident below this
_VMEM_LIMIT = 32 * 1024 * 1024        # scoped-VMEM cap, safe on v5e/v6e/v7x


def _round_up(x, m):
    return ((x + m - 1) // m) * m


def _row_tile(m, pref):
    """Largest multiple-of-8 divisor of m that is <= pref (avoids any padding
    pass over the activation); otherwise fall back to a padded row count."""
    start = (min(pref, m) // 8) * 8
    for t in range(start, 7, -8):
        if m % t == 0:
            return t, m
    tm = min(pref, _round_up(m, 8))
    return tm, _round_up(m, tm)


def _lane_tile(padded, pref):
    """Largest multiple-of-128 divisor of `padded` (itself a multiple of 128)
    that is <= pref."""
    t = min((pref // 128) * 128, padded)
    while padded % t:
        t -= 128
    return t


# ----------------------------------------------------------------------------
# in-kernel exact GELU (erf via Abramowitz & Stegun 7.1.26, |err| < 1.5e-7,
# built only from mul/add/exp so it always lowers in Mosaic; matches
# torch.nn.GELU() to float32 precision)
# ----------------------------------------------------------------------------
def _erf_f32(x):
    a1, a2, a3, a4, a5 = (0.254829592, -0.284496736, 1.421413741,
                          -1.453152027, 1.061405429)
    p = 0.3275911
    ax = jnp.abs(x)
    t = 1.0 / (1.0 + p * ax)
    poly = t * (a1 + t * (a2 + t * (a3 + t * (a4 + t * a5))))
    r = 1.0 - poly * jnp.exp(-ax * ax)
    return jnp.where(x >= 0, r, -r)


def _gelu_exact(x):
    return 0.5 * x * (1.0 + _erf_f32(x * 0.7071067811865476))


# ----------------------------------------------------------------------------
# Linear kernels
# ----------------------------------------------------------------------------
def _linear_resident_kernel(x_ref, w_ref, b_ref, *rest, activation, has_residual):
    """Weight is VMEM-resident (constant index_map) -> single K pass, no scratch."""
    if has_residual:
        r_ref, o_ref = rest
    else:
        (o_ref,) = rest
        r_ref = None
    y = jnp.dot(x_ref[...], w_ref[...], preferred_element_type=jnp.float32)
    y = y + b_ref[...].astype(jnp.float32)
    if activation == "gelu":
        y = _gelu_exact(y)
    if r_ref is not None:
        y = y + r_ref[...].astype(jnp.float32)
    o_ref[...] = y.astype(o_ref.dtype)


def _linear_streamed_kernel(x_ref, w_ref, b_ref, *rest, activation, has_residual):
    """K-tiled fallback for weights too large to keep resident."""
    if has_residual:
        r_ref, o_ref, acc_ref = rest
    else:
        o_ref, acc_ref = rest
        r_ref = None

    @pl.when(pl.program_id(2) == 0)
    def _init():
        acc_ref[...] = jnp.zeros_like(acc_ref)

    acc_ref[...] += jnp.dot(x_ref[...], w_ref[...],
                            preferred_element_type=jnp.float32)

    @pl.when(pl.program_id(2) == pl.num_programs(2) - 1)
    def _finalize():
        y = acc_ref[...] + b_ref[...].astype(jnp.float32)
        if activation == "gelu":
            y = _gelu_exact(y)
        if r_ref is not None:
            y = y + r_ref[...].astype(jnp.float32)
        o_ref[...] = y.astype(o_ref.dtype)


def pallas_linear(x, w, b, *, activation=None, residual=None,
                  out_dtype=jnp.bfloat16):
    """y = activation(x @ w + b) [+ residual].   x:(M,K), w:(K,N), b:(N,).

    bf16 operands into the MXU, f32 accumulation.  If the bf16 weight fits the
    resident budget it is given a full (Kp, Np) block with a constant index_map
    (DMA'd once, reused across all M blocks); otherwise a (M,N,K)-tiled grid
    with a f32 VMEM accumulator is used."""
    M, K = x.shape
    K2, N = w.shape
    assert K == K2
    Kp, Np = _round_up(K, 128), _round_up(N, 128)

    xb = x.astype(jnp.bfloat16)
    wb = w.astype(jnp.bfloat16)
    bp = b.astype(jnp.float32).reshape(1, N)
    if Np != N:
        bp = jnp.pad(bp, ((0, 0), (0, Np - N)))
    rb = None if residual is None else residual.astype(jnp.bfloat16)

    if Kp * Np * 2 <= _RESIDENT_W_BYTES:
        # ---- weight-resident path: grid over M only --------------------------
        tm, Mp = _row_tile(M, _TM)
        if Mp != M or Kp != K:
            xb = jnp.pad(xb, ((0, Mp - M), (0, Kp - K)))
        if Kp != K or Np != N:
            wb = jnp.pad(wb, ((0, Kp - K), (0, Np - N)))
        if rb is not None and (Mp != M or Np != N):
            rb = jnp.pad(rb, ((0, Mp - M), (0, Np - N)))

        in_specs = [
            pl.BlockSpec((tm, Kp), lambda i: (i, 0)),
            pl.BlockSpec((Kp, Np), lambda i: (0, 0)),    # resident weight
            pl.BlockSpec((1, Np), lambda i: (0, 0)),
        ]
        args = [xb, wb, bp]
        if rb is not None:
            in_specs.append(pl.BlockSpec((tm, Np), lambda i: (i, 0)))
            args.append(rb)

        out = pl.pallas_call(
            functools.partial(_linear_resident_kernel, activation=activation,
                              has_residual=rb is not None),
            out_shape=jax.ShapeDtypeStruct((Mp, Np), out_dtype),
            grid=(Mp // tm,),
            in_specs=in_specs,
            out_specs=pl.BlockSpec((tm, Np), lambda i: (i, 0)),
            compiler_params=pltpu.CompilerParams(
                dimension_semantics=("parallel",),
                vmem_limit_bytes=_VMEM_LIMIT),
            cost_estimate=pl.CostEstimate(
                flops=2 * Mp * Np * Kp,
                transcendentals=(Mp * Np) if activation == "gelu" else 0,
                bytes_accessed=(Mp * Kp * 2 + Kp * Np * 2 + Np * 4
                                + (Mp * Np * 2 if rb is not None else 0)
                                + Mp * Np * jnp.dtype(out_dtype).itemsize)),
        )(*args)
    else:
        # ---- streamed fallback: (M,N,K)-tiled with f32 accumulator -----------
        tm = min(_TM_STREAM, _round_up(M, 8))
        Mp = _round_up(M, tm)
        tn = _lane_tile(Np, _TN_STREAM)
        tk = _lane_tile(Kp, _TK_STREAM)
        if Mp != M or Kp != K:
            xb = jnp.pad(xb, ((0, Mp - M), (0, Kp - K)))
        if Kp != K or Np != N:
            wb = jnp.pad(wb, ((0, Kp - K), (0, Np - N)))
        if rb is not None and (Mp != M or Np != N):
            rb = jnp.pad(rb, ((0, Mp - M), (0, Np - N)))

        in_specs = [
            pl.BlockSpec((tm, tk), lambda i, j, k: (i, k)),
            pl.BlockSpec((tk, tn), lambda i, j, k: (k, j)),
            pl.BlockSpec((1, tn), lambda i, j, k: (0, j)),
        ]
        args = [xb, wb, bp]
        if rb is not None:
            in_specs.append(pl.BlockSpec((tm, tn), lambda i, j, k: (i, j)))
            args.append(rb)

        out = pl.pallas_call(
            functools.partial(_linear_streamed_kernel, activation=activation,
                              has_residual=rb is not None),
            out_shape=jax.ShapeDtypeStruct((Mp, Np), out_dtype),
            grid=(Mp // tm, Np // tn, Kp // tk),
            in_specs=in_specs,
            out_specs=pl.BlockSpec((tm, tn), lambda i, j, k: (i, j)),
            scratch_shapes=[pltpu.VMEM((tm, tn), jnp.float32)],
            compiler_params=pltpu.CompilerParams(
                dimension_semantics=("parallel", "parallel", "arbitrary"),
                vmem_limit_bytes=_VMEM_LIMIT),
            cost_estimate=pl.CostEstimate(
                flops=2 * Mp * Np * Kp,
                transcendentals=(Mp * Np) if activation == "gelu" else 0,
                bytes_accessed=((Mp * Kp * 2) * (Np // tn)
                                + (Kp * Np * 2) * (Mp // tm)
                                + Np * 4
                                + (Mp * Np * 2 if rb is not None else 0)
                                + Mp * Np * jnp.dtype(out_dtype).itemsize)),
        )(*args)

    if Mp != M or Np != N:
        out = out[:M, :N]
    return out


# ----------------------------------------------------------------------------
# LayerNorm kernel (bf16 I/O, f32 statistics)
# ----------------------------------------------------------------------------
def _layernorm_kernel(x_ref, g_ref, b_ref, o_ref, *, eps):
    x = x_ref[...].astype(jnp.float32)
    mean = jnp.mean(x, axis=-1, keepdims=True)
    xc = x - mean
    var = jnp.mean(xc * xc, axis=-1, keepdims=True)
    y = xc * jax.lax.rsqrt(var + eps)
    o_ref[...] = (y * g_ref[...] + b_ref[...]).astype(o_ref.dtype)


def pallas_layernorm_2d(x, gamma, beta, eps):
    M, D = x.shape
    tm, Mp = _row_tile(M, _LN_TM)
    xp = x if Mp == M else jnp.pad(x, ((0, Mp - M), (0, 0)))
    out = pl.pallas_call(
        functools.partial(_layernorm_kernel, eps=eps),
        out_shape=jax.ShapeDtypeStruct((Mp, D), jnp.bfloat16),
        grid=(Mp // tm,),
        in_specs=[
            pl.BlockSpec((tm, D), lambda i: (i, 0)),
            pl.BlockSpec((1, D), lambda i: (0, 0)),
            pl.BlockSpec((1, D), lambda i: (0, 0)),
        ],
        out_specs=pl.BlockSpec((tm, D), lambda i: (i, 0)),
        compiler_params=pltpu.CompilerParams(
            dimension_semantics=("parallel",),
            vmem_limit_bytes=_VMEM_LIMIT),
    )(xp, gamma.reshape(1, D).astype(jnp.float32),
      beta.reshape(1, D).astype(jnp.float32))
    return out[:M] if Mp != M else out


def layer_norm(x, gamma, beta, eps):
    shape = x.shape
    y = pallas_layernorm_2d(x.reshape(-1, shape[-1]), gamma, beta, eps)
    return y.reshape(shape)


# ----------------------------------------------------------------------------
# Attention kernel (fused-QKV layout, Bn-batched, lane-dense head groups)
# ----------------------------------------------------------------------------
def _attention_kernel(q_ref, k_ref, v_ref, o_ref, *, scale, hb, dh):
    q = q_ref[...]                                  # (bb, S, hb*dh) bf16
    k = k_ref[...]
    v = v_ref[...]
    for h in range(hb):                             # static unroll over heads in group
        sl = slice(h * dh, (h + 1) * dh)
        qh = q[:, :, sl] * scale                    # scale folded into q (S*dh muls)
        s = jnp.einsum('bsd,btd->bst', qh, k[:, :, sl],
                       preferred_element_type=jnp.float32)
        s = s - jnp.max(s, axis=-1, keepdims=True)
        p = jnp.exp(s)
        denom = jnp.sum(p, axis=-1, keepdims=True)
        ctx = jnp.einsum('bst,btd->bsd', p.astype(jnp.bfloat16), v[:, :, sl],
                         preferred_element_type=jnp.float32)
        # defer softmax normalization to the (S, dh) context (EUP reciprocal slot)
        ctx = ctx * pl.reciprocal(denom, approx=True)
        o_ref[:, :, sl] = ctx.astype(o_ref.dtype)   # per-head direct store, no concat


def pallas_attention(qkv, num_heads, scale):
    """qkv: (Bn, S, 3*D) with columns [Q | K | V], each head-major (matches the
    HF fused-QKV layout).  Q/K/V head-groups are selected via BlockSpec
    index_maps (no HBM transposes).  The Bn axis is batched per grid step when
    S is short (temporal attention) to amortize grid overhead.  Returns
    (Bn, S, D) bf16 context in head-major column order."""
    Bn, S, threeD = qkv.shape
    D = threeD // 3
    Dh = D // num_heads
    hb = None
    for cand in range(1, num_heads + 1):            # smallest lane-dense head group
        if num_heads % cand == 0 and (cand * Dh) % 128 == 0:
            hb = cand
            break
    assert hb is not None, "per-group Q/K/V width must be a multiple of 128 lanes"
    ng = num_heads // hb
    bw = hb * Dh

    # batch Bn: bounded by per-head f32 score temp and q/k/v block bytes
    score_budget = 2 * 1024 * 1024
    io_budget = 6 * 1024 * 1024
    bb_cap = max(1, min(score_budget // max(1, S * S * 4),
                        io_budget // max(1, 3 * S * bw * 2), 128))
    bb = 1
    for cand in range(1, Bn + 1):
        if Bn % cand == 0 and cand <= bb_cap:
            bb = cand

    blk = (bb, S, bw)
    # TODO(synk): flash-style KV-tiled online softmax for very long S (HR spatial
    # path, S~785) to bound the per-head (S,S) f32 score temporary on v7x VMEM.
    return pl.pallas_call(
        functools.partial(_attention_kernel, scale=scale, hb=hb, dh=Dh),
        out_shape=jax.ShapeDtypeStruct((Bn, S, D), jnp.bfloat16),
        grid=(Bn // bb, ng),
        in_specs=[
            pl.BlockSpec(blk, lambda b, g: (b, 0, g)),            # Q head group
            pl.BlockSpec(blk, lambda b, g: (b, 0, ng + g)),       # K head group
            pl.BlockSpec(blk, lambda b, g: (b, 0, 2 * ng + g)),   # V head group
        ],
        out_specs=pl.BlockSpec(blk, lambda b, g: (b, 0, g)),
        compiler_params=pltpu.CompilerParams(
            dimension_semantics=("parallel", "parallel"),
            vmem_limit_bytes=_VMEM_LIMIT),
        cost_estimate=pl.CostEstimate(
            flops=4 * Bn * num_heads * S * S * Dh,
            transcendentals=Bn * num_heads * S * S,
            bytes_accessed=qkv.size * qkv.dtype.itemsize + Bn * S * D * 2),
    )(qkv, qkv, qkv)


# ----------------------------------------------------------------------------
# Model glue (reshapes / composition in plain JAX; residual stream in bf16)
# ----------------------------------------------------------------------------
def _jnp_layernorm(x, g, b, eps):
    mean = jnp.mean(x, axis=-1, keepdims=True)
    xc = x - mean
    var = jnp.mean(xc * xc, axis=-1, keepdims=True)
    return xc * jax.lax.rsqrt(var + eps) * g + b


def multi_head_attention(x, qkv_w, qkv_b, proj_w, proj_b, num_heads):
    """TimesformerAttention: fused-QKV self-attention + output dense."""
    Bn, S, D = x.shape
    Dh = D // num_heads
    qkv = pallas_linear(x.reshape(Bn * S, D), qkv_w, qkv_b)        # bf16 (Bn*S, 3D)
    ctx = pallas_attention(qkv.reshape(Bn, S, 3 * D), num_heads, scale=Dh ** -0.5)
    out = pallas_linear(ctx.reshape(Bn * S, D), proj_w, proj_b)    # bf16
    return out.reshape(Bn, S, D)


def timesformer_layer(h, lp, *, B, T, Hp, Wp, num_heads, eps):
    """One divided space-time attention block (HF TimesformerLayer, eval mode)."""
    D = h.shape[-1]
    NP = Hp * Wp

    # ---- temporal attention -------------------------------------------------
    temporal = h[:, 1:, :].reshape(B * NP, T, D)      # token order = (patch, frame)
    t_in = layer_norm(temporal, lp["t_ln_g"], lp["t_ln_b"], eps)
    # TODO(synk): fuse the LayerNorm prologue into the QKV matmul (needs full-row
    # stats before the matmul; a two-pass or resident-K variant).
    t_attn = multi_head_attention(
        t_in, lp["t_qkv_w"], lp["t_qkv_b"], lp["t_proj_w"], lp["t_proj_b"], num_heads
    )
    # temporal_dense + residual add fused into one Pallas epilogue (bf16 residual)
    res_t = pallas_linear(
        t_attn.reshape(B * NP * T, D), lp["t_dense_w"], lp["t_dense_b"],
        residual=temporal.reshape(B * NP * T, D),
    ).reshape(B, NP * T, D)

    # ---- spatial attention --------------------------------------------------
    init_cls = h[:, 0:1, :]                                           # (B,1,D)
    cls_rep = jnp.broadcast_to(init_cls, (B, T, D)).reshape(B * T, 1, D)
    # TODO(synk): fold this 5-D permutation into the following LN/QKV index_maps
    # to avoid one full HBM pass per layer (bf16 already halves its cost).
    sp = res_t.reshape(B, Hp, Wp, T, D).transpose(0, 3, 1, 2, 4).reshape(B * T, NP, D)
    sp = jnp.concatenate([cls_rep, sp], axis=1)                       # (B*T, 1+NP, D)
    s_in = layer_norm(sp, lp["s_ln_g"], lp["s_ln_b"], eps)
    s_attn = multi_head_attention(
        s_in, lp["s_qkv_w"], lp["s_qkv_b"], lp["s_proj_w"], lp["s_proj_b"], num_heads
    )
    cls_mean = jnp.mean(s_attn[:, 0, :].reshape(B, T, D), axis=1, keepdims=True)
    s_tok = (
        s_attn[:, 1:, :]
        .reshape(B, T, Hp, Wp, D)
        .transpose(0, 2, 3, 1, 4)
        .reshape(B, NP * T, D)
    )
    hidden = jnp.concatenate([init_cls, res_t], axis=1) + jnp.concatenate(
        [cls_mean, s_tok], axis=1
    )

    # ---- MLP: LN -> (fc1 + GELU fused) -> (fc2 + residual fused) -------------
    m_in = layer_norm(hidden, lp["ln2_g"], lp["ln2_b"], eps).reshape(-1, D)
    m = pallas_linear(m_in, lp["mlp_fc1_w"], lp["mlp_fc1_b"], activation="gelu")
    out = pallas_linear(m, lp["mlp_fc2_w"], lp["mlp_fc2_b"],
                        residual=hidden.reshape(-1, D))
    return out.reshape(hidden.shape)


def timesformer_forward(params, images, *, patch_size, num_heads, ln_eps=1e-6):
    """Full TimeSformer.forward (backbone + classifier head + temperature)."""
    B, T, C, H, W = images.shape
    p = patch_size
    Hp, Wp = H // p, W // p
    NP = Hp * Wp
    D = params["patch_w"].shape[1]

    # --- patch embedding: Conv2d(k=s=p) as patch-extract + Pallas matmul ------
    x = images.reshape(B * T, C, Hp, p, Wp, p)
    x = x.transpose(0, 2, 4, 1, 3, 5).reshape(B * T * NP, C * p * p)
    patches = pallas_linear(x, params["patch_w"], params["patch_b"])   # bf16
    emb = patches.reshape(B * T, NP, D)

    cls = jnp.broadcast_to(params["cls_token"].astype(jnp.bfloat16), (B * T, 1, D))
    emb = jnp.concatenate([cls, emb], axis=1)                  # (B*T, 1+NP, D)
    emb = emb + params["pos_emb"].astype(jnp.bfloat16)

    # --- time embeddings (divided space-time) --------------------------------
    cls_tokens = emb[:B, 0:1, :]                               # HF slice semantics
    e = emb[:, 1:, :].reshape(B, T, NP, D).transpose(0, 2, 1, 3).reshape(B * NP, T, D)
    e = e + params["time_emb"].astype(jnp.bfloat16)
    e = e.reshape(B, NP * T, D)
    h = jnp.concatenate([cls_tokens, e], axis=1)               # (B, 1+NP*T, D) bf16

    # --- encoder --------------------------------------------------------------
    for lp in params["layers"]:
        h = timesformer_layer(
            h, lp, B=B, T=T, Hp=Hp, Wp=Wp, num_heads=num_heads, eps=ln_eps
        )

    # --- final backbone layernorm, CLS token ----------------------------------
    h = layer_norm(h, params["final_ln_g"], params["final_ln_b"], ln_eps)
    cls_out = h[:, 0, :].astype(jnp.float32)                   # (B, D)

    # --- classifier head: tiny (B x D) matmuls -> plain XLA (per perf review) --
    y = _jnp_layernorm(cls_out, params["cls_ln_g"], params["cls_ln_b"], 1e-5)
    y = jnp.dot(y, params["fc1_w"]) + params["fc1_b"]
    y = jax.nn.gelu(y, approximate=False)                      # exact erf GELU
    y = jnp.dot(y, params["fc2_w"]) + params["fc2_b"]
    return y / params["temperature"]                           # temperature scaling


# ----------------------------------------------------------------------------
# Deterministic parameter initialization (synthetic, no checkpoint load)
# ----------------------------------------------------------------------------
def init_params(key, *, num_frames, image_size, patch_size, num_channels,
                hidden, intermediate, layers, num_classes, cls_hidden=512):
    num_patches = (image_size // patch_size) ** 2
    keys = iter(jax.random.split(key, 512))

    def nrm(shape, std=0.02, dtype=jnp.bfloat16):
        return (jax.random.normal(next(keys), shape, jnp.float32) * std).astype(dtype)

    params = dict(
        patch_w=nrm((num_channels * patch_size * patch_size, hidden)),
        patch_b=jnp.zeros((hidden,), jnp.float32),
        cls_token=nrm((1, 1, hidden), dtype=jnp.float32),
        pos_emb=nrm((1, num_patches + 1, hidden), dtype=jnp.float32),
        time_emb=nrm((1, num_frames, hidden), dtype=jnp.float32),
        final_ln_g=jnp.ones((hidden,), jnp.float32),
        final_ln_b=jnp.zeros((hidden,), jnp.float32),
        cls_ln_g=jnp.ones((hidden,), jnp.float32),
        cls_ln_b=jnp.zeros((hidden,), jnp.float32),
        fc1_w=nrm((hidden, cls_hidden), dtype=jnp.float32),
        fc1_b=jnp.zeros((cls_hidden,), jnp.float32),
        fc2_w=nrm((cls_hidden, num_classes), dtype=jnp.float32),
        fc2_b=jnp.zeros((num_classes,), jnp.float32),
        temperature=jnp.ones((1,), jnp.float32),
        layers=[],
    )
    for _ in range(layers):
        lp = dict(
            t_ln_g=jnp.ones((hidden,), jnp.float32),
            t_ln_b=jnp.zeros((hidden,), jnp.float32),
            t_qkv_w=nrm((hidden, 3 * hidden)),
            t_qkv_b=jnp.zeros((3 * hidden,), jnp.float32),
            t_proj_w=nrm((hidden, hidden)),
            t_proj_b=jnp.zeros((hidden,), jnp.float32),
            t_dense_w=nrm((hidden, hidden)),
            t_dense_b=jnp.zeros((hidden,), jnp.float32),
            s_ln_g=jnp.ones((hidden,), jnp.float32),
            s_ln_b=jnp.zeros((hidden,), jnp.float32),
            s_qkv_w=nrm((hidden, 3 * hidden)),
            s_qkv_b=jnp.zeros((3 * hidden,), jnp.float32),
            s_proj_w=nrm((hidden, hidden)),
            s_proj_b=jnp.zeros((hidden,), jnp.float32),
            ln2_g=jnp.ones((hidden,), jnp.float32),
            ln2_b=jnp.zeros((hidden,), jnp.float32),
            mlp_fc1_w=nrm((hidden, intermediate)),
            mlp_fc1_b=jnp.zeros((intermediate,), jnp.float32),
            mlp_fc2_w=nrm((intermediate, hidden)),
            mlp_fc2_b=jnp.zeros((hidden,), jnp.float32),
        )
        params["layers"].append(lp)
    return params


# ----------------------------------------------------------------------------
if __name__ == "__main__":
    # Small, shape-consistent config (scaled-down timesformer-hr):
    B, T, C, H, W = 2, 2, 3, 16, 16          # batch, frames, channels, spatial
    PATCH = 8                                # 2x2 = 4 patches per frame
    HIDDEN, HEADS = 128, 2                   # head_dim 64 -> lane-dense head pairs
    INTERMEDIATE, LAYERS, CLASSES = 256, 2, 18

    key = jax.random.PRNGKey(0)
    pkey, xkey = jax.random.split(key)
    params = init_params(
        pkey,
        num_frames=T, image_size=H, patch_size=PATCH, num_channels=C,
        hidden=HIDDEN, intermediate=INTERMEDIATE, layers=LAYERS,
        num_classes=CLASSES,
    )
    images = jax.random.normal(xkey, (B, T, C, H, W), jnp.float32)

    fwd = jax.jit(
        functools.partial(timesformer_forward, patch_size=PATCH, num_heads=HEADS)
    )
    logits = fwd(params, images)
    jax.block_until_ready(logits)
    assert logits.shape == (B, CLASSES) and logits.dtype == jnp.float32
    print("KERNEL_OK")
</pallas_src>

<mosaic_0001>
module attributes {stable_mosaic.version = 11 : i64} {
  func.func @_linear_resident_kernel(%arg0: i32, %arg1: memref<16x256xbf16, #tpu.memory_space<vmem>>, %arg2: memref<256x128xbf16, #tpu.memory_space<vmem>>, %arg3: memref<1x128xf32, #tpu.memory_space<vmem>>, %arg4: memref<16x128xbf16, #tpu.memory_space<vmem>>) attributes {dimension_semantics = [#tpu.dimension_semantics<parallel>], iteration_bounds = array<i64: 1>, scalar_prefetch = 0 : i64, scratch_operands = 0 : i64, tpu.core_type = #tpu.core_type<tc>, window_params = [{transform_indices = @transform_0, window_bounds = array<i64: 16, 256>}, {pipeline_mode = #tpu.pipeline_mode<synchronous>, transform_indices = @transform_1, window_bounds = array<i64: 256, 128>}, {pipeline_mode = #tpu.pipeline_mode<synchronous>, transform_indices = @transform_2, window_bounds = array<i64: 1, 128>}, {transform_indices = @transform_3, window_bounds = array<i64: 16, 128>}]} {
    %c0 = arith.constant 0 : index
    %c0_0 = arith.constant 0 : index
    %0 = vector.load %arg1[%c0, %c0_0] : memref<16x256xbf16, #tpu.memory_space<vmem>>, vector<16x256xbf16>
    %c0_1 = arith.constant 0 : index
    %c0_2 = arith.constant 0 : index
    %1 = vector.load %arg2[%c0_1, %c0_2] : memref<256x128xbf16, #tpu.memory_space<vmem>>, vector<256x128xbf16>
    %cst = arith.constant dense<0.000000e+00> : vector<16x128xf32>
    %2 = tpu.matmul %0, %1, %cst {dimension_numbers = #tpu.dot_dimension_numbers<[1], [0], [0], [1], [0, 0, 1, 1], [], []>} : vector<16x256xbf16>, vector<256x128xbf16>, vector<16x128xf32> -> vector<16x128xf32>
    %c0_3 = arith.constant 0 : index
    %c0_4 = arith.constant 0 : index
    %3 = vector.load %arg3[%c0_3, %c0_4] : memref<1x128xf32, #tpu.memory_space<vmem>>, vector<1x128xf32>
    %4 = vector.broadcast %3 : vector<1x128xf32> to vector<16x128xf32>
    %5 = arith.addf %2, %4 : vector<16x128xf32>
    %6 = arith.truncf %5 : vector<16x128xf32> to vector<16x128xbf16>
    %c0_5 = arith.constant 0 : index
    %c0_6 = arith.constant 0 : index
    %7 = vector.load %arg4[%c0_5, %c0_6] : memref<16x128xbf16, #tpu.memory_space<vmem>>, vector<16x128xbf16>
    tpu.vector_store %arg4[%c0_5, %c0_6], %6 {strides = array<i32>} : memref<16x128xbf16, #tpu.memory_space<vmem>>, vector<16x128xbf16>,
    return
  }
  func.func @transform_0(%arg0: i32) -> (i32, i32) {
    %c0_i32 = arith.constant 0 : i32
    %c0_i32_0 = arith.constant 0 : i32
    return %arg0, %c0_i32 : i32, i32
  }
  func.func @transform_1(%arg0: i32) -> (i32, i32) {
    %c0_i32 = arith.constant 0 : i32
    %c0_i32_0 = arith.constant 0 : i32
    %c0_i32_1 = arith.constant 0 : i32
    return %c0_i32, %c0_i32_0 : i32, i32
  }
  func.func @transform_2(%arg0: i32) -> (i32, i32) {
    %c0_i32 = arith.constant 0 : i32
    %c0_i32_0 = arith.constant 0 : i32
    %c0_i32_1 = arith.constant 0 : i32
    return %c0_i32, %c0_i32_0 : i32, i32
  }
  func.func @transform_3(%arg0: i32) -> (i32, i32) {
    %c0_i32 = arith.constant 0 : i32
    %c0_i32_0 = arith.constant 0 : i32
    return %arg0, %c0_i32 : i32, i32
  }
}

module attributes {stable_mosaic.version = 11 : i64} {
  func.func @_layernorm_kernel(%arg0: i32, %arg1: memref<16x128xbf16, #tpu.memory_space<vmem>>, %arg2: memref<1x128xf32, #tpu.memory_space<vmem>>, %arg3: memref<1x128xf32, #tpu.memory_space<vmem>>, %arg4: memref<16x128xbf16, #tpu.memory_space<vmem>>) attributes {dimension_semantics = [#tpu.dimension_semantics<parallel>], iteration_bounds = array<i64: 1>, scalar_prefetch = 0 : i64, scratch_operands = 0 : i64, tpu.core_type = #tpu.core_type<tc>, window_params = [{transform_indices = @transform_0, window_bounds = array<i64: 16, 128>}, {pipeline_mode = #tpu.pipeline_mode<synchronous>, transform_indices = @transform_1, window_bounds = array<i64: 1, 128>}, {pipeline_mode = #tpu.pipeline_mode<synchronous>, transform_indices = @transform_2, window_bounds = array<i64: 1, 128>}, {transform_indices = @transform_3, window_bounds = array<i64: 16, 128>}]} {
    %c0 = arith.constant 0 : index
    %c0_0 = arith.constant 0 : index
    %0 = vector.load %arg1[%c0, %c0_0] : memref<16x128xbf16, #tpu.memory_space<vmem>>, vector<16x128xbf16>
    %1 = arith.extf %0 : vector<16x128xbf16> to vector<16x128xf32>
    %cst = arith.constant dense<0.000000e+00> : vector<16xf32>
    %2 = vector.multi_reduction <add>, %1, %cst [1] : vector<16x128xf32> to vector<16xf32>
    %3 = vector.shape_cast %2 : vector<16xf32> to vector<16x1xf32>
    %cst_1 = arith.constant 1.280000e+02 : f32
    %4 = vector.broadcast %cst_1 : f32 to vector<16x1xf32>
    %5 = arith.divf %3, %4 : vector<16x1xf32>
    %6 = vector.broadcast %5 : vector<16x1xf32> to vector<16x128xf32>
    %7 = arith.subf %1, %6 : vector<16x128xf32>
    %8 = arith.mulf %7, %7 : vector<16x128xf32>
    %cst_2 = arith.constant dense<0.000000e+00> : vector<16xf32>
    %9 = vector.multi_reduction <add>, %8, %cst_2 [1] : vector<16x128xf32> to vector<16xf32>
    %10 = vector.shape_cast %9 : vector<16xf32> to vector<16x1xf32>
    %cst_3 = arith.constant 1.280000e+02 : f32
    %11 = vector.broadcast %cst_3 : f32 to vector<16x1xf32>
    %12 = arith.divf %10, %11 : vector<16x1xf32>
    %cst_4 = arith.constant 9.99999997E-7 : f32
    %13 = vector.broadcast %cst_4 : f32 to vector<16x1xf32>
    %14 = arith.addf %12, %13 : vector<16x1xf32>
    %15 = math.rsqrt %14 : vector<16x1xf32>
    %16 = vector.broadcast %15 : vector<16x1xf32> to vector<16x128xf32>
    %17 = arith.mulf %7, %16 : vector<16x128xf32>
    %c0_5 = arith.constant 0 : index
    %c0_6 = arith.constant 0 : index
    %18 = vector.load %arg2[%c0_5, %c0_6] : memref<1x128xf32, #tpu.memory_space<vmem>>, vector<1x128xf32>
    %19 = vector.broadcast %18 : vector<1x128xf32> to vector<16x128xf32>
    %20 = arith.mulf %17, %19 : vector<16x128xf32>
    %c0_7 = arith.constant 0 : index
    %c0_8 = arith.constant 0 : index
    %21 = vector.load %arg3[%c0_7, %c0_8] : memref<1x128xf32, #tpu.memory_space<vmem>>, vector<1x128xf32>
    %22 = vector.broadcast %21 : vector<1x128xf32> to vector<16x128xf32>
    %23 = arith.addf %20, %22 : vector<16x128xf32>
    %24 = arith.truncf %23 : vector<16x128xf32> to vector<16x128xbf16>
    %c0_9 = arith.constant 0 : index
    %c0_10 = arith.constant 0 : index
    %25 = vector.load %arg4[%c0_9, %c0_10] : memref<16x128xbf16, #tpu.memory_space<vmem>>, vector<16x128xbf16>
    tpu.vector_store %arg4[%c0_9, %c0_10], %24 {strides = array<i32>} : memref<16x128xbf16, #tpu.memory_space<vmem>>, vector<16x128xbf16>,
    return
  }
  func.func @transform_0(%arg0: i32) -> (i32, i32) {
    %c0_i32 = arith.constant 0 : i32
    %c0_i32_0 = arith.constant 0 : i32
    return %arg0, %c0_i32 : i32, i32
  }
  func.func @transform_1(%arg0: i32) -> (i32, i32) {
    %c0_i32 = arith.constant 0 : i32
    %c0_i32_0 = arith.constant 0 : i32
    %c0_i32_1 = arith.constant 0 : i32
    return %c0_i32, %c0_i32_0 : i32, i32
  }
  func.func @transform_2(%arg0: i32) -> (i32, i32) {
    %c0_i32 = arith.constant 0 : i32
    %c0_i32_0 = arith.constant 0 : i32
    %c0_i32_1 = arith.constant 0 : i32
    return %c0_i32, %c0_i32_0 : i32, i32
  }
  func.func @transform_3(%arg0: i32) -> (i32, i32) {
    %c0_i32 = arith.constant 0 : i32
    %c0_i32_0 = arith.constant 0 : i32
    return %arg0, %c0_i32 : i32, i32
  }
}

module attributes {stable_mosaic.version = 11 : i64} {
  func.func @_linear_resident_kernel(%arg0: i32, %arg1: memref<16x128xbf16, #tpu.memory_space<vmem>>, %arg2: memref<128x384xbf16, #tpu.memory_space<vmem>>, %arg3: memref<1x384xf32, #tpu.memory_space<vmem>>, %arg4: memref<16x384xbf16, #tpu.memory_space<vmem>>) attributes {dimension_semantics = [#tpu.dimension_semantics<parallel>], iteration_bounds = array<i64: 1>, scalar_prefetch = 0 : i64, scratch_operands = 0 : i64, tpu.core_type = #tpu.core_type<tc>, window_params = [{transform_indices = @transform_0, window_bounds = array<i64: 16, 128>}, {pipeline_mode = #tpu.pipeline_mode<synchronous>, transform_indices = @transform_1, window_bounds = array<i64: 128, 384>}, {pipeline_mode = #tpu.pipeline_mode<synchronous>, transform_indices = @transform_2, window_bounds = array<i64: 1, 384>}, {transform_indices = @transform_3, window_bounds = array<i64: 16, 384>}]} {
    %c0 = arith.constant 0 : index
    %c0_0 = arith.constant 0 : index
    %0 = vector.load %arg1[%c0, %c0_0] : memref<16x128xbf16, #tpu.memory_space<vmem>>, vector<16x128xbf16>
    %c0_1 = arith.constant 0 : index
    %c0_2 = arith.constant 0 : index
    %1 = vector.load %arg2[%c0_1, %c0_2] : memref<128x384xbf16, #tpu.memory_space<vmem>>, vector<128x384xbf16>
    %cst = arith.constant dense<0.000000e+00> : vector<16x384xf32>
    %2 = tpu.matmul %0, %1, %cst {dimension_numbers = #tpu.dot_dimension_numbers<[1], [0], [0], [1], [0, 0, 1, 1], [], []>} : vector<16x128xbf16>, vector<128x384xbf16>, vector<16x384xf32> -> vector<16x384xf32>
    %c0_3 = arith.constant 0 : index
    %c0_4 = arith.constant 0 : index
    %3 = vector.load %arg3[%c0_3, %c0_4] : memref<1x384xf32, #tpu.memory_space<vmem>>, vector<1x384xf32>
    %4 = vector.broadcast %3 : vector<1x384xf32> to vector<16x384xf32>
    %5 = arith.addf %2, %4 : vector<16x384xf32>
    %6 = arith.truncf %5 : vector<16x384xf32> to vector<16x384xbf16>
    %c0_5 = arith.constant 0 : index
    %c0_6 = arith.constant 0 : index
    %7 = vector.load %arg4[%c0_5, %c0_6] : memref<16x384xbf16, #tpu.memory_space<vmem>>, vector<16x384xbf16>
    tpu.vector_store %arg4[%c0_5, %c0_6], %6 {strides = array<i32>} : memref<16x384xbf16, #tpu.memory_space<vmem>>, vector<16x384xbf16>,
    return
  }
  func.func @transform_0(%arg0: i32) -> (i32, i32) {
    %c0_i32 = arith.constant 0 : i32
    %c0_i32_0 = arith.constant 0 : i32
    return %arg0, %c0_i32 : i32, i32
  }
  func.func @transform_1(%arg0: i32) -> (i32, i32) {
    %c0_i32 = arith.constant 0 : i32
    %c0_i32_0 = arith.constant 0 : i32
    %c0_i32_1 = arith.constant 0 : i32
    return %c0_i32, %c0_i32_0 : i32, i32
  }
  func.func @transform_2(%arg0: i32) -> (i32, i32) {
    %c0_i32 = arith.constant 0 : i32
    %c0_i32_0 = arith.constant 0 : i32
    %c0_i32_1 = arith.constant 0 : i32
    return %c0_i32, %c0_i32_0 : i32, i32
  }
  func.func @transform_3(%arg0: i32) -> (i32, i32) {
    %c0_i32 = arith.constant 0 : i32
    %c0_i32_0 = arith.constant 0 : i32
    return %arg0, %c0_i32 : i32, i32
  }
}

module attributes {stable_mosaic.version = 11 : i64} {
  func.func @_attention_kernel(%arg0: i32, %arg1: i32, %arg2: memref<8x2x128xbf16, #tpu.memory_space<vmem>>, %arg3: memref<8x2x128xbf16, #tpu.memory_space<vmem>>, %arg4: memref<8x2x128xbf16, #tpu.memory_space<vmem>>, %arg5: memref<8x2x128xbf16, #tpu.memory_space<vmem>>) attributes {dimension_semantics = [#tpu.dimension_semantics<parallel>, #tpu.dimension_semantics<parallel>], iteration_bounds = array<i64: 1, 1>, scalar_prefetch = 0 : i64, scratch_operands = 0 : i64, tpu.core_type = #tpu.core_type<tc>, window_params = [{transform_indices = @transform_0, window_bounds = array<i64: 8, 2, 128>}, {transform_indices = @transform_1, window_bounds = array<i64: 8, 2, 128>}, {transform_indices = @transform_2, window_bounds = array<i64: 8, 2, 128>}, {transform_indices = @transform_3, window_bounds = array<i64: 8, 2, 128>}]} {
    %c0 = arith.constant 0 : index
    %c0_0 = arith.constant 0 : index
    %c0_1 = arith.constant 0 : index
    %0 = vector.load %arg2[%c0, %c0_0, %c0_1] : memref<8x2x128xbf16, #tpu.memory_space<vmem>>, vector<8x2x128xbf16>
    %c0_2 = arith.constant 0 : index
    %c0_3 = arith.constant 0 : index
    %c0_4 = arith.constant 0 : index
    %1 = vector.load %arg3[%c0_2, %c0_3, %c0_4] : memref<8x2x128xbf16, #tpu.memory_space<vmem>>, vector<8x2x128xbf16>
    %c0_5 = arith.constant 0 : index
    %c0_6 = arith.constant 0 : index
    %c0_7 = arith.constant 0 : index
    %2 = vector.load %arg4[%c0_5, %c0_6, %c0_7] : memref<8x2x128xbf16, #tpu.memory_space<vmem>>, vector<8x2x128xbf16>
    %3 = vector.extract_strided_slice %0 {offsets = [0, 0, 0], sizes = [8, 2, 64], strides = [1, 1, 1]} : vector<8x2x128xbf16> to vector<8x2x64xbf16>
    %cst = arith.constant 1.250000e-01 : bf16
    %4 = vector.broadcast %cst : bf16 to vector<8x2x64xbf16>
    %5 = arith.mulf %3, %4 : vector<8x2x64xbf16>
    %6 = vector.extract_strided_slice %1 {offsets = [0, 0, 0], sizes = [8, 2, 64], strides = [1, 1, 1]} : vector<8x2x128xbf16> to vector<8x2x64xbf16>
    "tpu.trace_start"() <{level = 10 : i32, message = "bsd,btd->bst"}> : () -> ()
    %cst_8 = arith.constant dense<0.000000e+00> : vector<8x2x2xf32>
    %7 = tpu.matmul %5, %6, %cst_8 {dimension_numbers = #tpu.dot_dimension_numbers<[2], [2], [1], [1], [0, 0, 0, 1, 1, 1], [0], [0]>} : vector<8x2x64xbf16>, vector<8x2x64xbf16>, vector<8x2x2xf32> -> vector<8x2x2xf32>
    "tpu.trace_stop"() : () -> ()
    %cst_9 = arith.constant dense<0xFF800000> : vector<8x2xf32>
    %8 = vector.multi_reduction <maximumf>, %7, %cst_9 [2] : vector<8x2x2xf32> to vector<8x2xf32>
    %9 = vector.shape_cast %8 : vector<8x2xf32> to vector<8x2x1xf32>
    %10 = vector.broadcast %9 : vector<8x2x1xf32> to vector<8x2x2xf32>
    %11 = arith.subf %7, %10 : vector<8x2x2xf32>
    %12 = math.exp %11 : vector<8x2x2xf32>
    %cst_10 = arith.constant dense<0.000000e+00> : vector<8x2xf32>
    %13 = vector.multi_reduction <add>, %12, %cst_10 [2] : vector<8x2x2xf32> to vector<8x2xf32>
    %14 = vector.shape_cast %13 : vector<8x2xf32> to vector<8x2x1xf32>
    %15 = arith.truncf %12 : vector<8x2x2xf32> to vector<8x2x2xbf16>
    %16 = vector.extract_strided_slice %2 {offsets = [0, 0, 0], sizes = [8, 2, 64], strides = [1, 1, 1]} : vector<8x2x128xbf16> to vector<8x2x64xbf16>
    "tpu.trace_start"() <{level = 10 : i32, message = "bst,btd->bsd"}> : () -> ()
    %cst_11 = arith.constant dense<0.000000e+00> : vector<8x2x64xf32>
    %17 = tpu.matmul %15, %16, %cst_11 {dimension_numbers = #tpu.dot_dimension_numbers<[2], [1], [1], [2], [0, 0, 0, 1, 1, 2], [0], [0]>} : vector<8x2x2xbf16>, vector<8x2x64xbf16>, vector<8x2x64xf32> -> vector<8x2x64xf32>
    "tpu.trace_stop"() : () -> ()
    %18 = tpu.reciprocal %14 {approx = true} : vector<8x2x1xf32> -> vector<8x2x1xf32>
    %19 = vector.broadcast %18 : vector<8x2x1xf32> to vector<8x2x64xf32>
    %20 = arith.mulf %17, %19 : vector<8x2x64xf32>
    %21 = arith.truncf %20 : vector<8x2x64xf32> to vector<8x2x64xbf16>
    %c0_12 = arith.constant 0 : index
    %c0_13 = arith.constant 0 : index
    %c0_14 = arith.constant 0 : index
    %22 = vector.load %arg5[%c0_12, %c0_13, %c0_14] : memref<8x2x128xbf16, #tpu.memory_space<vmem>>, vector<8x2x64xbf16>
    tpu.vector_store %arg5[%c0_12, %c0_13, %c0_14], %21 {strides = array<i32>} : memref<8x2x128xbf16, #tpu.memory_space<vmem>>, vector<8x2x64xbf16>,
    %23 = vector.extract_strided_slice %0 {offsets = [0, 0, 64], sizes = [8, 2, 64], strides = [1, 1, 1]} : vector<8x2x128xbf16> to vector<8x2x64xbf16>
    %cst_15 = arith.constant 1.250000e-01 : bf16
    %24 = vector.broadcast %cst_15 : bf16 to vector<8x2x64xbf16>
    %25 = arith.mulf %23, %24 : vector<8x2x64xbf16>
    %26 = vector.extract_strided_slice %1 {offsets = [0, 0, 64], sizes = [8, 2, 64], strides = [1, 1, 1]} : vector<8x2x128xbf16> to vector<8x2x64xbf16>
    "tpu.trace_start"() <{level = 10 : i32, message = "bsd,btd->bst"}> : () -> ()
    %cst_16 = arith.constant dense<0.000000e+00> : vector<8x2x2xf32>
    %27 = tpu.matmul %25, %26, %cst_16 {dimension_numbers = #tpu.dot_dimension_numbers<[2], [2], [1], [1], [0, 0, 0, 1, 1, 1], [0], [0]>} : vector<8x2x64xbf16>, vector<8x2x64xbf16>, vector<8x2x2xf32> -> vector<8x2x2xf32>
    "tpu.trace_stop"() : () -> ()
    %cst_17 = arith.constant dense<0xFF800000> : vector<8x2xf32>
    %28 = vector.multi_reduction <maximumf>, %27, %cst_17 [2] : vector<8x2x2xf32> to vector<8x2xf32>
    %29 = vector.shape_cast %28 : vector<8x2xf32> to vector<8x2x1xf32>
    %30 = vector.broadcast %29 : vector<8x2x1xf32> to vector<8x2x2xf32>
    %31 = arith.subf %27, %30 : vector<8x2x2xf32>
    %32 = math.exp %31 : vector<8x2x2xf32>
    %cst_18 = arith.constant dense<0.000000e+00> : vector<8x2xf32>
    %33 = vector.multi_reduction <add>, %32, %cst_18 [2] : vector<8x2x2xf32> to vector<8x2xf32>
    %34 = vector.shape_cast %33 : vector<8x2xf32> to vector<8x2x1xf32>
    %35 = arith.truncf %32 : vector<8x2x2xf32> to vector<8x2x2xbf16>
    %36 = vector.extract_strided_slice %2 {offsets = [0, 0, 64], sizes = [8, 2, 64], strides = [1, 1, 1]} : vector<8x2x128xbf16> to vector<8x2x64xbf16>
    "tpu.trace_start"() <{level = 10 : i32, message = "bst,btd->bsd"}> : () -> ()
    %cst_19 = arith.constant dense<0.000000e+00> : vector<8x2x64xf32>
    %37 = tpu.matmul %35, %36, %cst_19 {dimension_numbers = #tpu.dot_dimension_numbers<[2], [1], [1], [2], [0, 0, 0, 1, 1, 2], [0], [0]>} : vector<8x2x2xbf16>, vector<8x2x64xbf16>, vector<8x2x64xf32> -> vector<8x2x64xf32>
    "tpu.trace_stop"() : () -> ()
    %38 = tpu.reciprocal %34 {approx = true} : vector<8x2x1xf32> -> vector<8x2x1xf32>
    %39 = vector.broadcast %38 : vector<8x2x1xf32> to vector<8x2x64xf32>
    %40 = arith.mulf %37, %39 : vector<8x2x64xf32>
    %41 = arith.truncf %40 : vector<8x2x64xf32> to vector<8x2x64xbf16>
    %c0_20 = arith.constant 0 : index
    %c0_21 = arith.constant 0 : index
    %c64 = arith.constant 64 : index
    %42 = vector.load %arg5[%c0_20, %c0_21, %c64] : memref<8x2x128xbf16, #tpu.memory_space<vmem>>, vector<8x2x64xbf16>
    tpu.vector_store %arg5[%c0_20, %c0_21, %c64], %41 {strides = array<i32>} : memref<8x2x128xbf16, #tpu.memory_space<vmem>>, vector<8x2x64xbf16>,
    return
  }
  func.func @transform_0(%arg0: i32, %arg1: i32) -> (i32, i32, i32) {
    %c0_i32 = arith.constant 0 : i32
    %c0_i32_0 = arith.constant 0 : i32
    return %arg0, %c0_i32, %arg1 : i32, i32, i32
  }
  func.func @transform_1(%arg0: i32, %arg1: i32) -> (i32, i32, i32) {
    %c1_i32 = arith.constant 1 : i32
    %0 = arith.addi %c1_i32, %arg1 : i32
    %c0_i32 = arith.constant 0 : i32
    %c0_i32_0 = arith.constant 0 : i32
    return %arg0, %c0_i32, %0 : i32, i32, i32
  }
  func.func @transform_2(%arg0: i32, %arg1: i32) -> (i32, i32, i32) {
    %c2_i32 = arith.constant 2 : i32
    %0 = arith.addi %c2_i32, %arg1 : i32
    %c0_i32 = arith.constant 0 : i32
    %c0_i32_0 = arith.constant 0 : i32
    return %arg0, %c0_i32, %0 : i32, i32, i32
  }
  func.func @transform_3(%arg0: i32, %arg1: i32) -> (i32, i32, i32) {
    %c0_i32 = arith.constant 0 : i32
    %c0_i32_0 = arith.constant 0 : i32
    return %arg0, %c0_i32, %arg1 : i32, i32, i32
  }
}

module attributes {stable_mosaic.version = 11 : i64} {
  func.func @_linear_resident_kernel(%arg0: i32, %arg1: memref<16x128xbf16, #tpu.memory_space<vmem>>, %arg2: memref<128x128xbf16, #tpu.memory_space<vmem>>, %arg3: memref<1x128xf32, #tpu.memory_space<vmem>>, %arg4: memref<16x128xbf16, #tpu.memory_space<vmem>>) attributes {dimension_semantics = [#tpu.dimension_semantics<parallel>], iteration_bounds = array<i64: 1>, scalar_prefetch = 0 : i64, scratch_operands = 0 : i64, tpu.core_type = #tpu.core_type<tc>, window_params = [{transform_indices = @transform_0, window_bounds = array<i64: 16, 128>}, {pipeline_mode = #tpu.pipeline_mode<synchronous>, transform_indices = @transform_1, window_bounds = array<i64: 128, 128>}, {pipeline_mode = #tpu.pipeline_mode<synchronous>, transform_indices = @transform_2, window_bounds = array<i64: 1, 128>}, {transform_indices = @transform_3, window_bounds = array<i64: 16, 128>}]} {
    %c0 = arith.constant 0 : index
    %c0_0 = arith.constant 0 : index
    %0 = vector.load %arg1[%c0, %c0_0] : memref<16x128xbf16, #tpu.memory_space<vmem>>, vector<16x128xbf16>
    %c0_1 = arith.constant 0 : index
    %c0_2 = arith.constant 0 : index
    %1 = vector.load %arg2[%c0_1, %c0_2] : memref<128x128xbf16, #tpu.memory_space<vmem>>, vector<128x128xbf16>
    %cst = arith.constant dense<0.000000e+00> : vector<16x128xf32>
    %2 = tpu.matmul %0, %1, %cst {dimension_numbers = #tpu.dot_dimension_numbers<[1], [0], [0], [1], [0, 0, 1, 1], [], []>} : vector<16x128xbf16>, vector<128x128xbf16>, vector<16x128xf32> -> vector<16x128xf32>
    %c0_3 = arith.constant 0 : index
    %c0_4 = arith.constant 0 : index
    %3 = vector.load %arg3[%c0_3, %c0_4] : memref<1x128xf32, #tpu.memory_space<vmem>>, vector<1x128xf32>
    %4 = vector.broadcast %3 : vector<1x128xf32> to vector<16x128xf32>
    %5 = arith.addf %2, %4 : vector<16x128xf32>
    %6 = arith.truncf %5 : vector<16x128xf32> to vector<16x128xbf16>
    %c0_5 = arith.constant 0 : index
    %c0_6 = arith.constant 0 : index
    %7 = vector.load %arg4[%c0_5, %c0_6] : memref<16x128xbf16, #tpu.memory_space<vmem>>, vector<16x128xbf16>
    tpu.vector_store %arg4[%c0_5, %c0_6], %6 {strides = array<i32>} : memref<16x128xbf16, #tpu.memory_space<vmem>>, vector<16x128xbf16>,
    return
  }
  func.func @transform_0(%arg0: i32) -> (i32, i32) {
    %c0_i32 = arith.constant 0 : i32
    %c0_i32_0 = arith.constant 0 : i32
    return %arg0, %c0_i32 : i32, i32
  }
  func.func @transform_1(%arg0: i32) -> (i32, i32) {
    %c0_i32 = arith.constant 0 : i32
    %c0_i32_0 = arith.constant 0 : i32
    %c0_i32_1 = arith.constant 0 : i32
    return %c0_i32, %c0_i32_0 : i32, i32
  }
  func.func @transform_2(%arg0: i32) -> (i32, i32) {
    %c0_i32 = arith.constant 0 : i32
    %c0_i32_0 = arith.constant 0 : i32
    %c0_i32_1 = arith.constant 0 : i32
    return %c0_i32, %c0_i32_0 : i32, i32
  }
  func.func @transform_3(%arg0: i32) -> (i32, i32) {
    %c0_i32 = arith.constant 0 : i32
    %c0_i32_0 = arith.constant 0 : i32
    return %arg0, %c0_i32 : i32, i32
  }
}

module attributes {stable_mosaic.version = 11 : i64} {
  func.func @_linear_resident_kernel(%arg0: i32, %arg1: memref<16x128xbf16, #tpu.memory_space<vmem>>, %arg2: memref<128x128xbf16, #tpu.memory_space<vmem>>, %arg3: memref<1x128xf32, #tpu.memory_space<vmem>>, %arg4: memref<16x128xbf16, #tpu.memory_space<vmem>>, %arg5: memref<16x128xbf16, #tpu.memory_space<vmem>>) attributes {dimension_semantics = [#tpu.dimension_semantics<parallel>], iteration_bounds = array<i64: 1>, scalar_prefetch = 0 : i64, scratch_operands = 0 : i64, tpu.core_type = #tpu.core_type<tc>, window_params = [{transform_indices = @transform_0, window_bounds = array<i64: 16, 128>}, {pipeline_mode = #tpu.pipeline_mode<synchronous>, transform_indices = @transform_1, window_bounds = array<i64: 128, 128>}, {pipeline_mode = #tpu.pipeline_mode<synchronous>, transform_indices = @transform_2, window_bounds = array<i64: 1, 128>}, {transform_indices = @transform_3, window_bounds = array<i64: 16, 128>}, {transform_indices = @transform_4, window_bounds = array<i64: 16, 128>}]} {
    %c0 = arith.constant 0 : index
    %c0_0 = arith.constant 0 : index
    %0 = vector.load %arg1[%c0, %c0_0] : memref<16x128xbf16, #tpu.memory_space<vmem>>, vector<16x128xbf16>
    %c0_1 = arith.constant 0 : index
    %c0_2 = arith.constant 0 : index
    %1 = vector.load %arg2[%c0_1, %c0_2] : memref<128x128xbf16, #tpu.memory_space<vmem>>, vector<128x128xbf16>
    %cst = arith.constant dense<0.000000e+00> : vector<16x128xf32>
    %2 = tpu.matmul %0, %1, %cst {dimension_numbers = #tpu.dot_dimension_numbers<[1], [0], [0], [1], [0, 0, 1, 1], [], []>} : vector<16x128xbf16>, vector<128x128xbf16>, vector<16x128xf32> -> vector<16x128xf32>
    %c0_3 = arith.constant 0 : index
    %c0_4 = arith.constant 0 : index
    %3 = vector.load %arg3[%c0_3, %c0_4] : memref<1x128xf32, #tpu.memory_space<vmem>>, vector<1x128xf32>
    %4 = vector.broadcast %3 : vector<1x128xf32> to vector<16x128xf32>
    %5 = arith.addf %2, %4 : vector<16x128xf32>
    %c0_5 = arith.constant 0 : index
    %c0_6 = arith.constant 0 : index
    %6 = vector.load %arg4[%c0_5, %c0_6] : memref<16x128xbf16, #tpu.memory_space<vmem>>, vector<16x128xbf16>
    %7 = arith.extf %6 : vector<16x128xbf16> to vector<16x128xf32>
    %8 = arith.addf %5, %7 : vector<16x128xf32>
    %9 = arith.truncf %8 : vector<16x128xf32> to vector<16x128xbf16>
    %c0_7 = arith.constant 0 : index
    %c0_8 = arith.constant 0 : index
    %10 = vector.load %arg5[%c0_7, %c0_8] : memref<16x128xbf16, #tpu.memory_space<vmem>>, vector<16x128xbf16>
    tpu.vector_store %arg5[%c0_7, %c0_8], %9 {strides = array<i32>} : memref<16x128xbf16, #tpu.memory_space<vmem>>, vector<16x128xbf16>,
    return
  }
  func.func @transform_0(%arg0: i32) -> (i32, i32) {
    %c0_i32 = arith.constant 0 : i32
    %c0_i32_0 = arith.constant 0 : i32
    return %arg0, %c0_i32 : i32, i32
  }
  func.func @transform_1(%arg0: i32) -> (i32, i32) {
    %c0_i32 = arith.constant 0 : i32
    %c0_i32_0 = arith.constant 0 : i32
    %c0_i32_1 = arith.constant 0 : i32
    return %c0_i32, %c0_i32_0 : i32, i32
  }
  func.func @transform_2(%arg0: i32) -> (i32, i32) {
    %c0_i32 = arith.constant 0 : i32
    %c0_i32_0 = arith.constant 0 : i32
    %c0_i32_1 = arith.constant 0 : i32
    return %c0_i32, %c0_i32_0 : i32, i32
  }
  func.func @transform_3(%arg0: i32) -> (i32, i32) {
    %c0_i32 = arith.constant 0 : i32
    %c0_i32_0 = arith.constant 0 : i32
    return %arg0, %c0_i32 : i32, i32
  }
  func.func @transform_4(%arg0: i32) -> (i32, i32) {
    %c0_i32 = arith.constant 0 : i32
    %c0_i32_0 = arith.constant 0 : i32
    return %arg0, %c0_i32 : i32, i32
  }
}

module attributes {stable_mosaic.version = 11 : i64} {
  func.func @_layernorm_kernel(%arg0: i32, %arg1: memref<24x128xbf16, #tpu.memory_space<vmem>>, %arg2: memref<1x128xf32, #tpu.memory_space<vmem>>, %arg3: memref<1x128xf32, #tpu.memory_space<vmem>>, %arg4: memref<24x128xbf16, #tpu.memory_space<vmem>>) attributes {dimension_semantics = [#tpu.dimension_semantics<parallel>], iteration_bounds = array<i64: 1>, scalar_prefetch = 0 : i64, scratch_operands = 0 : i64, tpu.core_type = #tpu.core_type<tc>, window_params = [{transform_indices = @transform_0, window_bounds = array<i64: 24, 128>}, {pipeline_mode = #tpu.pipeline_mode<synchronous>, transform_indices = @transform_1, window_bounds = array<i64: 1, 128>}, {pipeline_mode = #tpu.pipeline_mode<synchronous>, transform_indices = @transform_2, window_bounds = array<i64: 1, 128>}, {transform_indices = @transform_3, window_bounds = array<i64: 24, 128>}]} {
    %c0 = arith.constant 0 : index
    %c0_0 = arith.constant 0 : index
    %0 = vector.load %arg1[%c0, %c0_0] : memref<24x128xbf16, #tpu.memory_space<vmem>>, vector<24x128xbf16>
    %1 = arith.extf %0 : vector<24x128xbf16> to vector<24x128xf32>
    %cst = arith.constant dense<0.000000e+00> : vector<24xf32>
    %2 = vector.multi_reduction <add>, %1, %cst [1] : vector<24x128xf32> to vector<24xf32>
    %3 = vector.shape_cast %2 : vector<24xf32> to vector<24x1xf32>
    %cst_1 = arith.constant 1.280000e+02 : f32
    %4 = vector.broadcast %cst_1 : f32 to vector<24x1xf32>
    %5 = arith.divf %3, %4 : vector<24x1xf32>
    %6 = vector.broadcast %5 : vector<24x1xf32> to vector<24x128xf32>
    %7 = arith.subf %1, %6 : vector<24x128xf32>
    %8 = arith.mulf %7, %7 : vector<24x128xf32>
    %cst_2 = arith.constant dense<0.000000e+00> : vector<24xf32>
    %9 = vector.multi_reduction <add>, %8, %cst_2 [1] : vector<24x128xf32> to vector<24xf32>
    %10 = vector.shape_cast %9 : vector<24xf32> to vector<24x1xf32>
    %cst_3 = arith.constant 1.280000e+02 : f32
    %11 = vector.broadcast %cst_3 : f32 to vector<24x1xf32>
    %12 = arith.divf %10, %11 : vector<24x1xf32>
    %cst_4 = arith.constant 9.99999997E-7 : f32
    %13 = vector.broadcast %cst_4 : f32 to vector<24x1xf32>
    %14 = arith.addf %12, %13 : vector<24x1xf32>
    %15 = math.rsqrt %14 : vector<24x1xf32>
    %16 = vector.broadcast %15 : vector<24x1xf32> to vector<24x128xf32>
    %17 = arith.mulf %7, %16 : vector<24x128xf32>
    %c0_5 = arith.constant 0 : index
    %c0_6 = arith.constant 0 : index
    %18 = vector.load %arg2[%c0_5, %c0_6] : memref<1x128xf32, #tpu.memory_space<vmem>>, vector<1x128xf32>
    %19 = vector.broadcast %18 : vector<1x128xf32> to vector<24x128xf32>
    %20 = arith.mulf %17, %19 : vector<24x128xf32>
    %c0_7 = arith.constant 0 : index
    %c0_8 = arith.constant 0 : index
    %21 = vector.load %arg3[%c0_7, %c0_8] : memref<1x128xf32, #tpu.memory_space<vmem>>, vector<1x128xf32>
    %22 = vector.broadcast %21 : vector<1x128xf32> to vector<24x128xf32>
    %23 = arith.addf %20, %22 : vector<24x128xf32>
    %24 = arith.truncf %23 : vector<24x128xf32> to vector<24x128xbf16>
    %c0_9 = arith.constant 0 : index
    %c0_10 = arith.constant 0 : index
    %25 = vector.load %arg4[%c0_9, %c0_10] : memref<24x128xbf16, #tpu.memory_space<vmem>>, vector<24x128xbf16>
    tpu.vector_store %arg4[%c0_9, %c0_10], %24 {strides = array<i32>} : memref<24x128xbf16, #tpu.memory_space<vmem>>, vector<24x128xbf16>,
    return
  }
  func.func @transform_0(%arg0: i32) -> (i32, i32) {
    %c0_i32 = arith.constant 0 : i32
    %c0_i32_0 = arith.constant 0 : i32
    return %arg0, %c0_i32 : i32, i32
  }
  func.func @transform_1(%arg0: i32) -> (i32, i32) {
    %c0_i32 = arith.constant 0 : i32
    %c0_i32_0 = arith.constant 0 : i32
    %c0_i32_1 = arith.constant 0 : i32
    return %c0_i32, %c0_i32_0 : i32, i32
  }
  func.func @transform_2(%arg0: i32) -> (i32, i32) {
    %c0_i32 = arith.constant 0 : i32
    %c0_i32_0 = arith.constant 0 : i32
    %c0_i32_1 = arith.constant 0 : i32
    return %c0_i32, %c0_i32_0 : i32, i32
  }
  func.func @transform_3(%arg0: i32) -> (i32, i32) {
    %c0_i32 = arith.constant 0 : i32
    %c0_i32_0 = arith.constant 0 : i32
    return %arg0, %c0_i32 : i32, i32
  }
}

module attributes {stable_mosaic.version = 11 : i64} {
  func.func @_linear_resident_kernel(%arg0: i32, %arg1: memref<24x128xbf16, #tpu.memory_space<vmem>>, %arg2: memref<128x384xbf16, #tpu.memory_space<vmem>>, %arg3: memref<1x384xf32, #tpu.memory_space<vmem>>, %arg4: memref<24x384xbf16, #tpu.memory_space<vmem>>) attributes {dimension_semantics = [#tpu.dimension_semantics<parallel>], iteration_bounds = array<i64: 1>, scalar_prefetch = 0 : i64, scratch_operands = 0 : i64, tpu.core_type = #tpu.core_type<tc>, window_params = [{transform_indices = @transform_0, window_bounds = array<i64: 24, 128>}, {pipeline_mode = #tpu.pipeline_mode<synchronous>, transform_indices = @transform_1, window_bounds = array<i64: 128, 384>}, {pipeline_mode = #tpu.pipeline_mode<synchronous>, transform_indices = @transform_2, window_bounds = array<i64: 1, 384>}, {transform_indices = @transform_3, window_bounds = array<i64: 24, 384>}]} {
    %c0 = arith.constant 0 : index
    %c0_0 = arith.constant 0 : index
    %0 = vector.load %arg1[%c0, %c0_0] : memref<24x128xbf16, #tpu.memory_space<vmem>>, vector<24x128xbf16>
    %c0_1 = arith.constant 0 : index
    %c0_2 = arith.constant 0 : index
    %1 = vector.load %arg2[%c0_1, %c0_2] : memref<128x384xbf16, #tpu.memory_space<vmem>>, vector<128x384xbf16>
    %cst = arith.constant dense<0.000000e+00> : vector<24x384xf32>
    %2 = tpu.matmul %0, %1, %cst {dimension_numbers = #tpu.dot_dimension_numbers<[1], [0], [0], [1], [0, 0, 1, 1], [], []>} : vector<24x128xbf16>, vector<128x384xbf16>, vector<24x384xf32> -> vector<24x384xf32>
    %c0_3 = arith.constant 0 : index
    %c0_4 = arith.constant 0 : index
    %3 = vector.load %arg3[%c0_3, %c0_4] : memref<1x384xf32, #tpu.memory_space<vmem>>, vector<1x384xf32>
    %4 = vector.broadcast %3 : vector<1x384xf32> to vector<24x384xf32>
    %5 = arith.addf %2, %4 : vector<24x384xf32>
    %6 = arith.truncf %5 : vector<24x384xf32> to vector<24x384xbf16>
    %c0_5 = arith.constant 0 : index
    %c0_6 = arith.constant 0 : index
    %7 = vector.load %arg4[%c0_5, %c0_6] : memref<24x384xbf16, #tpu.memory_space<vmem>>, vector<24x384xbf16>
    tpu.vector_store %arg4[%c0_5, %c0_6], %6 {strides = array<i32>} : memref<24x384xbf16, #tpu.memory_space<vmem>>, vector<24x384xbf16>,
    return
  }
  func.func @transform_0(%arg0: i32) -> (i32, i32) {
    %c0_i32 = arith.constant 0 : i32
    %c0_i32_0 = arith.constant 0 : i32
    return %arg0, %c0_i32 : i32, i32
  }
  func.func @transform_1(%arg0: i32) -> (i32, i32) {
    %c0_i32 = arith.constant 0 : i32
    %c0_i32_0 = arith.constant 0 : i32
    %c0_i32_1 = arith.constant 0 : i32
    return %c0_i32, %c0_i32_0 : i32, i32
  }
  func.func @transform_2(%arg0: i32) -> (i32, i32) {
    %c0_i32 = arith.constant 0 : i32
    %c0_i32_0 = arith.constant 0 : i32
    %c0_i32_1 = arith.constant 0 : i32
    return %c0_i32, %c0_i32_0 : i32, i32
  }
  func.func @transform_3(%arg0: i32) -> (i32, i32) {
    %c0_i32 = arith.constant 0 : i32
    %c0_i32_0 = arith.constant 0 : i32
    return %arg0, %c0_i32 : i32, i32
  }
}

module attributes {stable_mosaic.version = 11 : i64} {
  func.func @_attention_kernel(%arg0: i32, %arg1: i32, %arg2: memref<4x5x128xbf16, #tpu.memory_space<vmem>>, %arg3: memref<4x5x128xbf16, #tpu.memory_space<vmem>>, %arg4: memref<4x5x128xbf16, #tpu.memory_space<vmem>>, %arg5: memref<4x5x128xbf16, #tpu.memory_space<vmem>>) attributes {dimension_semantics = [#tpu.dimension_semantics<parallel>, #tpu.dimension_semantics<parallel>], iteration_bounds = array<i64: 1, 1>, scalar_prefetch = 0 : i64, scratch_operands = 0 : i64, tpu.core_type = #tpu.core_type<tc>, window_params = [{transform_indices = @transform_0, window_bounds = array<i64: 4, 5, 128>}, {transform_indices = @transform_1, window_bounds = array<i64: 4, 5, 128>}, {transform_indices = @transform_2, window_bounds = array<i64: 4, 5, 128>}, {transform_indices = @transform_3, window_bounds = array<i64: 4, 5, 128>}]} {
    %c0 = arith.constant 0 : index
    %c0_0 = arith.constant 0 : index
    %c0_1 = arith.constant 0 : index
    %0 = vector.load %arg2[%c0, %c0_0, %c0_1] : memref<4x5x128xbf16, #tpu.memory_space<vmem>>, vector<4x5x128xbf16>
    %c0_2 = arith.constant 0 : index
    %c0_3 = arith.constant 0 : index
    %c0_4 = arith.constant 0 : index
    %1 = vector.load %arg3[%c0_2, %c0_3, %c0_4] : memref<4x5x128xbf16, #tpu.memory_space<vmem>>, vector<4x5x128xbf16>
    %c0_5 = arith.constant 0 : index
    %c0_6 = arith.constant 0 : index
    %c0_7 = arith.constant 0 : index
    %2 = vector.load %arg4[%c0_5, %c0_6, %c0_7] : memref<4x5x128xbf16, #tpu.memory_space<vmem>>, vector<4x5x128xbf16>
    %3 = vector.extract_strided_slice %0 {offsets = [0, 0, 0], sizes = [4, 5, 64], strides = [1, 1, 1]} : vector<4x5x128xbf16> to vector<4x5x64xbf16>
    %cst = arith.constant 1.250000e-01 : bf16
    %4 = vector.broadcast %cst : bf16 to vector<4x5x64xbf16>
    %5 = arith.mulf %3, %4 : vector<4x5x64xbf16>
    %6 = vector.extract_strided_slice %1 {offsets = [0, 0, 0], sizes = [4, 5, 64], strides = [1, 1, 1]} : vector<4x5x128xbf16> to vector<4x5x64xbf16>
    "tpu.trace_start"() <{level = 10 : i32, message = "bsd,btd->bst"}> : () -> ()
    %cst_8 = arith.constant dense<0.000000e+00> : vector<4x5x5xf32>
    %7 = tpu.matmul %5, %6, %cst_8 {dimension_numbers = #tpu.dot_dimension_numbers<[2], [2], [1], [1], [0, 0, 0, 1, 1, 1], [0], [0]>} : vector<4x5x64xbf16>, vector<4x5x64xbf16>, vector<4x5x5xf32> -> vector<4x5x5xf32>
    "tpu.trace_stop"() : () -> ()
    %cst_9 = arith.constant dense<0xFF800000> : vector<4x5xf32>
    %8 = vector.multi_reduction <maximumf>, %7, %cst_9 [2] : vector<4x5x5xf32> to vector<4x5xf32>
    %9 = vector.shape_cast %8 : vector<4x5xf32> to vector<4x5x1xf32>
    %10 = vector.broadcast %9 : vector<4x5x1xf32> to vector<4x5x5xf32>
    %11 = arith.subf %7, %10 : vector<4x5x5xf32>
    %12 = math.exp %11 : vector<4x5x5xf32>
    %cst_10 = arith.constant dense<0.000000e+00> : vector<4x5xf32>
    %13 = vector.multi_reduction <add>, %12, %cst_10 [2] : vector<4x5x5xf32> to vector<4x5xf32>
    %14 = vector.shape_cast %13 : vector<4x5xf32> to vector<4x5x1xf32>
    %15 = arith.truncf %12 : vector<4x5x5xf32> to vector<4x5x5xbf16>
    %16 = vector.extract_strided_slice %2 {offsets = [0, 0, 0], sizes = [4, 5, 64], strides = [1, 1, 1]} : vector<4x5x128xbf16> to vector<4x5x64xbf16>
    "tpu.trace_start"() <{level = 10 : i32, message = "bst,btd->bsd"}> : () -> ()
    %cst_11 = arith.constant dense<0.000000e+00> : vector<4x5x64xf32>
    %17 = tpu.matmul %15, %16, %cst_11 {dimension_numbers = #tpu.dot_dimension_numbers<[2], [1], [1], [2], [0, 0, 0, 1, 1, 2], [0], [0]>} : vector<4x5x5xbf16>, vector<4x5x64xbf16>, vector<4x5x64xf32> -> vector<4x5x64xf32>
    "tpu.trace_stop"() : () -> ()
    %18 = tpu.reciprocal %14 {approx = true} : vector<4x5x1xf32> -> vector<4x5x1xf32>
    %19 = vector.broadcast %18 : vector<4x5x1xf32> to vector<4x5x64xf32>
    %20 = arith.mulf %17, %19 : vector<4x5x64xf32>
    %21 = arith.truncf %20 : vector<4x5x64xf32> to vector<4x5x64xbf16>
    %c0_12 = arith.constant 0 : index
    %c0_13 = arith.constant 0 : index
    %c0_14 = arith.constant 0 : index
    %22 = vector.load %arg5[%c0_12, %c0_13, %c0_14] : memref<4x5x128xbf16, #tpu.memory_space<vmem>>, vector<4x5x64xbf16>
    tpu.vector_store %arg5[%c0_12, %c0_13, %c0_14], %21 {strides = array<i32>} : memref<4x5x128xbf16, #tpu.memory_space<vmem>>, vector<4x5x64xbf16>,
    %23 = vector.extract_strided_slice %0 {offsets = [0, 0, 64], sizes = [4, 5, 64], strides = [1, 1, 1]} : vector<4x5x128xbf16> to vector<4x5x64xbf16>
    %cst_15 = arith.constant 1.250000e-01 : bf16
    %24 = vector.broadcast %cst_15 : bf16 to vector<4x5x64xbf16>
    %25 = arith.mulf %23, %24 : vector<4x5x64xbf16>
    %26 = vector.extract_strided_slice %1 {offsets = [0, 0, 64], sizes = [4, 5, 64], strides = [1, 1, 1]} : vector<4x5x128xbf16> to vector<4x5x64xbf16>
    "tpu.trace_start"() <{level = 10 : i32, message = "bsd,btd->bst"}> : () -> ()
    %cst_16 = arith.constant dense<0.000000e+00> : vector<4x5x5xf32>
    %27 = tpu.matmul %25, %26, %cst_16 {dimension_numbers = #tpu.dot_dimension_numbers<[2], [2], [1], [1], [0, 0, 0, 1, 1, 1], [0], [0]>} : vector<4x5x64xbf16>, vector<4x5x64xbf16>, vector<4x5x5xf32> -> vector<4x5x5xf32>
    "tpu.trace_stop"() : () -> ()
    %cst_17 = arith.constant dense<0xFF800000> : vector<4x5xf32>
    %28 = vector.multi_reduction <maximumf>, %27, %cst_17 [2] : vector<4x5x5xf32> to vector<4x5xf32>
    %29 = vector.shape_cast %28 : vector<4x5xf32> to vector<4x5x1xf32>
    %30 = vector.broadcast %29 : vector<4x5x1xf32> to vector<4x5x5xf32>
    %31 = arith.subf %27, %30 : vector<4x5x5xf32>
    %32 = math.exp %31 : vector<4x5x5xf32>
    %cst_18 = arith.constant dense<0.000000e+00> : vector<4x5xf32>
    %33 = vector.multi_reduction <add>, %32, %cst_18 [2] : vector<4x5x5xf32> to vector<4x5xf32>
    %34 = vector.shape_cast %33 : vector<4x5xf32> to vector<4x5x1xf32>
    %35 = arith.truncf %32 : vector<4x5x5xf32> to vector<4x5x5xbf16>
    %36 = vector.extract_strided_slice %2 {offsets = [0, 0, 64], sizes = [4, 5, 64], strides = [1, 1, 1]} : vector<4x5x128xbf16> to vector<4x5x64xbf16>
    "tpu.trace_start"() <{level = 10 : i32, message = "bst,btd->bsd"}> : () -> ()
    %cst_19 = arith.constant dense<0.000000e+00> : vector<4x5x64xf32>
    %37 = tpu.matmul %35, %36, %cst_19 {dimension_numbers = #tpu.dot_dimension_numbers<[2], [1], [1], [2], [0, 0, 0, 1, 1, 2], [0], [0]>} : vector<4x5x5xbf16>, vector<4x5x64xbf16>, vector<4x5x64xf32> -> vector<4x5x64xf32>
    "tpu.trace_stop"() : () -> ()
    %38 = tpu.reciprocal %34 {approx = true} : vector<4x5x1xf32> -> vector<4x5x1xf32>
    %39 = vector.broadcast %38 : vector<4x5x1xf32> to vector<4x5x64xf32>
    %40 = arith.mulf %37, %39 : vector<4x5x64xf32>
    %41 = arith.truncf %40 : vector<4x5x64xf32> to vector<4x5x64xbf16>
    %c0_20 = arith.constant 0 : index
    %c0_21 = arith.constant 0 : index
    %c64 = arith.constant 64 : index
    %42 = vector.load %arg5[%c0_20, %c0_21, %c64] : memref<4x5x128xbf16, #tpu.memory_space<vmem>>, vector<4x5x64xbf16>
    tpu.vector_store %arg5[%c0_20, %c0_21, %c64], %41 {strides = array<i32>} : memref<4x5x128xbf16, #tpu.memory_space<vmem>>, vector<4x5x64xbf16>,
    return
  }
  func.func @transform_0(%arg0: i32, %arg1: i32) -> (i32, i32, i32) {
    %c0_i32 = arith.constant 0 : i32
    %c0_i32_0 = arith.constant 0 : i32
    return %arg0, %c0_i32, %arg1 : i32, i32, i32
  }
  func.func @transform_1(%arg0: i32, %arg1: i32) -> (i32, i32, i32) {
    %c1_i32 = arith.constant 1 : i32
    %0 = arith.addi %c1_i32, %arg1 : i32
    %c0_i32 = arith.constant 0 : i32
    %c0_i32_0 = arith.constant 0 : i32
    return %arg0, %c0_i32, %0 : i32, i32, i32
  }
  func.func @transform_2(%arg0: i32, %arg1: i32) -> (i32, i32, i32) {
    %c2_i32 = arith.constant 2 : i32
    %0 = arith.addi %c2_i32, %arg1 : i32
    %c0_i32 = arith.constant 0 : i32
    %c0_i32_0 = arith.constant 0 : i32
    return %arg0, %c0_i32, %0 : i32, i32, i32
  }
  func.func @transform_3(%arg0: i32, %arg1: i32) -> (i32, i32, i32) {
    %c0_i32 = arith.constant 0 : i32
    %c0_i32_0 = arith.constant 0 : i32
    return %arg0, %c0_i32, %arg1 : i32, i32, i32
  }
}

module attributes {stable_mosaic.version = 11 : i64} {
  func.func @_linear_resident_kernel(%arg0: i32, %arg1: memref<24x128xbf16, #tpu.memory_space<vmem>>, %arg2: memref<128x128xbf16, #tpu.memory_space<vmem>>, %arg3: memref<1x128xf32, #tpu.memory_space<vmem>>, %arg4: memref<24x128xbf16, #tpu.memory_space<vmem>>) attributes {dimension_semantics = [#tpu.dimension_semantics<parallel>], iteration_bounds = array<i64: 1>, scalar_prefetch = 0 : i64, scratch_operands = 0 : i64, tpu.core_type = #tpu.core_type<tc>, window_params = [{transform_indices = @transform_0, window_bounds = array<i64: 24, 128>}, {pipeline_mode = #tpu.pipeline_mode<synchronous>, transform_indices = @transform_1, window_bounds = array<i64: 128, 128>}, {pipeline_mode = #tpu.pipeline_mode<synchronous>, transform_indices = @transform_2, window_bounds = array<i64: 1, 128>}, {transform_indices = @transform_3, window_bounds = array<i64: 24, 128>}]} {
    %c0 = arith.constant 0 : index
    %c0_0 = arith.constant 0 : index
    %0 = vector.load %arg1[%c0, %c0_0] : memref<24x128xbf16, #tpu.memory_space<vmem>>, vector<24x128xbf16>
    %c0_1 = arith.constant 0 : index
    %c0_2 = arith.constant 0 : index
    %1 = vector.load %arg2[%c0_1, %c0_2] : memref<128x128xbf16, #tpu.memory_space<vmem>>, vector<128x128xbf16>
    %cst = arith.constant dense<0.000000e+00> : vector<24x128xf32>
    %2 = tpu.matmul %0, %1, %cst {dimension_numbers = #tpu.dot_dimension_numbers<[1], [0], [0], [1], [0, 0, 1, 1], [], []>} : vector<24x128xbf16>, vector<128x128xbf16>, vector<24x128xf32> -> vector<24x128xf32>
    %c0_3 = arith.constant 0 : index
    %c0_4 = arith.constant 0 : index
    %3 = vector.load %arg3[%c0_3, %c0_4] : memref<1x128xf32, #tpu.memory_space<vmem>>, vector<1x128xf32>
    %4 = vector.broadcast %3 : vector<1x128xf32> to vector<24x128xf32>
    %5 = arith.addf %2, %4 : vector<24x128xf32>
    %6 = arith.truncf %5 : vector<24x128xf32> to vector<24x128xbf16>
    %c0_5 = arith.constant 0 : index
    %c0_6 = arith.constant 0 : index
    %7 = vector.load %arg4[%c0_5, %c0_6] : memref<24x128xbf16, #tpu.memory_space<vmem>>, vector<24x128xbf16>
    tpu.vector_store %arg4[%c0_5, %c0_6], %6 {strides = array<i32>} : memref<24x128xbf16, #tpu.memory_space<vmem>>, vector<24x128xbf16>,
    return
  }
  func.func @transform_0(%arg0: i32) -> (i32, i32) {
    %c0_i32 = arith.constant 0 : i32
    %c0_i32_0 = arith.constant 0 : i32
    return %arg0, %c0_i32 : i32, i32
  }
  func.func @transform_1(%arg0: i32) -> (i32, i32) {
    %c0_i32 = arith.constant 0 : i32
    %c0_i32_0 = arith.constant 0 : i32
    %c0_i32_1 = arith.constant 0 : i32
    return %c0_i32, %c0_i32_0 : i32, i32
  }
  func.func @transform_2(%arg0: i32) -> (i32, i32) {
    %c0_i32 = arith.constant 0 : i32
    %c0_i32_0 = arith.constant 0 : i32
    %c0_i32_1 = arith.constant 0 : i32
    return %c0_i32, %c0_i32_0 : i32, i32
  }
  func.func @transform_3(%arg0: i32) -> (i32, i32) {
    %c0_i32 = arith.constant 0 : i32
    %c0_i32_0 = arith.constant 0 : i32
    return %arg0, %c0_i32 : i32, i32
  }
}

module attributes {stable_mosaic.version = 11 : i64} {
  func.func @_linear_resident_kernel(%arg0: i32, %arg1: memref<24x128xbf16, #tpu.memory_space<vmem>>, %arg2: memref<128x256xbf16, #tpu.memory_space<vmem>>, %arg3: memref<1x256xf32, #tpu.memory_space<vmem>>, %arg4: memref<24x256xbf16, #tpu.memory_space<vmem>>) attributes {dimension_semantics = [#tpu.dimension_semantics<parallel>], iteration_bounds = array<i64: 1>, scalar_prefetch = 0 : i64, scratch_operands = 0 : i64, tpu.core_type = #tpu.core_type<tc>, window_params = [{transform_indices = @transform_0, window_bounds = array<i64: 24, 128>}, {pipeline_mode = #tpu.pipeline_mode<synchronous>, transform_indices = @transform_1, window_bounds = array<i64: 128, 256>}, {pipeline_mode = #tpu.pipeline_mode<synchronous>, transform_indices = @transform_2, window_bounds = array<i64: 1, 256>}, {transform_indices = @transform_3, window_bounds = array<i64: 24, 256>}]} {
    %c0 = arith.constant 0 : index
    %c0_0 = arith.constant 0 : index
    %0 = vector.load %arg1[%c0, %c0_0] : memref<24x128xbf16, #tpu.memory_space<vmem>>, vector<24x128xbf16>
    %c0_1 = arith.constant 0 : index
    %c0_2 = arith.constant 0 : index
    %1 = vector.load %arg2[%c0_1, %c0_2] : memref<128x256xbf16, #tpu.memory_space<vmem>>, vector<128x256xbf16>
    %cst = arith.constant dense<0.000000e+00> : vector<24x256xf32>
    %2 = tpu.matmul %0, %1, %cst {dimension_numbers = #tpu.dot_dimension_numbers<[1], [0], [0], [1], [0, 0, 1, 1], [], []>} : vector<24x128xbf16>, vector<128x256xbf16>, vector<24x256xf32> -> vector<24x256xf32>
    %c0_3 = arith.constant 0 : index
    %c0_4 = arith.constant 0 : index
    %3 = vector.load %arg3[%c0_3, %c0_4] : memref<1x256xf32, #tpu.memory_space<vmem>>, vector<1x256xf32>
    %4 = vector.broadcast %3 : vector<1x256xf32> to vector<24x256xf32>
    %5 = arith.addf %2, %4 : vector<24x256xf32>
    %cst_5 = arith.constant 5.000000e-01 : f32
    %6 = vector.broadcast %cst_5 : f32 to vector<24x256xf32>
    %7 = arith.mulf %6, %5 : vector<24x256xf32>
    %cst_6 = arith.constant 0.707106769 : f32
    %8 = vector.broadcast %cst_6 : f32 to vector<24x256xf32>
    %9 = arith.mulf %5, %8 : vector<24x256xf32>
    %10 = math.absf %9 : vector<24x256xf32>
    %cst_7 = arith.constant 0.327591091 : f32
    %11 = vector.broadcast %cst_7 : f32 to vector<24x256xf32>
    %12 = arith.mulf %11, %10 : vector<24x256xf32>
    %cst_8 = arith.constant 1.000000e+00 : f32
    %13 = vector.broadcast %cst_8 : f32 to vector<24x256xf32>
    %14 = arith.addf %13, %12 : vector<24x256xf32>
    %cst_9 = arith.constant 1.000000e+00 : f32
    %15 = vector.broadcast %cst_9 : f32 to vector<24x256xf32>
    %16 = arith.divf %15, %14 : vector<24x256xf32>
    %cst_10 = arith.constant 1.06140542 : f32
    %17 = vector.broadcast %cst_10 : f32 to vector<24x256xf32>
    %18 = arith.mulf %16, %17 : vector<24x256xf32>
    %cst_11 = arith.constant -1.45315206 : f32
    %19 = vector.broadcast %cst_11 : f32 to vector<24x256xf32>
    %20 = arith.addf %19, %18 : vector<24x256xf32>
    %21 = arith.mulf %16, %20 : vector<24x256xf32>
    %cst_12 = arith.constant 1.42141378 : f32
    %22 = vector.broadcast %cst_12 : f32 to vector<24x256xf32>
    %23 = arith.addf %22, %21 : vector<24x256xf32>
    %24 = arith.mulf %16, %23 : vector<24x256xf32>
    %cst_13 = arith.constant -0.284496725 : f32
    %25 = vector.broadcast %cst_13 : f32 to vector<24x256xf32>
    %26 = arith.addf %25, %24 : vector<24x256xf32>
    %27 = arith.mulf %16, %26 : vector<24x256xf32>
    %cst_14 = arith.constant 0.254829586 : f32
    %28 = vector.broadcast %cst_14 : f32 to vector<24x256xf32>
    %29 = arith.addf %28, %27 : vector<24x256xf32>
    %30 = arith.mulf %16, %29 : vector<24x256xf32>
    %cst_15 = arith.constant 0.000000e+00 : f32
    %31 = vector.broadcast %cst_15 : f32 to vector<24x256xf32>
    %32 = arith.subf %31, %10 : vector<24x256xf32>
    %33 = arith.mulf %32, %10 : vector<24x256xf32>
    %34 = math.exp %33 : vector<24x256xf32>
    %35 = arith.mulf %30, %34 : vector<24x256xf32>
    %cst_16 = arith.constant 1.000000e+00 : f32
    %36 = vector.broadcast %cst_16 : f32 to vector<24x256xf32>
    %37 = arith.subf %36, %35 : vector<24x256xf32>
    %cst_17 = arith.constant 0.000000e+00 : f32
    %38 = vector.broadcast %cst_17 : f32 to vector<24x256xf32>
    %39 = arith.cmpf oge, %9, %38 : vector<24x256xf32>
    %cst_18 = arith.constant 0.000000e+00 : f32
    %40 = vector.broadcast %cst_18 : f32 to vector<24x256xf32>
    %41 = arith.subf %40, %37 : vector<24x256xf32>
    %42 = arith.select %39, %37, %41 : vector<24x256xi1>, vector<24x256xf32>
    %cst_19 = arith.constant 1.000000e+00 : f32
    %43 = vector.broadcast %cst_19 : f32 to vector<24x256xf32>
    %44 = arith.addf %43, %42 : vector<24x256xf32>
    %45 = arith.mulf %7, %44 : vector<24x256xf32>
    %46 = arith.truncf %45 : vector<24x256xf32> to vector<24x256xbf16>
    %c0_20 = arith.constant 0 : index
    %c0_21 = arith.constant 0 : index
    %47 = vector.load %arg4[%c0_20, %c0_21] : memref<24x256xbf16, #tpu.memory_space<vmem>>, vector<24x256xbf16>
    tpu.vector_store %arg4[%c0_20, %c0_21], %46 {strides = array<i32>} : memref<24x256xbf16, #tpu.memory_space<vmem>>, vector<24x256xbf16>,
    return
  }
  func.func @transform_0(%arg0: i32) -> (i32, i32) {
    %c0_i32 = arith.constant 0 : i32
    %c0_i32_0 = arith.constant 0 : i32
    return %arg0, %c0_i32 : i32, i32
  }
  func.func @transform_1(%arg0: i32) -> (i32, i32) {
    %c0_i32 = arith.constant 0 : i32
    %c0_i32_0 = arith.constant 0 : i32
    %c0_i32_1 = arith.constant 0 : i32
    return %c0_i32, %c0_i32_0 : i32, i32
  }
  func.func @transform_2(%arg0: i32) -> (i32, i32) {
    %c0_i32 = arith.constant 0 : i32
    %c0_i32_0 = arith.constant 0 : i32
    %c0_i32_1 = arith.constant 0 : i32
    return %c0_i32, %c0_i32_0 : i32, i32
  }
  func.func @transform_3(%arg0: i32) -> (i32, i32) {
    %c0_i32 = arith.constant 0 : i32
    %c0_i32_0 = arith.constant 0 : i32
    return %arg0, %c0_i32 : i32, i32
  }
}

module attributes {stable_mosaic.version = 11 : i64} {
  func.func @_linear_resident_kernel(%arg0: i32, %arg1: memref<24x256xbf16, #tpu.memory_space<vmem>>, %arg2: memref<256x128xbf16, #tpu.memory_space<vmem>>, %arg3: memref<1x128xf32, #tpu.memory_space<vmem>>, %arg4: memref<24x128xbf16, #tpu.memory_space<vmem>>, %arg5: memref<24x128xbf16, #tpu.memory_space<vmem>>) attributes {dimension_semantics = [#tpu.dimension_semantics<parallel>], iteration_bounds = array<i64: 1>, scalar_prefetch = 0 : i64, scratch_operands = 0 : i64, tpu.core_type = #tpu.core_type<tc>, window_params = [{transform_indices = @transform_0, window_bounds = array<i64: 24, 256>}, {pipeline_mode = #tpu.pipeline_mode<synchronous>, transform_indices = @transform_1, window_bounds = array<i64: 256, 128>}, {pipeline_mode = #tpu.pipeline_mode<synchronous>, transform_indices = @transform_2, window_bounds = array<i64: 1, 128>}, {transform_indices = @transform_3, window_bounds = array<i64: 24, 128>}, {transform_indices = @transform_4, window_bounds = array<i64: 24, 128>}]} {
    %c0 = arith.constant 0 : index
    %c0_0 = arith.constant 0 : index
    %0 = vector.load %arg1[%c0, %c0_0] : memref<24x256xbf16, #tpu.memory_space<vmem>>, vector<24x256xbf16>
    %c0_1 = arith.constant 0 : index
    %c0_2 = arith.constant 0 : index
    %1 = vector.load %arg2[%c0_1, %c0_2] : memref<256x128xbf16, #tpu.memory_space<vmem>>, vector<256x128xbf16>
    %cst = arith.constant dense<0.000000e+00> : vector<24x128xf32>
    %2 = tpu.matmul %0, %1, %cst {dimension_numbers = #tpu.dot_dimension_numbers<[1], [0], [0], [1], [0, 0, 1, 1], [], []>} : vector<24x256xbf16>, vector<256x128xbf16>, vector<24x128xf32> -> vector<24x128xf32>
    %c0_3 = arith.constant 0 : index
    %c0_4 = arith.constant 0 : index
    %3 = vector.load %arg3[%c0_3, %c0_4] : memref<1x128xf32, #tpu.memory_space<vmem>>, vector<1x128xf32>
    %4 = vector.broadcast %3 : vector<1x128xf32> to vector<24x128xf32>
    %5 = arith.addf %2, %4 : vector<24x128xf32>
    %c0_5 = arith.constant 0 : index
    %c0_6 = arith.constant 0 : index
    %6 = vector.load %arg4[%c0_5, %c0_6] : memref<24x128xbf16, #tpu.memory_space<vmem>>, vector<24x128xbf16>
    %7 = arith.extf %6 : vector<24x128xbf16> to vector<24x128xf32>
    %8 = arith.addf %5, %7 : vector<24x128xf32>
    %9 = arith.truncf %8 : vector<24x128xf32> to vector<24x128xbf16>
    %c0_7 = arith.constant 0 : index
    %c0_8 = arith.constant 0 : index
    %10 = vector.load %arg5[%c0_7, %c0_8] : memref<24x128xbf16, #tpu.memory_space<vmem>>, vector<24x128xbf16>
    tpu.vector_store %arg5[%c0_7, %c0_8], %9 {strides = array<i32>} : memref<24x128xbf16, #tpu.memory_space<vmem>>, vector<24x128xbf16>,
    return
  }
  func.func @transform_0(%arg0: i32) -> (i32, i32) {
    %c0_i32 = arith.constant 0 : i32
    %c0_i32_0 = arith.constant 0 : i32
    return %arg0, %c0_i32 : i32, i32
  }
  func.func @transform_1(%arg0: i32) -> (i32, i32) {
    %c0_i32 = arith.constant 0 : i32
    %c0_i32_0 = arith.constant 0 : i32
    %c0_i32_1 = arith.constant 0 : i32
    return %c0_i32, %c0_i32_0 : i32, i32
  }
  func.func @transform_2(%arg0: i32) -> (i32, i32) {
    %c0_i32 = arith.constant 0 : i32
    %c0_i32_0 = arith.constant 0 : i32
    %c0_i32_1 = arith.constant 0 : i32
    return %c0_i32, %c0_i32_0 : i32, i32
  }
  func.func @transform_3(%arg0: i32) -> (i32, i32) {
    %c0_i32 = arith.constant 0 : i32
    %c0_i32_0 = arith.constant 0 : i32
    return %arg0, %c0_i32 : i32, i32
  }
  func.func @transform_4(%arg0: i32) -> (i32, i32) {
    %c0_i32 = arith.constant 0 : i32
    %c0_i32_0 = arith.constant 0 : i32
    return %arg0, %c0_i32 : i32, i32
  }
}

</mosaic_0001>

<bundles_post_ra>
// kernel: timesformer_forward.27
= control target key start
LH: loop header
LB: loop body
LE: loop exit
PB: predicated region body
PF: predicated region fallthrough
CT: control target
= control target key end

     0   :  { %s124_s0 = inlined_call_operand.vmem [shape: bf16[16,128], index: 0, kind: input, shape index: {}]   ;;  %s125_s1 = inlined_call_operand.vmem [shape: f32[1,128], index: 1, kind: input, shape index: {}]   ;;  %s126_s2 = inlined_call_operand.vmem [shape: f32[1,128], index: 2, kind: input, shape index: {}]   ;;  %s127_s3 = inlined_call_operand.vmem [shape: bf16[16,128], index: 3, kind: output, shape index: {}]  }
   0x1   :  { %v80_v0 = vld [vmem:[%s124_s0] sm:$0xff]  }
   0x2   :  { %v81_v1 = vunpack.c.l.bf16 %v80_v0  ;;  %v82_v2 = vunpack.c.h.bf16 %v80_v0  ;;  %v73_v19 = vld [vmem:[%s125_s1] ss:$0 sm:$0xff] }
   0x3   :  { %v74_v23 = vld [vmem:[%s126_s2] ss:$0 sm:$0xff] }
   0x4   :  { %18 = vadd.xlane.f32.xlu0 %v81_v1 }
   0x8   :  { %20 = vadd.xlane.f32.xlu0 %v82_v2 }
  0x8d   :  { %v19_v3 = vpop.xlane.xlu0 %18 }
  0x8e   :  { %v23_v4 = vmul.f32 0.0078125, %v19_v3 }
  0x90   :  { %v25_v5 = vsub.f32 %v81_v1, %v23_v4 }
  0x91   :  { %v21_v6 = vpop.xlane.xlu0 %20 }
  0x92   :  { %v24_v7 = vmul.f32 0.0078125, %v21_v6  ;;  %v27_v8 = vmul.f32 %v25_v5, %v25_v5 }
  0x94   :  { %v26_v9 = vsub.f32 %v82_v2, %v24_v7  ;;  %29 = vadd.xlane.f32.xlu1 %v27_v8 }
  0x96   :  { %v28_v10 = vmul.f32 %v26_v9, %v26_v9 }
  0x98   :  { %31 = vadd.xlane.f32.xlu1 %v28_v10 }
 0x11d   :  { %v30_v11 = vpop.xlane.xlu1 %29 }
 0x11e   :  { %v33_v12 = vmul.f32 0.0078125, %v30_v11 }
 0x120   :  { %v35_v13 = vadd.f32 1e-06, %v33_v12 }
 0x121   :  { %v32_v14 = vpop.xlane.xlu1 %31 }
 0x122   :  { %88 = vrsqrt.f32 %v35_v13  ;;  %v34_v15 = vmul.f32 0.0078125, %v32_v14 }
 0x124   :  { %v36_v16 = vadd.f32 1e-06, %v34_v15 }
 0x126   :  { %90 = vrsqrt.f32 %v36_v16 }
 0x12f   :  { %v89_v17 = vpop.eup %88 }
 0x130   :  { %v39_v18 = vmul.f32 %v89_v17, %v25_v5 }
 0x132   :  { %v48_v21 = vmul.f32 %v73_v19, %v39_v18 }
 0x133   :  { %v91_v20 = vpop.eup %90 }
 0x134   :  { %v40_v22 = vmul.f32 %v91_v20, %v26_v9  ;;  %v57_v25 = vadd.f32 %v74_v23, %v48_v21 }
 0x136   :  { %v49_v24 = vmul.f32 %v73_v19, %v40_v22 }
 0x138   :  { %v58_v26 = vadd.f32 %v74_v23, %v49_v24 }
 0x13a   :  { %v86_v27 = vpack.c.bf16 %v58_v26, %v57_v25 }
 0x13c   :  { %87 = vst [vmem:[%s127_s3] sm:$0xff] %v86_v27  }

// kernel: timesformer_forward.26
= control target key start
LH: loop header
LB: loop body
LE: loop exit
PB: predicated region body
PF: predicated region fallthrough
CT: control target
= control target key end

     0   :  { %s366_s1 = inlined_call_operand.vmem [shape: bf16[256,128], index: 1, kind: input, shape index: {}]   ;;  %s367_s0 = inlined_call_operand.vmem [shape: bf16[16,256], index: 0, kind: input, shape index: {}]   ;;  %s368_s2 = inlined_call_operand.vmem [shape: f32[1,128], index: 2, kind: input, shape index: {}]   ;;  %s369_s3 = inlined_call_operand.vmem [shape: bf16[16,128], index: 3, kind: output, shape index: {}]  }
   0x1   :  { %v267_v0 = vld [vmem:[%s366_s1 + $0x78] sm:$0xff]   ;;  %v269_v2 = vld [vmem:[%s366_s1 + $0x70] sm:$0xff]   ;;  %v271_v4 = vld [vmem:[%s366_s1 + $0x68] sm:$0xff]  }
   0x2   :  { %v268_v1 = vld [vmem:[%s366_s1 + $0x38] sm:$0xff]   ;;  %245 = vmatprep.subr.bf16.mxu0 %v267_v0  ;;  %v270_v3 = vld [vmem:[%s366_s1 + $0x30] sm:$0xff]   ;;  %v272_v5 = vld [vmem:[%s366_s1 + $0x28] sm:$0xff]  }
   0x3   :  { %246 = vmatpush3.bf16.msra.mxu0 %v268_v1  ;;  %v273_v6 = vld [vmem:[%s366_s1 + $0x60] sm:$0xff]   ;;  %v275_v8 = vld [vmem:[%s366_s1 + $0x58] sm:$0xff]   ;;  %v277_v10 = vld [vmem:[%s366_s1 + $0x50] sm:$0xff]  }
   0x4   :  { %247 = vmatprep.subr.bf16.mxu0 %v269_v2  ;;  %v274_v7 = vld [vmem:[%s366_s1 + $0x20] sm:$0xff]   ;;  %v276_v9 = vld [vmem:[%s366_s1 + $0x18] sm:$0xff]   ;;  %v278_v12 = vld [vmem:[%s366_s1 + $0x10] sm:$0xff]  }
   0x5   :  { %v285_v11 = vld [vmem:[%s367_s0 + $0x4] ss:$8 sps:$4 sm:$0xff]   ;;  %v283_v17 = vld [vmem:[%s367_s0] ss:$8 sps:$4 sm:$0xff]  }
   0x6   :  { %194 = vmatprep.mubr.bf16.mxu0 %v285_v11  ;;  %v279_v13 = vld [vmem:[%s366_s1 + $0x48] sm:$0xff]   ;;  %v281_v15 = vld [vmem:[%s366_s1 + $0x40] sm:$0xff]  }
   0x7   :  { %248 = vmatpush3.bf16.msra.mxu0 %v270_v3  ;;  %v280_v14 = vld [vmem:[%s366_s1 + $0x8] sm:$0xff]   ;;  %v282_v16 = vld [vmem:[%s366_s1] sm:$0xff]  }
   0x8   :  { %249 = vmatprep.subr.bf16.mxu0 %v271_v4  ;;  %v217_v22 = vld [vmem:[%s368_s2] ss:$0 sm:$0xff] }
   0xb   :  { %250 = vmatpush3.bf16.msra.mxu0 %v272_v5 }
   0xc   :  { %251 = vmatprep.subr.bf16.mxu0 %v273_v6 }
   0xf   :  { %252 = vmatpush3.bf16.msra.mxu0 %v274_v7 }
  0x10   :  { %253 = vmatprep.subr.bf16.mxu0 %v275_v8 }
  0x13   :  { %254 = vmatpush3.bf16.msra.mxu0 %v276_v9 }
  0x14   :  { %255 = vmatprep.subr.bf16.mxu0 %v277_v10 }
  0x17   :  { %256 = vmatpush3.bf16.msra.mxu0 %v278_v12 }
  0x18   :  { %257 = vmatprep.subr.bf16.mxu0 %v279_v13 }
  0x1b   :  { %258 = vmatpush3.bf16.msra.mxu0 %v280_v14 }
  0x1c   :  { %259 = vmatprep.subr.bf16.mxu0 %v281_v15 }
  0x1f   :  { %260 = vmatpush3.bf16.msra.mxu0 %v282_v16 }
  0x22   :  { %195 = vmatmul.mubr.bf16.vlgmr.msra.gmra.mxu0 %v283_v17 }
  0xe2   :  { %v261_v18 = vpop.f32.mrf.mxu0 }
  0xe4   :  { %v262_v19 = vpop.f32.mrf.mxu0 }
  0xe5   :  { %v263_v21 = vadd.f32 %v262_v19, %v261_v18 }
  0xe6   :  { %v264_v20 = vpop.f32.mrf.mxu0 }
  0xe7   :  { %v197_v25 = vadd.f32 %v263_v21, %v217_v22 }
  0xe8   :  { %v265_v23 = vpop.f32.mrf.mxu0 }
  0xe9   :  { %v266_v24 = vadd.f32 %v265_v23, %v264_v20 }
  0xeb   :  { %v200_v26 = vadd.f32 %v266_v24, %v217_v22 }
  0xed   :  { %v243_v27 = vpack.c.bf16 %v200_v26, %v197_v25 }
  0xef   :  { %244 = vst [vmem:[%s369_s3] sm:$0xff] %v243_v27  }

// kernel: timesformer_forward.28
= control target key start
LH: loop header
LB: loop body
LE: loop exit
PB: predicated region body
PF: predicated region fallthrough
CT: control target
= control target key end

     0   :  { %v410_v0 = vmov 0.0   ;;  %vm411_vm0 = vmmov 0   ;;  %v412_v3 = vmov 0   ;;  %v51_v27 = vlaneseq  ;;  %s523_s1 = inlined_call_operand.vmem [shape: bf16[128,384], index: 1, kind: input, shape index: {}]   ;;  %s524_s0 = inlined_call_operand.vmem [shape: bf16[16,128], index: 0, kind: input, shape index: {}]   ;;  %s525_s2 = inlined_call_operand.vmem [shape: f32[1,384], index: 2, kind: input, shape index: {}]   ;;  %s526_s3 = inlined_call_operand.vmem [shape: bf16[16,384], index: 3, kind: output, shape index: {}]  }
   0x1   :  { %354 = vmatprep.subr.bf16.mxu1 %v410_v0  ;;  %v377_v1 = vld [vmem:[%s523_s1 + $0xac] ss:$12 sps:$4 sm:$0xff]   ;;  %370 = vmatprep.mubr.msk.bf16.mxu1 %vm411_vm0, %v410_v0  ;;  %v379_v2 = vld [vmem:[%s523_s1 + $0xb0] ss:$12 sps:$4 sm:$0xff]   ;;  %v380_v4 = vld [vmem:[%s523_s1 + $0xa8] ss:$12 sps:$4 sm:$0xff]  }
   0x2   :  { %232 = vmatprep.mubr.bf16.mxu0 %v412_v3  ;;  %200 = vmatprep.subr.bf16.mxu0 %v377_v1  ;;  %v381_v5 = vld [vmem:[%s523_s1 + $0x94] ss:$12 sps:$4 sm:$0xff]   ;;  %v383_v6 = vld [vmem:[%s523_s1 + $0x98] ss:$12 sps:$4 sm:$0xff]   ;;  %v384_v7 = vld [vmem:[%s523_s1 + $0x90] ss:$12 sps:$4 sm:$0xff]  }
   0x3   :  { %355 = vmatpush3.bf16.msra.mxu1 %v379_v2  ;;  %201 = vmatpush1.bf16.msra.mxu0 %v380_v4  ;;  %v385_v8 = vld [vmem:[%s523_s1 + $0x7c] ss:$12 sps:$4 sm:$0xff]   ;;  %v387_v9 = vld [vmem:[%s523_s1 + $0x80] ss:$12 sps:$4 sm:$0xff]   ;;  %v388_v10 = vld [vmem:[%s523_s1 + $0x78] ss:$12 sps:$4 sm:$0xff]  }
   0x4   :  { %356 = vmatprep.subr.bf16.mxu1 %v410_v0  ;;  %202 = vmatprep.subr.bf16.mxu0 %v381_v5  ;;  %v389_v11 = vld [vmem:[%s523_s1 + $0x64] ss:$12 sps:$4 sm:$0xff]   ;;  %v391_v12 = vld [vmem:[%s523_s1 + $0x68] ss:$12 sps:$4 sm:$0xff]   ;;  %v392_v13 = vld [vmem:[%s523_s1 + $0x60] ss:$12 sps:$4 sm:$0xff]  }
   0x5   :  { %v393_v14 = vld [vmem:[%s523_s1 + $0x4c] ss:$12 sps:$4 sm:$0xff]   ;;  %v395_v15 = vld [vmem:[%s523_s1 + $0x50] ss:$12 sps:$4 sm:$0xff]   ;;  %v396_v16 = vld [vmem:[%s523_s1 + $0x48] ss:$12 sps:$4 sm:$0xff]  }
   0x6   :  { %v397_v17 = vld [vmem:[%s523_s1 + $0x34] ss:$12 sps:$4 sm:$0xff]   ;;  %v399_v18 = vld [vmem:[%s523_s1 + $0x38] ss:$12 sps:$4 sm:$0xff]   ;;  %v400_v19 = vld [vmem:[%s523_s1 + $0x30] ss:$12 sps:$4 sm:$0xff]  }
   0x7   :  { %357 = vmatpush3.bf16.msra.mxu1 %v383_v6  ;;  %203 = vmatpush1.bf16.msra.mxu0 %v384_v7  ;;  %v401_v20 = vld [vmem:[%s523_s1 + $0x1c] ss:$12 sps:$4 sm:$0xff]   ;;  %v403_v21 = vld [vmem:[%s523_s1 + $0x20] ss:$12 sps:$4 sm:$0xff]   ;;  %v404_v22 = vld [vmem:[%s523_s1 + $0x18] ss:$12 sps:$4 sm:$0xff]  }
   0x8   :  { %358 = vmatprep.subr.bf16.mxu1 %v410_v0  ;;  %204 = vmatprep.subr.bf16.mxu0 %v385_v8  ;;  %v405_v23 = vld [vmem:[%s523_s1 + $0x4] ss:$12 sps:$4 sm:$0xff]   ;;  %v407_v24 = vld [vmem:[%s523_s1 + $0x8] ss:$12 sps:$4 sm:$0xff]   ;;  %v408_v25 = vld [vmem:[%s523_s1] ss:$12 sps:$4 sm:$0xff]  }
   0x9   :  { %v409_v26 = vld [vmem:[%s524_s0] sm:$0xff]   ;;  %v52_v28 = vshrl.u32 %v51_v27, 7 }
   0xa   :  { %v49_v30 = vld [vmem:[%s525_s2] sm:$0x7] }
   0xb   :  { %359 = vmatpush3.bf16.msra.mxu1 %v387_v9  ;;  %205 = vmatpush1.bf16.msra.mxu0 %v388_v10  ;;  %v61_v29 = vsub.s32 2, %v52_v28  ;;  %v53_v31 = vsub.s32 0, %v52_v28  ;;  %v57_v32 = vsub.s32 1, %v52_v28 }
   0xc   :  { %360 = vmatprep.subr.bf16.mxu1 %v410_v0  ;;  %206 = vmatprep.subr.bf16.mxu0 %v389_v11 }
   0xd   :  { %v62_v33 = vrot.slane %v49_v30, %v61_v29  ;;  %v54_v35 = vrot.slane %v49_v30, %v53_v31  ;;  %v58_v36 = vrot.slane %v49_v30, %v57_v32 }
   0xf   :  { %361 = vmatpush3.bf16.msra.mxu1 %v391_v12  ;;  %207 = vmatpush1.bf16.msra.mxu0 %v392_v13 }
  0x10   :  { %362 = vmatprep.subr.bf16.mxu1 %v410_v0  ;;  %208 = vmatprep.subr.bf16.mxu0 %v393_v14 }
  0x13   :  { %363 = vmatpush3.bf16.msra.mxu1 %v395_v15  ;;  %209 = vmatpush1.bf16.msra.mxu0 %v396_v16 }
  0x14   :  { %364 = vmatprep.subr.bf16.mxu1 %v410_v0  ;;  %210 = vmatprep.subr.bf16.mxu0 %v397_v17 }
  0x17   :  { %365 = vmatpush3.bf16.msra.mxu1 %v399_v18  ;;  %211 = vmatpush1.bf16.msra.mxu0 %v400_v19 }
  0x18   :  { %366 = vmatprep.subr.bf16.mxu1 %v410_v0  ;;  %212 = vmatprep.subr.bf16.mxu0 %v401_v20 }
  0x1b   :  { %367 = vmatpush3.bf16.msra.mxu1 %v403_v21  ;;  %213 = vmatpush1.bf16.msra.mxu0 %v404_v22 }
  0x1c   :  { %368 = vmatprep.subr.bf16.mxu1 %v410_v0  ;;  %214 = vmatprep.subr.bf16.mxu0 %v405_v23 }
  0x1f   :  { %369 = vmatpush3.bf16.msra.mxu1 %v407_v24  ;;  %215 = vmatpush1.bf16.msra.mxu0 %v408_v25 }
  0x22   :  { %371 = vmatmul.mubr.bf16.vlgmr.msra.gmra.mxu1 %v409_v26  ;;  %233 = vmatmul.mubr.bf16.vlgmr.msra.gmra.mxu0 %v409_v26 }
  0xe2   :  { %v277_v34 = vpop.f32.mrf.mxu1  ;;  %v234_v38 = vpop.f32.mrf.mxu0 }
  0xe3   :  { %v278_v37 = vadd.f32 %v277_v34, %v62_v33  ;;  %v235_v42 = vadd.f32 %v234_v38, %v54_v35 }
  0xe4   :  { %v372_v39 = vpop.f32.mrf.mxu1  ;;  %v236_v41 = vpop.f32.mrf.mxu0 }
  0xe5   :  { %v342_v40 = vpack.c.bf16 %v278_v37, %v278_v37  ;;  %v237_v43 = vadd.f32 %v236_v41, %v58_v36 }
  0xe6   :  { %v280_v44 = vpop.f32.mrf.mxu1  ;;  %v238_v46 = vpop.f32.mrf.mxu0 }
  0xe7   :  { %305 = vst [vmem:[%s526_s3 + $0x8] sm:$0xf] %v342_v40  ;;  %v281_v45 = vadd.f32 %v280_v44, %v62_v33  ;;  %v341_v47 = vpack.c.bf16 %v237_v43, %v235_v42  ;;  %v239_v51 = vadd.f32 %v238_v46, %v54_v35 }
  0xe8   :  { %v373_v48 = vpop.f32.mrf.mxu1  ;;  %v240_v50 = vpop.f32.mrf.mxu0 }
  0xe9   :  { %v344_v49 = vpack.c.bf16 %v281_v45, %v281_v45  ;;  %304 = vst [vmem:[%s526_s3] sm:$0xff] %v341_v47  ;;  %v241_v52 = vadd.f32 %v240_v50, %v58_v36 }
  0xeb   :  { %307 = vst [vmem:[%s526_s3 + $0x14] sm:$0xf] %v344_v49  ;;  %v343_v53 = vpack.c.bf16 %v241_v52, %v239_v51 }
  0xed   :  { %306 = vst [vmem:[%s526_s3 + $0xc] sm:$0xff] %v343_v53 }

// kernel: timesformer_forward.30
= control target key start
LH: loop header
LB: loop body
LE: loop exit
PB: predicated region body
PF: predicated region fallthrough
CT: control target
= control target key end

     0   :  { %v208_v0 = vmov 0.0   ;;  %vm209_vm0 = vmmov 0   ;;  %s263_s1 = inlined_call_operand.vmem [shape: bf16[128,128], index: 1, kind: input, shape index: {}]   ;;  %s264_s0 = inlined_call_operand.vmem [shape: bf16[16,128], index: 0, kind: input, shape index: {}]   ;;  %s265_s2 = inlined_call_operand.vmem [shape: f32[1,128], index: 2, kind: input, shape index: {}]   ;;  %s266_s3 = inlined_call_operand.vmem [shape: bf16[16,128], index: 3, kind: output, shape index: {}]  }
   0x1   :  { %177 = vmatprep.subr.bf16.mxu0 %v208_v0  ;;  %v199_v1 = vld [vmem:[%s263_s1 + $0x38] sm:$0xff]   ;;  %193 = vmatprep.mubr.msk.bf16.mxu0 %vm209_vm0, %v208_v0  ;;  %v200_v2 = vld [vmem:[%s263_s1 + $0x30] sm:$0xff]   ;;  %v201_v3 = vld [vmem:[%s263_s1 + $0x28] sm:$0xff]  }
   0x2   :  { %178 = vmatpush3.bf16.msra.mxu0 %v199_v1  ;;  %v202_v4 = vld [vmem:[%s263_s1 + $0x20] sm:$0xff]   ;;  %v203_v5 = vld [vmem:[%s263_s1 + $0x18] sm:$0xff]   ;;  %v204_v6 = vld [vmem:[%s263_s1 + $0x10] sm:$0xff]  }
   0x3   :  { %179 = vmatprep.subr.bf16.mxu0 %v208_v0  ;;  %v205_v7 = vld [vmem:[%s263_s1 + $0x8] sm:$0xff]   ;;  %v206_v8 = vld [vmem:[%s263_s1] sm:$0xff]  }
   0x4   :  { %v207_v9 = vld [vmem:[%s264_s0] sm:$0xff]  }
   0x5   :  { %v149_v11 = vld [vmem:[%s265_s2] ss:$0 sm:$0xff] }
   0x6   :  { %180 = vmatpush3.bf16.msra.mxu0 %v200_v2 }
   0x7   :  { %181 = vmatprep.subr.bf16.mxu0 %v208_v0 }
   0xa   :  { %182 = vmatpush3.bf16.msra.mxu0 %v201_v3 }
   0xb   :  { %183 = vmatprep.subr.bf16.mxu0 %v208_v0 }
   0xe   :  { %184 = vmatpush3.bf16.msra.mxu0 %v202_v4 }
   0xf   :  { %185 = vmatprep.subr.bf16.mxu0 %v208_v0 }
  0x12   :  { %186 = vmatpush3.bf16.msra.mxu0 %v203_v5 }
  0x13   :  { %187 = vmatprep.subr.bf16.mxu0 %v208_v0 }
  0x16   :  { %188 = vmatpush3.bf16.msra.mxu0 %v204_v6 }
  0x17   :  { %189 = vmatprep.subr.bf16.mxu0 %v208_v0 }
  0x1a   :  { %190 = vmatpush3.bf16.msra.mxu0 %v205_v7 }
  0x1b   :  { %191 = vmatprep.subr.bf16.mxu0 %v208_v0 }
  0x1e   :  { %192 = vmatpush3.bf16.msra.mxu0 %v206_v8 }
  0x21   :  { %194 = vmatmul.mubr.bf16.vlgmr.msra.gmra.mxu0 %v207_v9 }
  0xe1   :  { %v128_v10 = vpop.f32.mrf.mxu0 }
  0xe2   :  { %v129_v14 = vadd.f32 %v149_v11, %v128_v10 }
  0xe3   :  { %v195_v12 = vpop.f32.mrf.mxu0 }
  0xe5   :  { %v131_v13 = vpop.f32.mrf.mxu0 }
  0xe6   :  { %v132_v15 = vadd.f32 %v149_v11, %v131_v13 }
  0xe7   :  { %v196_v16 = vpop.f32.mrf.mxu0 }
  0xe8   :  { %v166_v17 = vpack.c.bf16 %v132_v15, %v129_v14 }
  0xea   :  { %167 = vst [vmem:[%s266_s3] sm:$0xff] %v166_v17  }

// kernel: timesformer_forward.31
= control target key start
LH: loop header
LB: loop body
LE: loop exit
PB: predicated region body
PF: predicated region fallthrough
CT: control target
= control target key end

     0   :  { %v221_v0 = vmov 0.0   ;;  %vm222_vm0 = vmmov 0   ;;  %s284_s1 = inlined_call_operand.vmem [shape: bf16[128,128], index: 1, kind: input, shape index: {}]   ;;  %s285_s0 = inlined_call_operand.vmem [shape: bf16[16,128], index: 0, kind: input, shape index: {}]   ;;  %s286_s2 = inlined_call_operand.vmem [shape: f32[1,128], index: 2, kind: input, shape index: {}]   ;;  %s287_s3 = inlined_call_operand.vmem [shape: bf16[16,128], index: 3, kind: input, shape index: {}]   ;;  %s288_s4 = inlined_call_operand.vmem [shape: bf16[16,128], index: 4, kind: output, shape index: {}]  }
   0x1   :  { %190 = vmatprep.subr.bf16.mxu0 %v221_v0  ;;  %v212_v1 = vld [vmem:[%s284_s1 + $0x38] sm:$0xff]   ;;  %206 = vmatprep.mubr.msk.bf16.mxu0 %vm222_vm0, %v221_v0  ;;  %v213_v2 = vld [vmem:[%s284_s1 + $0x30] sm:$0xff]   ;;  %v214_v3 = vld [vmem:[%s284_s1 + $0x28] sm:$0xff]  }
   0x2   :  { %191 = vmatpush3.bf16.msra.mxu0 %v212_v1  ;;  %v215_v4 = vld [vmem:[%s284_s1 + $0x20] sm:$0xff]   ;;  %v216_v5 = vld [vmem:[%s284_s1 + $0x18] sm:$0xff]   ;;  %v217_v6 = vld [vmem:[%s284_s1 + $0x10] sm:$0xff]  }
   0x3   :  { %192 = vmatprep.subr.bf16.mxu0 %v221_v0  ;;  %v218_v7 = vld [vmem:[%s284_s1 + $0x8] sm:$0xff]   ;;  %v219_v8 = vld [vmem:[%s284_s1] sm:$0xff]  }
   0x4   :  { %v220_v9 = vld [vmem:[%s285_s0] sm:$0xff]  }
   0x5   :  { %v158_v10 = vld [vmem:[%s286_s2] ss:$0 sm:$0xff] }
   0x6   :  { %193 = vmatpush3.bf16.msra.mxu0 %v213_v2  ;;  %v173_v12 = vld [vmem:[%s287_s3] sm:$0xff]  }
   0x7   :  { %194 = vmatprep.subr.bf16.mxu0 %v221_v0  ;;  %v174_v15 = vunpack.c.l.bf16 %v173_v12  ;;  %v175_v16 = vunpack.c.h.bf16 %v173_v12 }
   0xa   :  { %195 = vmatpush3.bf16.msra.mxu0 %v214_v3 }
   0xb   :  { %196 = vmatprep.subr.bf16.mxu0 %v221_v0 }
   0xe   :  { %197 = vmatpush3.bf16.msra.mxu0 %v215_v4 }
   0xf   :  { %198 = vmatprep.subr.bf16.mxu0 %v221_v0 }
  0x12   :  { %199 = vmatpush3.bf16.msra.mxu0 %v216_v5 }
  0x13   :  { %200 = vmatprep.subr.bf16.mxu0 %v221_v0 }
  0x16   :  { %201 = vmatpush3.bf16.msra.mxu0 %v217_v6 }
  0x17   :  { %202 = vmatprep.subr.bf16.mxu0 %v221_v0 }
  0x1a   :  { %203 = vmatpush3.bf16.msra.mxu0 %v218_v7 }
  0x1b   :  { %204 = vmatprep.subr.bf16.mxu0 %v221_v0 }
  0x1e   :  { %205 = vmatpush3.bf16.msra.mxu0 %v219_v8 }
  0x21   :  { %207 = vmatmul.mubr.bf16.vlgmr.msra.gmra.mxu0 %v220_v9 }
  0xe1   :  { %v131_v11 = vpop.f32.mrf.mxu0 }
  0xe2   :  { %v132_v14 = vadd.f32 %v158_v10, %v131_v11 }
  0xe3   :  { %v208_v13 = vpop.f32.mrf.mxu0 }
  0xe4   :  { %v142_v20 = vadd.f32 %v174_v15, %v132_v14 }
  0xe5   :  { %v134_v17 = vpop.f32.mrf.mxu0 }
  0xe6   :  { %v135_v18 = vadd.f32 %v158_v10, %v134_v17 }
  0xe7   :  { %v209_v19 = vpop.f32.mrf.mxu0 }
  0xe8   :  { %v143_v21 = vadd.f32 %v175_v16, %v135_v18 }
  0xea   :  { %v179_v22 = vpack.c.bf16 %v143_v21, %v142_v20 }
  0xec   :  { %180 = vst [vmem:[%s288_s4] sm:$0xff] %v179_v22  }

// kernel: timesformer_forward.32
= control target key start
LH: loop header
LB: loop body
LE: loop exit
PB: predicated region body
PF: predicated region fallthrough
CT: control target
= control target key end

     0   :  { %s155_s0 = inlined_call_operand.vmem [shape: bf16[24,128], index: 0, kind: input, shape index: {}]   ;;  %s156_s1 = inlined_call_operand.vmem [shape: f32[1,128], index: 1, kind: input, shape index: {}]   ;;  %s157_s2 = inlined_call_operand.vmem [shape: f32[1,128], index: 2, kind: input, shape index: {}]   ;;  %s158_s3 = inlined_call_operand.vmem [shape: bf16[24,128], index: 3, kind: output, shape index: {}]  }
   0x1   :  { %v103_v0 = vld [vmem:[%s155_s0] sm:$0xff]   ;;  %v16_v1 = vld [vmem:[%s155_s0 + $0x8] sm:$0xf] }
   0x2   :  { %v104_v2 = vunpack.c.l.bf16 %v103_v0  ;;  %v19_v3 = vunpack.c.l.bf16 %v16_v1  ;;  %v105_v4 = vunpack.c.h.bf16 %v103_v0  ;;  %v94_v28 = vld [vmem:[%s156_s1] ss:$0 sm:$0xff] }
   0x3   :  { %v95_v34 = vld [vmem:[%s157_s2] ss:$0 sm:$0xff] }
   0x4   :  { %20 = vadd.xlane.f32.xlu0 %v104_v2  ;;  %24 = vadd.xlane.f32.xlu1 %v19_v3 }
   0x8   :  { %22 = vadd.xlane.f32.xlu0 %v105_v4 }
  0x8d   :  { %v21_v5 = vpop.xlane.xlu0 %20  ;;  %v25_v6 = vpop.xlane.xlu1 %24 }
  0x8e   :  { %v27_v7 = vmul.f32 0.0078125, %v21_v5  ;;  %v29_v8 = vmul.f32 0.0078125, %v25_v6 }
  0x90   :  { %v30_v9 = vsub.f32 %v104_v2, %v27_v7  ;;  %v32_v10 = vsub.f32 %v19_v3, %v29_v8 }
  0x91   :  { %v23_v11 = vpop.xlane.xlu0 %22 }
  0x92   :  { %v28_v12 = vmul.f32 0.0078125, %v23_v11  ;;  %v33_v13 = vmul.f32 %v30_v9, %v30_v9  ;;  %v35_v15 = vmul.f32 %v32_v10, %v32_v10 }
  0x94   :  { %v31_v14 = vsub.f32 %v105_v4, %v28_v12  ;;  %36 = vadd.xlane.f32.xlu1 %v33_v13 }
  0x96   :  { %v34_v16 = vmul.f32 %v31_v14, %v31_v14 }
  0x98   :  { %40 = vadd.xlane.f32.xlu1 %v35_v15  ;;  %38 = vadd.xlane.f32.xlu0 %v34_v16 }
 0x11d   :  { %v37_v17 = vpop.xlane.xlu1 %36 }
 0x11e   :  { %v42_v18 = vmul.f32 0.0078125, %v37_v17 }
 0x120   :  { %v45_v19 = vadd.f32 1e-06, %v42_v18 }
 0x121   :  { %v41_v20 = vpop.xlane.xlu1 %40  ;;  %v39_v21 = vpop.xlane.xlu0 %38 }
 0x122   :  { %111 = vrsqrt.f32 %v45_v19  ;;  %v44_v22 = vmul.f32 0.0078125, %v41_v20  ;;  %v43_v23 = vmul.f32 0.0078125, %v39_v21 }
 0x124   :  { %v47_v24 = vadd.f32 1e-06, %v44_v22  ;;  %v46_v25 = vadd.f32 1e-06, %v43_v23 }
 0x126   :  { %113 = vrsqrt.f32 %v47_v24 }
 0x127   :  { %115 = vrsqrt.f32 %v46_v25 }
 0x12f   :  { %v112_v26 = vpop.eup %111 }
 0x130   :  { %v51_v27 = vmul.f32 %v112_v26, %v30_v9 }
 0x132   :  { %v61_v32 = vmul.f32 %v94_v28, %v51_v27 }
 0x133   :  { %v114_v29 = vpop.eup %113 }
 0x134   :  { %v116_v30 = vpop.eup %115  ;;  %v53_v31 = vmul.f32 %v114_v29, %v32_v10  ;;  %v71_v38 = vadd.f32 %v95_v34, %v61_v32 }
 0x135   :  { %v52_v33 = vmul.f32 %v116_v30, %v31_v14 }
 0x136   :  { %v63_v35 = vmul.f32 %v94_v28, %v53_v31 }
 0x137   :  { %v62_v36 = vmul.f32 %v94_v28, %v52_v33 }
 0x138   :  { %v73_v37 = vadd.f32 %v95_v34, %v63_v35 }
 0x139   :  { %v72_v39 = vadd.f32 %v95_v34, %v62_v36 }
 0x13a   :  { %v101_v40 = vpack.c.bf16 %v73_v37, %v73_v37 }
 0x13b   :  { %v109_v41 = vpack.c.bf16 %v72_v39, %v71_v38 }
 0x13c   :  { %89 = vst [vmem:[%s158_s3 + $0x8] sm:$0xf] %v101_v40 }
 0x13d   :  { %110 = vst [vmem:[%s158_s3] sm:$0xff] %v109_v41  }

// kernel: timesformer_forward.33
= control target key start
LH: loop header
LB: loop body
LE: loop exit
PB: predicated region body
PF: predicated region fallthrough
CT: control target
= control target key end

     0   :  { %v450_v1 = vmov 0   ;;  %v52_v27 = vlaneseq  ;;  %s570_s1 = inlined_call_operand.vmem [shape: bf16[128,384], index: 1, kind: input, shape index: {}]   ;;  %s571_s0 = inlined_call_operand.vmem [shape: bf16[24,128], index: 0, kind: input, shape index: {}]   ;;  %s572_s2 = inlined_call_operand.vmem [shape: f32[1,384], index: 2, kind: input, shape index: {}]   ;;  %s573_s3 = inlined_call_operand.vmem [shape: bf16[24,384], index: 3, kind: output, shape index: {}]  }
   0x1   :  { %v416_v0 = vld [vmem:[%s570_s1 + $0xac] ss:$12 sps:$4 sm:$0xff]   ;;  %237 = vmatprep.mubr.bf16.mxu0 %v450_v1  ;;  %v418_v2 = vld [vmem:[%s570_s1 + $0xb0] ss:$12 sps:$4 sm:$0xff]   ;;  %v419_v3 = vld [vmem:[%s570_s1 + $0xa8] ss:$12 sps:$4 sm:$0xff]  }
   0x2   :  { %205 = vmatprep.subr.bf16.mxu0 %v416_v0  ;;  %395 = vmatprep.subr.bf16.mxu1 %v418_v2  ;;  %v420_v4 = vld [vmem:[%s570_s1 + $0x94] ss:$12 sps:$4 sm:$0xff]   ;;  %v422_v5 = vld [vmem:[%s570_s1 + $0x98] ss:$12 sps:$4 sm:$0xff]   ;;  %v423_v6 = vld [vmem:[%s570_s1 + $0x90] ss:$12 sps:$4 sm:$0xff]  }
   0x3   :  { %206 = vmatpush1.bf16.msra.mxu0 %v419_v3  ;;  %396 = vmatpush3.bf16.msra.mxu1 %v418_v2  ;;  %v424_v7 = vld [vmem:[%s570_s1 + $0x7c] ss:$12 sps:$4 sm:$0xff]   ;;  %v426_v8 = vld [vmem:[%s570_s1 + $0x80] ss:$12 sps:$4 sm:$0xff]   ;;  %v427_v9 = vld [vmem:[%s570_s1 + $0x78] ss:$12 sps:$4 sm:$0xff]  }
   0x4   :  { %207 = vmatprep.subr.bf16.mxu0 %v420_v4  ;;  %397 = vmatprep.subr.bf16.mxu1 %v422_v5  ;;  %v428_v10 = vld [vmem:[%s570_s1 + $0x64] ss:$12 sps:$4 sm:$0xff]   ;;  %v430_v11 = vld [vmem:[%s570_s1 + $0x68] ss:$12 sps:$4 sm:$0xff]   ;;  %v431_v12 = vld [vmem:[%s570_s1 + $0x60] ss:$12 sps:$4 sm:$0xff]  }
   0x5   :  { %v432_v13 = vld [vmem:[%s570_s1 + $0x4c] ss:$12 sps:$4 sm:$0xff]   ;;  %v434_v14 = vld [vmem:[%s570_s1 + $0x50] ss:$12 sps:$4 sm:$0xff]   ;;  %v435_v15 = vld [vmem:[%s570_s1 + $0x48] ss:$12 sps:$4 sm:$0xff]  }
   0x6   :  { %v436_v16 = vld [vmem:[%s570_s1 + $0x34] ss:$12 sps:$4 sm:$0xff]   ;;  %v438_v17 = vld [vmem:[%s570_s1 + $0x38] ss:$12 sps:$4 sm:$0xff]   ;;  %v439_v19 = vld [vmem:[%s570_s1 + $0x30] ss:$12 sps:$4 sm:$0xff]  }
   0x7   :  { %208 = vmatpush1.bf16.msra.mxu0 %v423_v6  ;;  %398 = vmatpush3.bf16.msra.mxu1 %v422_v5  ;;  %v448_v18 = vld [vmem:[%s571_s0] sm:$0xff]   ;;  %v440_v20 = vld [vmem:[%s570_s1 + $0x1c] ss:$12 sps:$4 sm:$0xff]   ;;  %v53_v28 = vshrl.u32 %v52_v27, 7 }
   0x8   :  { %209 = vmatprep.subr.bf16.mxu0 %v424_v7  ;;  %399 = vmatprep.subr.bf16.mxu1 %v426_v8  ;;  %v442_v21 = vld [vmem:[%s570_s1 + $0x20] ss:$12 sps:$4 sm:$0xff]   ;;  %v443_v22 = vld [vmem:[%s570_s1 + $0x18] ss:$12 sps:$4 sm:$0xff]   ;;  %v446_v24 = vld [vmem:[%s570_s1 + $0x8] ss:$12 sps:$4 sm:$0xff]  }
   0x9   :  { %411 = vmatprep.mubr.bf16.mxu1 %v448_v18  ;;  %v444_v23 = vld [vmem:[%s570_s1 + $0x4] ss:$12 sps:$4 sm:$0xff]   ;;  %v447_v25 = vld [vmem:[%s570_s1] ss:$12 sps:$4 sm:$0xff]   ;;  %v449_v26 = vld [vmem:[%s571_s0 + $0x8] ss:$0 sps:$4 sm:$0xff]  }
   0xa   :  { %v62_v29 = vsub.s32 2, %v53_v28  ;;  %v54_v30 = vsub.s32 0, %v53_v28  ;;  %v58_v31 = vsub.s32 1, %v53_v28  ;;  %v50_v32 = vld [vmem:[%s572_s2] sm:$0x7] }
   0xb   :  { %210 = vmatpush1.bf16.msra.mxu0 %v427_v9  ;;  %400 = vmatpush3.bf16.msra.mxu1 %v426_v8 }
   0xc   :  { %211 = vmatprep.subr.bf16.mxu0 %v428_v10  ;;  %401 = vmatprep.subr.bf16.mxu1 %v430_v11  ;;  %v63_v33 = vrot.slane %v50_v32, %v62_v29  ;;  %v55_v34 = vrot.slane %v50_v32, %v54_v30  ;;  %v59_v35 = vrot.slane %v50_v32, %v58_v31 }
   0xf   :  { %212 = vmatpush1.bf16.msra.mxu0 %v431_v12  ;;  %402 = vmatpush3.bf16.msra.mxu1 %v430_v11 }
  0x10   :  { %213 = vmatprep.subr.bf16.mxu0 %v432_v13  ;;  %403 = vmatprep.subr.bf16.mxu1 %v434_v14 }
  0x13   :  { %214 = vmatpush1.bf16.msra.mxu0 %v435_v15  ;;  %404 = vmatpush3.bf16.msra.mxu1 %v434_v14 }
  0x14   :  { %215 = vmatprep.subr.bf16.mxu0 %v436_v16  ;;  %405 = vmatprep.subr.bf16.mxu1 %v438_v17 }
  0x17   :  { %216 = vmatpush1.bf16.msra.mxu0 %v439_v19  ;;  %406 = vmatpush3.bf16.msra.mxu1 %v438_v17 }
  0x18   :  { %217 = vmatprep.subr.bf16.mxu0 %v440_v20  ;;  %407 = vmatprep.subr.bf16.mxu1 %v442_v21 }
  0x1b   :  { %218 = vmatpush1.bf16.msra.mxu0 %v443_v22  ;;  %408 = vmatpush3.bf16.msra.mxu1 %v442_v21 }
  0x1c   :  { %219 = vmatprep.subr.bf16.mxu0 %v444_v23  ;;  %409 = vmatprep.subr.bf16.mxu1 %v446_v24 }
  0x1f   :  { %220 = vmatpush1.bf16.msra.mxu0 %v447_v25  ;;  %410 = vmatpush3.bf16.msra.mxu1 %v446_v24 }
  0x22   :  { %238 = vmatmul.mubr.bf16.vlgmr.msra.gmra.mxu0 %v448_v18  ;;  %412 = vmatmul.mubr.bf16.vlgmr.msra.gmra.mxu1 %v449_v26 }
  0x23   :  { %247 = vmatprep.mubr.bf16.mxu0 %v450_v1 }
  0x2a   :  { %248 = vmatmul.mubr.bf16.gmra.mxu0 %v449_v26 }
  0xe2   :  { %v239_v36 = vpop.f32.mrf.mxu0  ;;  %v413_v37 = vpop.f32.mrf.mxu1 }
  0xe3   :  { %v299_v38 = vadd.f32 %v413_v37, %v63_v33  ;;  %v240_v41 = vadd.f32 %v239_v36, %v55_v34 }
  0xe4   :  { %v241_v39 = vpop.f32.mrf.mxu0  ;;  %v290_v40 = vpop.f32.mrf.mxu1 }
  0xe5   :  { %v384_v42 = vpack.c.bf16 %v299_v38, %v299_v38  ;;  %v242_v43 = vadd.f32 %v241_v39, %v59_v35  ;;  %v291_v44 = vadd.f32 %v290_v40, %v63_v33 }
  0xe6   :  { %v243_v45 = vpop.f32.mrf.mxu0  ;;  %v414_v46 = vpop.f32.mrf.mxu1 }
  0xe7   :  { %342 = vst [vmem:[%s573_s3 + $0x20] sm:$0xf] %v384_v42  ;;  %v379_v47 = vpack.c.bf16 %v242_v43, %v240_v41  ;;  %v380_v48 = vpack.c.bf16 %v291_v44, %v291_v44  ;;  %v244_v51 = vadd.f32 %v243_v45, %v55_v34 }
  0xe8   :  { %v245_v49 = vpop.f32.mrf.mxu0  ;;  %v293_v50 = vpop.f32.mrf.mxu1 }
  0xe9   :  { %337 = vst [vmem:[%s573_s3] sm:$0xff] %v379_v47  ;;  %338 = vst [vmem:[%s573_s3 + $0x8] sm:$0xf] %v380_v48  ;;  %v246_v52 = vadd.f32 %v245_v49, %v59_v35  ;;  %v294_v53 = vadd.f32 %v293_v50, %v63_v33 }
  0xea   :  { %v249_v54 = vpop.f32.mrf.mxu0 }
  0xeb   :  { %v381_v55 = vpack.c.bf16 %v246_v52, %v244_v51  ;;  %v382_v56 = vpack.c.bf16 %v294_v53, %v294_v53  ;;  %v250_v58 = vadd.f32 %v249_v54, %v55_v34 }
  0xec   :  { %v251_v57 = vpop.f32.mrf.mxu0 }
  0xed   :  { %339 = vst [vmem:[%s573_s3 + $0xc] sm:$0xff] %v381_v55  ;;  %340 = vst [vmem:[%s573_s3 + $0x14] sm:$0xf] %v382_v56  ;;  %v252_v59 = vadd.f32 %v251_v57, %v59_v35 }
  0xee   :  { %v253_v60 = vpop.f32.mrf.mxu0 }
  0xef   :  { %v383_v61 = vpack.c.bf16 %v252_v59, %v250_v58 }
  0xf0   :  { %v254_v62 = vpop.f32.mrf.mxu0 }
  0xf1   :  { %341 = vst [vmem:[%s573_s3 + $0x18] sm:$0xff] %v383_v61 }

// kernel: timesformer_forward.29
= control target key start
LH: loop header
LB: loop body
LE: loop exit
PB: predicated region body
PF: predicated region fallthrough
CT: control target
= control target key end

     0   :  { %v2911_v1 = vmov 0.0   ;;  %vm2912_vm0 = vmmov 0   ;;  %vm267_vm1 = vcmask 523264   ;;  %vm636_vm2 = vcmask 9216   ;;  %s2914_s23 = smov 64   ;;  %s3618_s0 = inlined_call_operand.vmem [shape: bf16[8,2,384], index: 0, kind: input, shape index: {}, may-alias: {0,1,2}]   ;;  %s3619_s1 = inlined_call_operand.vmem [shape: bf16[8,2,384], index: 1, kind: input, shape index: {}, may-alias: {0,1,2}]   ;;  %s3620_s2 = inlined_call_operand.vmem [shape: bf16[8,2,384], index: 2, kind: input, shape index: {}, may-alias: {0,1,2}]   ;;  %s3621_s3 = inlined_call_operand.vmem [shape: bf16[8,2,128], index: 3, kind: output, shape index: {}]  }
   0x1   :  { %v2539_v0 = vld [vmem:[%s3619_s1 + $0x1] sm:$0x1]  ;;  %2651 = vmatprep.subr.bf16.mxu0 %v2911_v1  ;;  %2657 = vmatprep.subr.bf16.mxu1 %v2911_v1  ;;  %v2540_v2 = vld [vmem:[%s3619_s1 + $0x4] sm:$0x1]  ;;  %v26_v3 = vld [vmem:[%s3618_s0] sm:$0x1] }
   0x2   :  { %100 = vst [vmem:[#allocation3] sm:$0x1] %v2539_v0  ;;  %102 = vst [vmem:[#allocation3 + $0x1] sm:$0x1] %v2540_v2  ;;  %2653 = vmatprep.mubr.msk.bf16.mxu0 %vm2912_vm0, %v2911_v1  ;;  %2659 = vmatprep.mubr.msk.bf16.mxu1 %vm2912_vm0, %v2911_v1  ;;  %v28_v4 = vld [vmem:[%s3618_s0 + $0x3] sm:$0x1] }
   0x3   :  { %27 = vst [vmem:[#allocation2] sm:$0x1] %v26_v3  ;;  %v2541_v5 = vld [vmem:[%s3619_s1 + $0x7] sm:$0x1]  ;;  %29 = vst [vmem:[#allocation2 + $0x1] sm:$0x1] %v28_v4 }
   0x4   :  { %104 = vst [vmem:[#allocation3 + $0x2] sm:$0x1] %v2541_v5  ;;  %v2542_v6 = vld [vmem:[%s3619_s1 + $0xa] sm:$0x1]  ;;  %v30_v7 = vld [vmem:[%s3618_s0 + $0x6] sm:$0x1] }
   0x5   :  { %v32_v8 = vld [vmem:[%s3618_s0 + $0x9] sm:$0x1]  ;;  %106 = vst [vmem:[#allocation3 + $0x3] sm:$0x1] %v2542_v6  ;;  %31 = vst [vmem:[#allocation2 + $0x2] sm:$0x1] %v30_v7 }
   0x6   :  { %33 = vst [vmem:[#allocation2 + $0x3] sm:$0x1] %v32_v8  ;;  %v2543_v9 = vld [vmem:[%s3619_s1 + $0xd] sm:$0x1]  ;;  %v2544_v10 = vld [vmem:[%s3619_s1 + $0x10] sm:$0x1]  ;;  %v1124_v8 = vlaneseq }
   0x7   :  { %v34_v11 = vld [vmem:[%s3618_s0 + $0xc] sm:$0x1]  ;;  %108 = vst [vmem:[#allocation3 + $0x4] sm:$0x1] %v2543_v9  ;;  %110 = vst [vmem:[#allocation3 + $0x5] sm:$0x1] %v2544_v10 }
   0x8   :  { %35 = vst [vmem:[#allocation2 + $0x4] sm:$0x1] %v34_v11  ;;  %v36_v12 = vld [vmem:[%s3618_s0 + $0xf] sm:$0x1]  ;;  %v2545_v13 = vld [vmem:[%s3619_s1 + $0x13] sm:$0x1] }
   0x9   :  { %v38_v14 = vld [vmem:[%s3618_s0 + $0x12] sm:$0x1]  ;;  %37 = vst [vmem:[#allocation2 + $0x5] sm:$0x1] %v36_v12  ;;  %112 = vst [vmem:[#allocation3 + $0x6] sm:$0x1] %v2545_v13 }
   0xa   :  { %39 = vst [vmem:[#allocation2 + $0x6] sm:$0x1] %v38_v14  ;;  %v2546_v15 = vld [vmem:[%s3619_s1 + $0x16] sm:$0x1]  ;;  %v40_v16 = vld [vmem:[%s3618_s0 + $0x15] sm:$0x1] }
   0xb   :  { %114 = vst [vmem:[#allocation3 + $0x7] sm:$0x1] %v2546_v15  ;;  %41 = vst [vmem:[#allocation2 + $0x7] sm:$0x1] %v40_v16  ;;  %v2989_v17 = vld [vmem:[#allocation3] sm:$0x1] }
   0xc   :  { %v272_v18 = vsel %vm267_vm1, %v2989_v17, 0  ;;  %v2993_v19 = vld [vmem:[#allocation3 + $0x1] sm:$0x1]  ;;  %v2997_v21 = vld [vmem:[#allocation2] sm:$0x1]  ;;  %v1125_v16 = vshrl.u32 %v1124_v8, 7 }
   0xd   :  { %2652 = vmatpush3.bf16.xpose.msra.mxu0 %v272_v18  ;;  %v318_v20 = vsel %vm267_vm1, %v2993_v19, 0  ;;  %v2999_v22 = vld [vmem:[#allocation2 + $0x1] sm:$0x1]  ;;  %v3003_v23 = vld [vmem:[#allocation3 + $0x2] sm:$0x1]  ;;  %vm721_vm3 = vcmask 1040384  }
   0xe   :  { %2658 = vmatpush3.bf16.xpose.msra.mxu1 %v318_v20  ;;  %2663 = vmatprep.subr.bf16.mxu0 %v2911_v1  ;;  %v259_v24 = vmul.bf16 1040203264, %v2997_v21  ;;  %v3006_v25 = vld [vmem:[#allocation3 + $0x3] sm:$0x1]  ;;  %v260_v26 = vmul.bf16 1040203264, %v2999_v22 }
   0xf   :  { %2669 = vmatprep.subr.bf16.mxu1 %v2911_v1  ;;  %v364_v27 = vsel %vm267_vm1, %v3003_v23, 0  ;;  %v410_v28 = vsel %vm267_vm1, %v3006_v25, 0  ;;  %v3019_v29 = vld [vmem:[#allocation2 + $0x2] sm:$0x1]  ;;  %v3023_v30 = vld [vmem:[#allocation2 + $0x3] sm:$0x1] }
  0x10   :  { %v3028_v31 = vld [vmem:[#allocation3 + $0x4] sm:$0x1]  ;;  %v261_v32 = vmul.bf16 1040203264, %v3019_v29  ;;  %v3032_v33 = vld [vmem:[#allocation3 + $0x5] sm:$0x1] }
  0x11   :  { %v262_v34 = vmul.bf16 1040203264, %v3023_v30  ;;  %v456_v35 = vsel %vm267_vm1, %v3028_v31, 0  ;;  %v502_v36 = vsel %vm267_vm1, %v3032_v33, 0  ;;  %v3045_v37 = vld [vmem:[#allocation2 + $0x4] sm:$0x1] }
  0x12   :  { %v3049_v38 = vld [vmem:[#allocation2 + $0x5] sm:$0x1]  ;;  %v3054_v39 = vld [vmem:[#allocation3 + $0x6] sm:$0x1]  ;;  %v263_v40 = vmul.bf16 1040203264, %v3045_v37 }
  0x13   :  { %v3058_v41 = vld [vmem:[#allocation3 + $0x7] sm:$0x1]  ;;  %v264_v42 = vmul.bf16 1040203264, %v3049_v38  ;;  %v548_v43 = vsel %vm267_vm1, %v3054_v39, 0  ;;  %vm717_vm4 = vcmask 15360  }
  0x14   :  { %2654 = vmatmul.mubr.msk.bf16.vlgmr.msra.gmra.mxu0 %vm267_vm1, %v259_v24  ;;  %v594_v44 = vsel %vm267_vm1, %v3058_v41, 0  ;;  %v3071_v45 = vld [vmem:[#allocation2 + $0x6] sm:$0x1]  ;;  %v3075_v46 = vld [vmem:[#allocation2 + $0x7] sm:$0x1]  ;;  %vm1111_vm5 = vcmask 516096  }
  0x15   :  { %2660 = vmatmul.mubr.msk.bf16.vlgmr.msra.gmra.mxu1 %vm267_vm1, %v260_v26  ;;  %2664 = vmatpush3.bf16.xpose.msra.mxu0 %v364_v27  ;;  %v265_v47 = vmul.bf16 1040203264, %v3071_v45  ;;  %v266_v48 = vmul.bf16 1040203264, %v3075_v46  ;;  %v2913_v6 = vmov 1966171168  }
  0x16   :  { %2670 = vmatpush3.bf16.xpose.msra.mxu1 %v410_v28  ;;  %2665 = vmatprep.mubr.msk.bf16.mxu0 %vm2912_vm0, %v2911_v1  ;;  %v1122_v7 = vunpack.c.l.s4 %v2913_v6  ;;  %v2547_v20 = vld [vmem:[%s3620_s2 + $0x2] sm:$0x1]  ;;  %v2551_v21 = vld [vmem:[%s3620_s2 + $0xe] sm:$0x1]  ;;  %vm2512_vm6 = vcmask 1040896  }
  0x17   :  { %2671 = vmatprep.mubr.msk.bf16.mxu1 %vm2912_vm0, %v2911_v1  ;;  %2675 = vmatprep.subr.bf16.mxu0 %v2911_v1  ;;  %173 = vst [vmem:[#allocation4] sm:$0x1] %v2547_v20  ;;  %181 = vst [vmem:[#allocation4 + $0x4] sm:$0x1] %v2551_v21 }
  0x18   :  { %2681 = vmatprep.subr.bf16.mxu1 %v2911_v1  ;;  %v1123_v15 = vunpack.c.0.s8 %v1122_v7  ;;  %v2552_v7 = vld [vmem:[%s3620_s2 + $0x11] sm:$0x1] }
  0x19   :  { %183 = vst [vmem:[#allocation4 + $0x5] sm:$0x1] %v2552_v7 }
  0x1c   :  { %2666 = vmatmul.mubr.msk.bf16.vlgmr.msra.gmra.mxu0 %vm267_vm1, %v261_v32 }
  0x1d   :  { %2672 = vmatmul.mubr.msk.bf16.vlgmr.msra.gmra.mxu1 %vm267_vm1, %v262_v34  ;;  %2676 = vmatpush3.bf16.xpose.msra.mxu0 %v456_v35 }
  0x1e   :  { %2682 = vmatpush3.bf16.xpose.msra.mxu1 %v502_v36  ;;  %2677 = vmatprep.mubr.msk.bf16.mxu0 %vm2912_vm0, %v2911_v1  ;;  %v3120_v36 = vsub.s32 %v1123_v15, %v1125_v16  ;;  %v3259_v7 = vld [vmem:[#allocation4 + $0x4] sm:$0x1] }
  0x1f   :  { %2683 = vmatprep.mubr.msk.bf16.mxu1 %vm2912_vm0, %v2911_v1  ;;  %2687 = vmatprep.subr.bf16.mxu0 %v2911_v1 }
  0x20   :  { %2693 = vmatprep.subr.bf16.mxu1 %v2911_v1  ;;  %v1304_v8 = vrot.slane %v3003_v23, %v3120_v36  ;;  %v1447_v16 = vrot.slane %v263_v40, %v3120_v36  ;;  %v1384_v20 = vrot.slane %v3006_v25, %v3120_v36  ;;  %v1544_v22 = vrot.slane %v3032_v33, %v3120_v36 }
  0x22   :  { %v1454_v29 = vrot.slane %v1447_v16, %v3120_v36 }
  0x24   :  { %2678 = vmatmul.mubr.msk.bf16.vlgmr.msra.gmra.mxu0 %vm267_vm1, %v263_v40  ;;  %v1207_v40 = vrot.slane %v260_v26, %v3120_v36  ;;  %v1551_v26 = vrot.slane %v1544_v22, %v3120_v36 }
  0x25   :  { %2684 = vmatmul.mubr.msk.bf16.vlgmr.msra.gmra.mxu1 %vm267_vm1, %v264_v42  ;;  %2688 = vmatpush3.bf16.xpose.msra.mxu0 %v548_v43 }
  0x26   :  { %2689 = vmatprep.mubr.msk.bf16.mxu0 %vm2912_vm0, %v2911_v1  ;;  %2694 = vmatpush3.bf16.xpose.msra.mxu1 %v594_v44  ;;  %v2548_v44 = vld [vmem:[%s3620_s2 + $0x5] sm:$0x1]  ;;  %v1214_v45 = vrot.slane %v1207_v40, %v3120_v36 }
  0x27   :  { %2695 = vmatprep.mubr.msk.bf16.mxu1 %vm2912_vm0, %v2911_v1  ;;  %2699 = vmatprep.subr.bf16.mxu0 %v2911_v1  ;;  %175 = vst [vmem:[#allocation4 + $0x1] sm:$0x1] %v2548_v44  ;;  %v1704_v44 = vrot.slane %v3058_v41, %v3120_v36 }
  0x28   :  { %2705 = vmatprep.subr.bf16.mxu1 %v2911_v1 }
  0x29   :  { %v1711_v33 = vrot.slane %v1704_v44, %v3120_v36 }
  0x2c   :  { %2690 = vmatmul.mubr.msk.bf16.vlgmr.msra.gmra.mxu0 %vm267_vm1, %v265_v47 }
  0x2d   :  { %2696 = vmatmul.mubr.msk.bf16.vlgmr.msra.gmra.mxu1 %vm267_vm1, %v266_v48  ;;  %2701 = vmatprep.mubr.msk.bf16.mxu0 %vm2912_vm0, %v2911_v1 }
  0x2e   :  { %2707 = vmatprep.mubr.msk.bf16.mxu1 %vm2912_vm0, %v2911_v1 }
  0xd4   :  { %v3093_v49 = vpop.f32.mrf.mxu0 }
  0xd5   :  { %v3095_v50 = vpop.f32.mrf.mxu1  ;;  %v637_v51 = vsel %vm636_vm2, %v3093_v49, -inf }
  0xd6   :  { %638 = vmax.xlane.f32.xlu0 %v637_v51  ;;  %v2655_v52 = vpop.f32.mrf.mxu0  ;;  %v640_v56 = vsel %vm636_vm2, %v3095_v50, -inf }
  0xd7   :  { %v2661_v53 = vpop.f32.mrf.mxu1 }
  0xd8   :  { %v311_v54 = vpop.f32.mrf.mxu0 }
  0xd9   :  { %v357_v55 = vpop.f32.mrf.mxu1 }
  0xda   :  { %641 = vmax.xlane.f32.xlu0 %v640_v56  ;;  %v2656_v57 = vpop.f32.mrf.mxu0  ;;  %v1224_v55 = vrot.slane %v2993_v19, %v3120_v36 }
  0xdb   :  { %v2662_v58 = vpop.f32.mrf.mxu1  ;;  %v3133_v57 = vld [vmem:[#allocation4] sm:$0x1] }
  0xdc   :  { %v3101_v59 = vpop.f32.mrf.mxu0  ;;  %v2549_v58 = vld [vmem:[%s3620_s2 + $0x8] sm:$0x1]  ;;  %v1231_v19 = vrot.slane %v1224_v55, %v3120_v36 }
  0xdd   :  { %v3103_v60 = vpop.f32.mrf.mxu1  ;;  %v643_v61 = vsel %vm636_vm2, %v3101_v59, -inf  ;;  %177 = vst [vmem:[#allocation4 + $0x2] sm:$0x1] %v2549_v58 }
  0xde   :  { %644 = vmax.xlane.f32.xlu1 %v643_v61  ;;  %v2667_v62 = vpop.f32.mrf.mxu0  ;;  %v646_v3 = vsel %vm636_vm2, %v3103_v60, -inf }
  0xdf   :  { %v2673_v63 = vpop.f32.mrf.mxu1  ;;  %v723_v62 = vsel %vm721_vm3, %v3133_v57, 0 }
  0xe0   :  { %v403_v0 = vpop.f32.mrf.mxu0  ;;  %2700 = vmatpush3.bf16.msra.mxu0 %v723_v62 }
  0xe1   :  { %v449_v2 = vpop.f32.mrf.mxu1  ;;  %2711 = vmatprep.subr.bf16.mxu0 %v2911_v1 }
  0xe2   :  { %647 = vmax.xlane.f32.xlu1 %v646_v3  ;;  %v2668_v4 = vpop.f32.mrf.mxu0  ;;  %v1127_v2 = vrot.slane %v259_v24, %v3120_v36  ;;  %v3145_v3 = vld [vmem:[#allocation4 + $0x1] sm:$0x1]  ;;  %v1144_v24 = vrot.slane %v2989_v17, %v3120_v36  ;;  %v1311_v17 = vrot.slane %v1304_v8, %v3120_v36 }
  0xe3   :  { %v2674_v5 = vpop.f32.mrf.mxu1  ;;  %v2550_v4 = vld [vmem:[%s3620_s2 + $0xb] sm:$0x1] }
  0xe4   :  { %v3109_v9 = vpop.f32.mrf.mxu0  ;;  %v769_v5 = vsel %vm721_vm3, %v3145_v3, 0  ;;  %179 = vst [vmem:[#allocation4 + $0x3] sm:$0x1] %v2550_v4  ;;  %v1134_v6 = vrot.slane %v1127_v2, %v3120_v36 }
  0xe5   :  { %v3111_v10 = vpop.f32.mrf.mxu1  ;;  %v649_v11 = vsel %vm636_vm2, %v3109_v9, -inf  ;;  %2706 = vmatpush3.bf16.msra.mxu1 %v769_v5 }
  0xe6   :  { %v652_v12 = vsel %vm636_vm2, %v3111_v10, -inf  ;;  %650 = vmax.xlane.f32.xlu0 %v649_v11  ;;  %v2679_v13 = vpop.f32.mrf.mxu0  ;;  %2717 = vmatprep.subr.bf16.mxu1 %v2911_v1  ;;  %v1151_v11 = vrot.slane %v1144_v24, %v3120_v36 }
  0xe7   :  { %v2685_v14 = vpop.f32.mrf.mxu1  ;;  %653 = vmax.xlane.f32.xlu1 %v652_v12  ;;  %v2553_v12 = vld [vmem:[%s3620_s2 + $0x14] sm:$0x1]  ;;  %v1287_v13 = vrot.slane %v261_v32, %v3120_v36  ;;  %v1607_v32 = vrot.slane %v265_v47, %v3120_v36  ;;  %v2554_v47 = vld [vmem:[%s3620_s2 + $0x17] sm:$0x1] }
  0xe8   :  { %v495_v18 = vpop.f32.mrf.mxu0  ;;  %185 = vst [vmem:[#allocation4 + $0x6] sm:$0x1] %v2553_v12  ;;  %v1464_v14 = vrot.slane %v3028_v31, %v3120_v36  ;;  %187 = vst [vmem:[#allocation4 + $0x7] sm:$0x1] %v2554_v47 }
  0xe9   :  { %v541_v27 = vpop.f32.mrf.mxu1  ;;  %v1294_v23 = vrot.slane %v1287_v13, %v3120_v36  ;;  %v1624_v18 = vrot.slane %v3054_v39, %v3120_v36  ;;  %v1614_v37 = vrot.slane %v1607_v32, %v3120_v36  ;;  %v907_v13 = vsel %vm721_vm3, %v3259_v7, 0 }
  0xea   :  { %v2680_v28 = vpop.f32.mrf.mxu0  ;;  %v1471_v15 = vrot.slane %v1464_v14, %v3120_v36  ;;  %v1391_v27 = vrot.slane %v1384_v20, %v3120_v36  ;;  %v3272_v14 = vld [vmem:[#allocation4 + $0x5] sm:$0x1] }
  0xeb   :  { %v2686_v35 = vpop.f32.mrf.mxu1  ;;  %v1631_v31 = vrot.slane %v1624_v18, %v3120_v36  ;;  %v1367_v28 = vrot.slane %v262_v34, %v3120_v36  ;;  %v1687_v34 = vrot.slane %v266_v48, %v3120_v36 }
  0xec   :  { %v3122_v43 = vpop.f32.mrf.mxu0  ;;  %v1527_v35 = vrot.slane %v264_v42, %v3120_v36 }
  0xed   :  { %v655_v51 = vsel %vm636_vm2, %v3122_v43, -inf  ;;  %v3129_v52 = vpop.f32.mrf.mxu1  ;;  %v1374_v25 = vrot.slane %v1367_v28, %v3120_v36  ;;  %v1694_v38 = vrot.slane %v1687_v34, %v3120_v36 }
  0xee   :  { %656 = vmax.xlane.f32.xlu0 %v655_v51  ;;  %v2691_v53 = vpop.f32.mrf.mxu0  ;;  %v658_v39 = vsel %vm636_vm2, %v3129_v52, -inf  ;;  %v1534_v30 = vrot.slane %v1527_v35, %v3120_v36 }
  0xef   :  { %v2697_v54 = vpop.f32.mrf.mxu1  ;;  %v3284_v16 = vld [vmem:[#allocation4 + $0x6] sm:$0x1] }
  0xf0   :  { %v587_v56 = vpop.f32.mrf.mxu0 }
  0xf1   :  { %v633_v61 = vpop.f32.mrf.mxu1 }
  0xf2   :  { %v2692_v63 = vpop.f32.mrf.mxu0 }
  0xf3   :  { %v2698_v0 = vpop.f32.mrf.mxu1 }
  0xf4   :  { %v3237_v0 = vld [vmem:[#allocation4 + $0x2] sm:$0x1] }
  0xf8   :  { %1232 = vrot.lane.b32.xlu1 %v1231_v19, %s2914_s23 }
  0xfc   :  { %1135 = vrot.lane.b32.xlu1 %v1134_v6, %s2914_s23  ;;  %v3247_v6 = vld [vmem:[#allocation4 + $0x3] sm:$0x1] }
 0x104   :  { %1152 = vrot.lane.b32.xlu0 %v1151_v11, %s2914_s23 }
 0x108   :  { %1312 = vrot.lane.b32.xlu0 %v1311_v17, %s2914_s23 }
 0x10c   :  { %1295 = vrot.lane.b32.xlu0 %v1294_v23, %s2914_s23 }
 0x110   :  { %1472 = vrot.lane.b32.xlu0 %v1471_v15, %s2914_s23  ;;  %v953_v15 = vsel %vm721_vm3, %v3272_v14, 0 }
 0x114   :  { %1455 = vrot.lane.b32.xlu0 %v1454_v29, %s2914_s23 }
 0x118   :  { %1632 = vrot.lane.b32.xlu0 %v1631_v31, %s2914_s23  ;;  %v999_v31 = vsel %vm721_vm3, %v3284_v16, 0 }
 0x11c   :  { %1615 = vrot.lane.b32.xlu0 %v1614_v37, %s2914_s23  ;;  %v3298_v37 = vld [vmem:[#allocation4 + $0x7] sm:$0x1] }
 0x11d   :  { %v1045_v40 = vsel %vm721_vm3, %v3298_v37, 0 }
 0x120   :  { %659 = vmax.xlane.f32.xlu1 %v658_v39 }
 0x131   :  { %1215 = vrot.lane.b32.xlu1 %v1214_v45, %s2914_s23 }
 0x135   :  { %1392 = vrot.lane.b32.xlu1 %v1391_v27, %s2914_s23 }
 0x139   :  { %1375 = vrot.lane.b32.xlu1 %v1374_v25, %s2914_s23 }
 0x13d   :  { %1552 = vrot.lane.b32.xlu1 %v1551_v26, %s2914_s23 }
 0x141   :  { %1535 = vrot.lane.b32.xlu1 %v1534_v30, %s2914_s23 }
 0x145   :  { %1712 = vrot.lane.b32.xlu1 %v1711_v33, %s2914_s23 }
 0x149   :  { %1695 = vrot.lane.b32.xlu1 %v1694_v38, %s2914_s23 }
 0x15f   :  { %v639_v42 = vpop.xlane.xlu0 %638 }
 0x160   :  { %v661_v41 = vsub.f32 %v3093_v49, %v639_v42 }
 0x162   :  { %v669_v51 = vmul.f32 1.442695, %v661_v41 }
 0x163   :  { %v642_v53 = vpop.xlane.xlu0 %641 }
 0x164   :  { %2847 = vpow2.f32 %v669_v51  ;;  %v662_v54 = vsub.f32 %v3095_v50, %v642_v53 }
 0x166   :  { %v671_v55 = vmul.f32 1.442695, %v662_v54  ;;  %v1847_v54 = vrot.slane %v3133_v57, %v3120_v36 }
 0x167   :  { %v645_v56 = vpop.xlane.xlu1 %644 }
 0x168   :  { %2849 = vpow2.f32 %v671_v55  ;;  %v663_v46 = vsub.f32 %v3101_v59, %v645_v56  ;;  %v1854_v55 = vrot.slane %v1847_v54, %v3120_v36 }
 0x16a   :  { %v673_v48 = vmul.f32 1.442695, %v663_v46  ;;  %1855 = vrot.lane.b32.xlu0 %v1854_v55, %s2914_s23 }
 0x16b   :  { %v648_v58 = vpop.xlane.xlu1 %647 }
 0x16c   :  { %2851 = vpow2.f32 %v673_v48  ;;  %v664_v61 = vsub.f32 %v3103_v60, %v648_v58  ;;  %v815_v60 = vsel %vm721_vm3, %v3237_v0, 0 }
 0x16e   :  { %v675_v62 = vmul.f32 1.442695, %v664_v61 }
 0x16f   :  { %v651_v63 = vpop.xlane.xlu0 %650 }
 0x170   :  { %2853 = vpow2.f32 %v675_v62  ;;  %v654_v49 = vpop.xlane.xlu1 %653  ;;  %v665_v19 = vsub.f32 %v3109_v9, %v651_v63 }
 0x171   :  { %v3240_v2 = vpop.eup %2847  ;;  %v666_v50 = vsub.f32 %v3111_v10, %v654_v49  ;;  %v861_v10 = vsel %vm721_vm3, %v3247_v6, 0 }
 0x172   :  { %v677_v4 = vmul.f32 1.442695, %v665_v19  ;;  %v709_v59 = vpack.c.bf16 %v3240_v2, %v3240_v2 }
 0x173   :  { %v679_v5 = vmul.f32 1.442695, %v666_v50 }
 0x174   :  { %2855 = vpow2.f32 %v677_v4  ;;  %2702 = vmatmul.mubr.msk.bf16.vlgmr.msra.gmra.mxu0 %vm717_vm4, %v709_v59  ;;  %v1233_v28 = vpop.permute.xlu1 %1232  ;;  %v1910_v4 = vrot.slane %v3145_v3, %v3120_v36  ;;  %v1973_v59 = vrot.slane %v3237_v0, %v3120_v36 }
 0x175   :  { %v3250_v21 = vpop.eup %2849  ;;  %2712 = vmatpush3.bf16.msra.mxu0 %v815_v60  ;;  %2713 = vmatprep.mubr.msk.bf16.mxu0 %vm2912_vm0, %v2911_v1  ;;  %2857 = vpow2.f32 %v679_v5  ;;  %v1238_v48 = vsel %vm267_vm1, %v1233_v28, 0 }
 0x176   :  { %v710_v9 = vpack.c.bf16 %v3250_v21, %v3250_v21  ;;  %2723 = vmatprep.subr.bf16.mxu0 %v2911_v1  ;;  %v1917_v60 = vrot.slane %v1910_v4, %v3120_v36  ;;  %v1980_v3 = vrot.slane %v1973_v59, %v3120_v36 }
 0x177   :  { %v657_v24 = vpop.xlane.xlu0 %656 }
 0x178   :  { %v667_v8 = vsub.f32 %v3122_v43, %v657_v24  ;;  %2708 = vmatmul.mubr.msk.bf16.vlgmr.msra.gmra.mxu1 %vm717_vm4, %v710_v9  ;;  %v1136_v26 = vpop.permute.xlu1 %1135  ;;  %v2036_v9 = vrot.slane %v3247_v6, %v3120_v36  ;;  %1918 = vrot.lane.b32.xlu1 %v1917_v60, %s2914_s23 }
 0x179   :  { %v3263_v11 = vpop.eup %2851  ;;  %2718 = vmatpush3.bf16.msra.mxu1 %v861_v10  ;;  %2719 = vmatprep.mubr.msk.bf16.mxu1 %vm2912_vm0, %v2911_v1 }
 0x17a   :  { %v681_v12 = vmul.f32 1.442695, %v667_v8  ;;  %v711_v17 = vpack.c.bf16 %v3263_v11, %v3263_v11  ;;  %2729 = vmatprep.subr.bf16.mxu1 %v2911_v1  ;;  %v2043_v10 = vrot.slane %v2036_v9, %v3120_v36 }
 0x17b   :  { %v1153_v20 = vpop.permute.xlu0 %1152 }
 0x17c   :  { %2859 = vpow2.f32 %v681_v12  ;;  %2714 = vmatmul.mubr.msk.bf16.vlgmr.msra.gmra.mxu0 %vm717_vm4, %v711_v17  ;;  %v1158_v47 = vsel %vm267_vm1, %v1153_v20, 0  ;;  %1981 = vrot.lane.b32.xlu1 %v1980_v3, %s2914_s23 }
 0x17d   :  { %v3275_v43 = vpop.eup %2853  ;;  %2724 = vmatpush3.bf16.msra.mxu0 %v907_v13  ;;  %2725 = vmatprep.mubr.msk.bf16.mxu0 %vm2912_vm0, %v2911_v1 }
 0x17e   :  { %v712_v23 = vpack.c.bf16 %v3275_v43, %v3275_v43  ;;  %2735 = vmatprep.subr.bf16.mxu0 %v2911_v1 }
 0x17f   :  { %v1313_v22 = vpop.permute.xlu0 %1312 }
 0x180   :  { %2720 = vmatmul.mubr.msk.bf16.vlgmr.msra.gmra.mxu1 %vm717_vm4, %v712_v23  ;;  %v1318_v25 = vsel %vm267_vm1, %v1313_v22, 0  ;;  %2044 = vrot.lane.b32.xlu1 %v2043_v10, %s2914_s23 }
 0x181   :  { %v3287_v18 = vpop.eup %2855  ;;  %2730 = vmatpush3.bf16.msra.mxu1 %v953_v15  ;;  %2731 = vmatprep.mubr.msk.bf16.mxu1 %vm2912_vm0, %v2911_v1 }
 0x182   :  { %v713_v29 = vpack.c.bf16 %v3287_v18, %v3287_v18  ;;  %2741 = vmatprep.subr.bf16.mxu1 %v2911_v1  ;;  %v3296_v32 = vpop.eup %2857 }
 0x183   :  { %v714_v39 = vpack.c.bf16 %v3296_v32, %v3296_v32  ;;  %v1296_v35 = vpop.permute.xlu0 %1295 }
 0x184   :  { %2726 = vmatmul.mubr.msk.bf16.vlgmr.msra.gmra.mxu0 %vm717_vm4, %v713_v29 }
 0x185   :  { %2736 = vmatpush3.bf16.msra.mxu0 %v999_v31  ;;  %2737 = vmatprep.mubr.msk.bf16.mxu0 %vm2912_vm0, %v2911_v1 }
 0x186   :  { %2747 = vmatprep.subr.bf16.mxu0 %v2911_v1 }
 0x187   :  { %v1473_v44 = vpop.permute.xlu0 %1472 }
 0x188   :  { %2732 = vmatmul.mubr.msk.bf16.vlgmr.msra.gmra.mxu1 %vm717_vm4, %v714_v39  ;;  %v1478_v30 = vsel %vm267_vm1, %v1473_v44, 0 }
 0x189   :  { %v3309_v45 = vpop.eup %2859  ;;  %2742 = vmatpush3.bf16.msra.mxu1 %v1045_v40  ;;  %2743 = vmatprep.mubr.msk.bf16.mxu1 %vm2912_vm0, %v2911_v1 }
 0x18a   :  { %v715_v27 = vpack.c.bf16 %v3309_v45, %v3309_v45  ;;  %2753 = vmatprep.subr.bf16.mxu1 %v2911_v1 }
 0x18b   :  { %v1456_v33 = vpop.permute.xlu0 %1455 }
 0x18c   :  { %2738 = vmatmul.mubr.msk.bf16.vlgmr.msra.gmra.mxu0 %vm717_vm4, %v715_v27 }
 0x18d   :  { %2748 = vmatpush3.bf16.xpose.msra.mxu0 %v1158_v47  ;;  %2749 = vmatprep.mubr.msk.bf16.mxu0 %vm2912_vm0, %v2911_v1 }
 0x18e   :  { %2759 = vmatprep.subr.bf16.mxu0 %v2911_v1 }
 0x18f   :  { %v1633_v34 = vpop.permute.xlu0 %1632 }
 0x190   :  { %v1638_v38 = vsel %vm267_vm1, %v1633_v34, 0 }
 0x193   :  { %v1616_v41 = vpop.permute.xlu0 %1615 }
 0x194   :  { %2750 = vmatmul.mubr.msk.bf16.vlgmr.msra.gmra.mxu0 %vm267_vm1, %v1136_v26 }
 0x195   :  { %2760 = vmatpush3.bf16.xpose.msra.mxu0 %v1318_v25  ;;  %2761 = vmatprep.mubr.msk.bf16.mxu0 %vm2912_vm0, %v2911_v1 }
 0x196   :  { %2771 = vmatprep.subr.bf16.mxu0 %v2911_v1 }
 0x19c   :  { %2762 = vmatmul.mubr.msk.bf16.vlgmr.msra.gmra.mxu0 %vm267_vm1, %v1296_v35 }
 0x19d   :  { %2772 = vmatpush3.bf16.xpose.msra.mxu0 %v1478_v30  ;;  %2773 = vmatprep.mubr.msk.bf16.mxu0 %vm2912_vm0, %v2911_v1 }
 0x19e   :  { %2783 = vmatprep.subr.bf16.mxu0 %v2911_v1 }
 0x1a4   :  { %2774 = vmatmul.mubr.msk.bf16.vlgmr.msra.gmra.mxu0 %vm267_vm1, %v1456_v33 }
 0x1a5   :  { %2784 = vmatpush3.bf16.xpose.msra.mxu0 %v1638_v38  ;;  %2785 = vmatprep.mubr.msk.bf16.mxu0 %vm2912_vm0, %v2911_v1 }
 0x1a6   :  { %2795 = vmatprep.subr.bf16.mxu0 %v2911_v1 }
 0x1a9   :  { %v660_v42 = vpop.xlane.xlu1 %659 }
 0x1aa   :  { %v668_v51 = vsub.f32 %v3129_v52, %v660_v42 }
 0x1ac   :  { %v683_v53 = vmul.f32 1.442695, %v668_v51  ;;  %2786 = vmatmul.mubr.msk.bf16.vlgmr.msra.gmra.mxu0 %vm267_vm1, %v1616_v41 }
 0x1ad   :  { %2797 = vmatprep.mubr.msk.bf16.mxu0 %vm2912_vm0, %v2911_v1  ;;  %v1216_v56 = vpop.permute.xlu1 %1215 }
 0x1ae   :  { %2861 = vpow2.f32 %v683_v53 }
 0x1b1   :  { %v1393_v58 = vpop.permute.xlu1 %1392 }
 0x1b2   :  { %v1398_v61 = vsel %vm267_vm1, %v1393_v58, 0 }
 0x1b5   :  { %v1376_v57 = vpop.permute.xlu1 %1375 }
 0x1b9   :  { %v1553_v62 = vpop.permute.xlu1 %1552 }
 0x1ba   :  { %v1558_v49 = vsel %vm267_vm1, %v1553_v62, 0 }
 0x1bb   :  { %v3344_v46 = vpop.eup %2861 }
 0x1bc   :  { %v716_v52 = vpack.c.bf16 %v3344_v46, %v3344_v46 }
 0x1bd   :  { %v1536_v63 = vpop.permute.xlu1 %1535 }
 0x1be   :  { %2744 = vmatmul.mubr.msk.bf16.vlgmr.msra.gmra.mxu1 %vm717_vm4, %v716_v52 }
 0x1bf   :  { %2754 = vmatpush3.bf16.xpose.msra.mxu1 %v1238_v48  ;;  %2755 = vmatprep.mubr.msk.bf16.mxu1 %vm2912_vm0, %v2911_v1 }
 0x1c0   :  { %2765 = vmatprep.subr.bf16.mxu1 %v2911_v1 }
 0x1c1   :  { %v1713_v19 = vpop.permute.xlu1 %1712 }
 0x1c2   :  { %v1718_v50 = vsel %vm267_vm1, %v1713_v19, 0 }
 0x1c5   :  { %v1696_v5 = vpop.permute.xlu1 %1695 }
 0x1c6   :  { %2756 = vmatmul.mubr.msk.bf16.vlgmr.msra.gmra.mxu1 %vm267_vm1, %v1216_v56 }
 0x1c7   :  { %2766 = vmatpush3.bf16.xpose.msra.mxu1 %v1398_v61  ;;  %2767 = vmatprep.mubr.msk.bf16.mxu1 %vm2912_vm0, %v2911_v1 }
 0x1c8   :  { %2777 = vmatprep.subr.bf16.mxu1 %v2911_v1 }
 0x1ce   :  { %2768 = vmatmul.mubr.msk.bf16.vlgmr.msra.gmra.mxu1 %vm267_vm1, %v1376_v57 }
 0x1cf   :  { %2778 = vmatpush3.bf16.xpose.msra.mxu1 %v1558_v49  ;;  %2779 = vmatprep.mubr.msk.bf16.mxu1 %vm2912_vm0, %v2911_v1 }
 0x1d0   :  { %2789 = vmatprep.subr.bf16.mxu1 %v2911_v1 }
 0x1d6   :  { %2780 = vmatmul.mubr.msk.bf16.vlgmr.msra.gmra.mxu1 %vm267_vm1, %v1536_v63 }
 0x1d7   :  { %2790 = vmatpush3.bf16.xpose.msra.mxu1 %v1718_v50  ;;  %2791 = vmatprep.mubr.msk.bf16.mxu1 %vm2912_vm0, %v2911_v1 }
 0x1d8   :  { %2801 = vmatprep.subr.bf16.mxu1 %v2911_v1 }
 0x1dc   :  { %v1856_v35 = vpop.permute.xlu0 %1855 }
 0x1dd   :  { %v1861_v33 = vsel %vm721_vm3, %v1856_v35, 0 }
 0x1de   :  { %2792 = vmatmul.mubr.msk.bf16.vlgmr.msra.gmra.mxu1 %vm267_vm1, %v1696_v5  ;;  %2796 = vmatpush3.bf16.msra.mxu0 %v1861_v33 }
 0x1df   :  { %2803 = vmatprep.mubr.msk.bf16.mxu1 %vm2912_vm0, %v2911_v1  ;;  %2807 = vmatprep.subr.bf16.mxu0 %v2911_v1 }
 0x1ea   :  { %v1919_v51 = vpop.permute.xlu1 %1918 }
 0x1eb   :  { %v1924_v54 = vsel %vm721_vm3, %v1919_v51, 0 }
 0x1ec   :  { %2802 = vmatpush3.bf16.msra.mxu1 %v1924_v54 }
 0x1ed   :  { %2813 = vmatprep.subr.bf16.mxu1 %v2911_v1 }
 0x234   :  { %v3383_v0 = vpop.f32.mrf.mxu0 }
 0x236   :  { %v2703_v24 = vpop.f32.mrf.mxu0 }
 0x238   :  { %v762_v8 = vpop.f32.mrf.mxu0  ;;  %v3385_v6 = vpop.f32.mrf.mxu1 }
 0x23a   :  { %v2704_v12 = vpop.f32.mrf.mxu0  ;;  %v2709_v17 = vpop.f32.mrf.mxu1 }
 0x23c   :  { %v808_v13 = vpop.f32.mrf.mxu1  ;;  %v3387_v23 = vpop.f32.mrf.mxu0 }
 0x23e   :  { %v2710_v15 = vpop.f32.mrf.mxu1  ;;  %v2715_v29 = vpop.f32.mrf.mxu0 }
 0x240   :  { %v854_v31 = vpop.f32.mrf.mxu0  ;;  %v3389_v39 = vpop.f32.mrf.mxu1 }
 0x242   :  { %v2716_v40 = vpop.f32.mrf.mxu0  ;;  %v2721_v20 = vpop.f32.mrf.mxu1 }
 0x244   :  { %v900_v47 = vpop.f32.mrf.mxu1  ;;  %v3391_v27 = vpop.f32.mrf.mxu0 }
 0x246   :  { %v2722_v28 = vpop.f32.mrf.mxu1  ;;  %v2727_v22 = vpop.f32.mrf.mxu0 }
 0x247   :  { %v2162_v22 = vrot.slane %v3272_v14, %v3120_v36  ;;  %v2099_v14 = vrot.slane %v3259_v7, %v3120_v36  ;;  %v2288_v7 = vrot.slane %v3298_v37, %v3120_v36 }
 0x248   :  { %v946_v25 = vpop.f32.mrf.mxu0  ;;  %v3393_v26 = vpop.f32.mrf.mxu1 }
 0x24a   :  { %v2728_v44 = vpop.f32.mrf.mxu0  ;;  %v2733_v30 = vpop.f32.mrf.mxu1 }
 0x24b   :  { %v2169_v30 = vrot.slane %v2162_v22, %v3120_v36 }
 0x24c   :  { %v992_v34 = vpop.f32.mrf.mxu1  ;;  %v3396_v38 = vpop.f32.mrf.mxu0 }
 0x24e   :  { %v2734_v42 = vpop.f32.mrf.mxu1  ;;  %v2739_v41 = vpop.f32.mrf.mxu0 }
 0x250   :  { %v1038_v53 = vpop.f32.mrf.mxu0 }
 0x252   :  { %v2740_v55 = vpop.f32.mrf.mxu0 }
 0x254   :  { %v3401_v56 = vpop.f32.mrf.mxu0 }
 0x255   :  { %v1760_v52 = vsel %vm636_vm2, %v3401_v56, -inf }
 0x256   :  { %1761 = vmax.xlane.f32.xlu0 %v1760_v52  ;;  %v2751_v48 = vpop.f32.mrf.mxu0  ;;  %v2106_v52 = vrot.slane %v2099_v14, %v3120_v36 }
 0x258   :  { %v1197_v58 = vpop.f32.mrf.mxu0 }
 0x25a   :  { %v2752_v57 = vpop.f32.mrf.mxu0 }
 0x25c   :  { %v3405_v61 = vpop.f32.mrf.mxu0 }
 0x25d   :  { %v1766_v62 = vsel %vm636_vm2, %v3405_v61, -inf }
 0x25e   :  { %1767 = vmax.xlane.f32.xlu0 %v1766_v62  ;;  %v2763_v63 = vpop.f32.mrf.mxu0  ;;  %v2295_v62 = vrot.slane %v2288_v7, %v3120_v36 }
 0x25f   :  { %v2225_v63 = vrot.slane %v3284_v16, %v3120_v36 }
 0x260   :  { %v1357_v49 = vpop.f32.mrf.mxu0 }
 0x261   :  { %v2232_v49 = vrot.slane %v2225_v63, %v3120_v36 }
 0x262   :  { %v2764_v19 = vpop.f32.mrf.mxu0 }
 0x264   :  { %v3409_v50 = vpop.f32.mrf.mxu0 }
 0x265   :  { %v1772_v25 = vsel %vm636_vm2, %v3409_v50, -inf }
 0x266   :  { %v2775_v4 = vpop.f32.mrf.mxu0 }
 0x268   :  { %v1517_v59 = vpop.f32.mrf.mxu0 }
 0x26a   :  { %v2776_v60 = vpop.f32.mrf.mxu0 }
 0x26c   :  { %v3411_v5 = vpop.f32.mrf.mxu0 }
 0x26d   :  { %v1778_v57 = vsel %vm636_vm2, %v3411_v5, -inf }
 0x26e   :  { %v2787_v9 = vpop.f32.mrf.mxu0 }
 0x270   :  { %v1677_v3 = vpop.f32.mrf.mxu0 }
 0x272   :  { %v2788_v10 = vpop.f32.mrf.mxu0 }
 0x273   :  { %v1982_v10 = vpop.permute.xlu1 %1981 }
 0x27e   :  { %v3413_v24 = vpop.f32.mrf.mxu1 }
 0x280   :  { %v2745_v8 = vpop.f32.mrf.mxu1 }
 0x282   :  { %v1084_v12 = vpop.f32.mrf.mxu1 }
 0x283   :  { %v1987_v12 = vsel %vm721_vm3, %v1982_v10, 0 }
 0x284   :  { %v2746_v17 = vpop.f32.mrf.mxu1 }
 0x286   :  { %v3415_v13 = vpop.f32.mrf.mxu1 }
 0x287   :  { %v1763_v15 = vsel %vm636_vm2, %v3415_v13, -inf }
 0x288   :  { %1764 = vmax.xlane.f32.xlu1 %v1763_v15  ;;  %v2757_v29 = vpop.f32.mrf.mxu1  ;;  %v2045_v15 = vpop.permute.xlu1 %2044 }
 0x28a   :  { %v1277_v31 = vpop.f32.mrf.mxu1 }
 0x28c   :  { %v2758_v40 = vpop.f32.mrf.mxu1 }
 0x28e   :  { %v3419_v20 = vpop.f32.mrf.mxu1 }
 0x28f   :  { %v1769_v47 = vsel %vm636_vm2, %v3419_v20, -inf }
 0x290   :  { %v2769_v28 = vpop.f32.mrf.mxu1  ;;  %1770 = vmax.xlane.f32.xlu0 %v1769_v47 }
 0x292   :  { %v1437_v35 = vpop.f32.mrf.mxu1 }
 0x294   :  { %v2770_v44 = vpop.f32.mrf.mxu1  ;;  %1773 = vmax.xlane.f32.xlu0 %v1772_v25 }
 0x296   :  { %v3428_v33 = vpop.f32.mrf.mxu1 }
 0x297   :  { %v1775_v48 = vsel %vm636_vm2, %v3428_v33, -inf }
 0x298   :  { %v2781_v34 = vpop.f32.mrf.mxu1 }
 0x299   :  { %2170 = vrot.lane.b32.xlu1 %v2169_v30, %s2914_s23 }
 0x29a   :  { %v1597_v42 = vpop.f32.mrf.mxu1 }
 0x29c   :  { %v2782_v41 = vpop.f32.mrf.mxu1 }
 0x29e   :  { %v3431_v51 = vpop.f32.mrf.mxu1 }
 0x29f   :  { %v1781_v58 = vsel %vm636_vm2, %v3431_v51, -inf }
 0x2a0   :  { %v2793_v53 = vpop.f32.mrf.mxu1 }
 0x2a2   :  { %v1757_v54 = vpop.f32.mrf.mxu1 }
 0x2a4   :  { %v2794_v55 = vpop.f32.mrf.mxu1 }
 0x2aa   :  { %2107 = vrot.lane.b32.xlu0 %v2106_v52, %s2914_s23 }
 0x2bd   :  { %1776 = vmax.xlane.f32.xlu1 %v1775_v48 }
 0x2c1   :  { %1782 = vmax.xlane.f32.xlu1 %v1781_v58 }
 0x2c9   :  { %1779 = vmax.xlane.f32.xlu0 %v1778_v57 }
 0x2d2   :  { %2296 = vrot.lane.b32.xlu1 %v2295_v62, %s2914_s23 }
 0x2df   :  { %2233 = vrot.lane.b32.xlu0 %v2232_v49, %s2914_s23  ;;  %v1762_v19 = vpop.xlane.xlu0 %1761 }
 0x2e0   :  { %v1784_v4 = vsub.f32 %v3401_v56, %v1762_v19 }
 0x2e2   :  { %v1792_v59 = vmul.f32 1.442695, %v1784_v4 }
 0x2e4   :  { %2863 = vpow2.f32 %v1792_v59 }
 0x2e7   :  { %v1768_v60 = vpop.xlane.xlu0 %1767 }
 0x2e8   :  { %v1786_v9 = vsub.f32 %v3405_v61, %v1768_v60 }
 0x2ea   :  { %v1796_v37 = vmul.f32 1.442695, %v1786_v9 }
 0x2ec   :  { %2865 = vpow2.f32 %v1796_v37 }
 0x2f1   :  { %v2864_v3 = vpop.eup %2863 }
 0x2f2   :  { %v1832_v8 = vpack.c.bf16 %v2864_v3, %v2864_v3  ;;  %v1808_v61 = vsel %vm636_vm2, %v2864_v3, 0.0 }
 0x2f4   :  { %2798 = vmatmul.mubr.msk.bf16.vlgmr.msra.gmra.mxu0 %vm717_vm4, %v1832_v8 }
 0x2f5   :  { %2808 = vmatpush3.bf16.msra.mxu0 %v1987_v12  ;;  %2809 = vmatprep.mubr.msk.bf16.mxu0 %vm2912_vm0, %v2911_v1 }
 0x2f6   :  { %2819 = vmatprep.subr.bf16.mxu0 %v2911_v1 }
 0x2f9   :  { %v2866_v16 = vpop.eup %2865 }
 0x2fa   :  { %v1834_v56 = vpack.c.bf16 %v2866_v16, %v2866_v16  ;;  %v1814_v17 = vsel %vm636_vm2, %v2866_v16, 0.0  ;;  %v688_v16 = vsel %vm636_vm2, %v3250_v21, 0.0  ;;  %v685_v21 = vsel %vm636_vm2, %v3240_v2, 0.0 }
 0x2fc   :  { %2810 = vmatmul.mubr.msk.bf16.vlgmr.msra.gmra.mxu0 %vm717_vm4, %v1834_v56 }
 0x2fd   :  { %2821 = vmatprep.mubr.msk.bf16.mxu0 %vm2912_vm0, %v2911_v1 }
 0x2fe   :  { %1809 = vadd.xlane.f32.xlu0 %v1808_v61 }
 0x302   :  { %1815 = vadd.xlane.f32.xlu0 %v1814_v17  ;;  %v694_v17 = vsel %vm636_vm2, %v3275_v43, 0.0  ;;  %v691_v43 = vsel %vm636_vm2, %v3263_v11, 0.0 }
 0x311   :  { %v1765_v29 = vpop.xlane.xlu1 %1764 }
 0x312   :  { %v1785_v31 = vsub.f32 %v3415_v13, %v1765_v29 }
 0x314   :  { %v1794_v40 = vmul.f32 1.442695, %v1785_v31  ;;  %v706_v31 = vsel %vm636_vm2, %v3344_v46, 0.0 }
 0x315   :  { %v2171_v53 = vpop.permute.xlu1 %2170 }
 0x316   :  { %2867 = vpow2.f32 %v1794_v40  ;;  %v2176_v55 = vsel %vm721_vm3, %v2171_v53, 0  ;;  %v697_v40 = vsel %vm636_vm2, %v3287_v18, 0.0 }
 0x319   :  { %v1771_v47 = vpop.xlane.xlu0 %1770 }
 0x31a   :  { %v1787_v28 = vsub.f32 %v3419_v20, %v1771_v47  ;;  %v2050_v20 = vsel %vm721_vm3, %v2045_v15, 0 }
 0x31c   :  { %v1798_v22 = vmul.f32 1.442695, %v1787_v28 }
 0x31d   :  { %v1774_v25 = vpop.xlane.xlu0 %1773 }
 0x31e   :  { %2869 = vpow2.f32 %v1798_v22  ;;  %v1788_v35 = vsub.f32 %v3409_v50, %v1774_v25 }
 0x320   :  { %v1800_v44 = vmul.f32 1.442695, %v1788_v35 }
 0x321   :  { %v2108_v30 = vpop.permute.xlu0 %2107 }
 0x322   :  { %2871 = vpow2.f32 %v1800_v44  ;;  %v2113_v34 = vsel %vm721_vm3, %v2108_v30, 0 }
 0x323   :  { %v2868_v42 = vpop.eup %2867  ;;  %2820 = vmatpush3.bf16.msra.mxu0 %v2113_v34 }
 0x324   :  { %v1811_v41 = vsel %vm636_vm2, %v2868_v42, 0.0  ;;  %v1833_v13 = vpack.c.bf16 %v2868_v42, %v2868_v42  ;;  %2831 = vmatprep.subr.bf16.mxu0 %v2911_v1 }
 0x325   :  { %1812 = vadd.xlane.f32.xlu1 %v1811_v41 }
 0x326   :  { %2804 = vmatmul.mubr.msk.bf16.vlgmr.msra.gmra.mxu1 %vm717_vm4, %v1833_v13 }
 0x327   :  { %2814 = vmatpush3.bf16.msra.mxu1 %v2050_v20  ;;  %2815 = vmatprep.mubr.msk.bf16.mxu1 %vm2912_vm0, %v2911_v1 }
 0x328   :  { %2825 = vmatprep.subr.bf16.mxu1 %v2911_v1 }
 0x32b   :  { %v2870_v50 = vpop.eup %2869 }
 0x32c   :  { %v1817_v14 = vsel %vm636_vm2, %v2870_v50, 0.0  ;;  %v1835_v54 = vpack.c.bf16 %v2870_v50, %v2870_v50 }
 0x32d   :  { %1818 = vadd.xlane.f32.xlu0 %v1817_v14 }
 0x32e   :  { %2816 = vmatmul.mubr.msk.bf16.vlgmr.msra.gmra.mxu1 %vm717_vm4, %v1835_v54 }
 0x32f   :  { %v2872_v52 = vpop.eup %2871  ;;  %2826 = vmatpush3.bf16.msra.mxu1 %v2176_v55  ;;  %2827 = vmatprep.mubr.msk.bf16.mxu1 %vm2912_vm0, %v2911_v1 }
 0x330   :  { %v1820_v48 = vsel %vm636_vm2, %v2872_v52, 0.0  ;;  %v1836_v58 = vpack.c.bf16 %v2872_v52, %v2872_v52  ;;  %2837 = vmatprep.subr.bf16.mxu1 %v2911_v1 }
 0x331   :  { %1821 = vadd.xlane.f32.xlu0 %v1820_v48 }
 0x332   :  { %2822 = vmatmul.mubr.msk.bf16.vlgmr.msra.gmra.mxu0 %vm717_vm4, %v1836_v58 }
 0x333   :  { %2833 = vmatprep.mubr.msk.bf16.mxu0 %vm2912_vm0, %v2911_v1 }
 0x346   :  { %v1777_v57 = vpop.xlane.xlu1 %1776 }
 0x347   :  { %v1789_v7 = vsub.f32 %v3428_v33, %v1777_v57 }
 0x349   :  { %v1802_v62 = vmul.f32 1.442695, %v1789_v7 }
 0x34a   :  { %v1783_v63 = vpop.xlane.xlu1 %1782 }
 0x34b   :  { %2873 = vpow2.f32 %v1802_v62  ;;  %v1791_v49 = vsub.f32 %v3431_v51, %v1783_v63 }
 0x34d   :  { %v1806_v19 = vmul.f32 1.442695, %v1791_v49 }
 0x34e   :  { %v2297_v9 = vpop.permute.xlu1 %2296 }
 0x34f   :  { %2875 = vpow2.f32 %v1806_v19  ;;  %v2302_v12 = vsel %vm721_vm3, %v2297_v9, 0 }
 0x352   :  { %v1780_v4 = vpop.xlane.xlu0 %1779 }
 0x353   :  { %v1790_v59 = vsub.f32 %v3411_v5, %v1780_v4 }
 0x355   :  { %v1804_v60 = vmul.f32 1.442695, %v1790_v59 }
 0x356   :  { %v2234_v37 = vpop.permute.xlu0 %2233 }
 0x357   :  { %2877 = vpow2.f32 %v1804_v60  ;;  %v2239_v3 = vsel %vm721_vm3, %v2234_v37, 0 }
 0x358   :  { %v2874_v10 = vpop.eup %2873  ;;  %2832 = vmatpush3.bf16.msra.mxu0 %v2239_v3 }
 0x359   :  { %v1823_v33 = vsel %vm636_vm2, %v2874_v10, 0.0  ;;  %v1837_v8 = vpack.c.bf16 %v2874_v10, %v2874_v10 }
 0x35a   :  { %1824 = vadd.xlane.f32.xlu1 %v1823_v33 }
 0x35b   :  { %2828 = vmatmul.mubr.msk.bf16.vlgmr.msra.gmra.mxu1 %vm717_vm4, %v1837_v8 }
 0x35c   :  { %v2876_v51 = vpop.eup %2875  ;;  %2838 = vmatpush3.bf16.msra.mxu1 %v2302_v12  ;;  %2839 = vmatprep.mubr.msk.bf16.mxu1 %vm2912_vm0, %v2911_v1  ;;  %v700_v1 = vsel %vm636_vm2, %v3296_v32, 0.0  ;;  %v703_v32 = vsel %vm636_vm2, %v3309_v45, 0.0 }
 0x35d   :  { %v1829_v5 = vsel %vm636_vm2, %v2876_v51, 0.0  ;;  %v1839_v56 = vpack.c.bf16 %v2876_v51, %v2876_v51 }
 0x35e   :  { %1830 = vadd.xlane.f32.xlu1 %v1829_v5 }
 0x362   :  { %689 = vadd.xlane.f32.xlu1 %v688_v16 }
 0x363   :  { %2840 = vmatmul.mubr.msk.bf16.vlgmr.msra.gmra.mxu1 %vm717_vm4, %v1839_v56 }
 0x364   :  { %v2878_v61 = vpop.eup %2877 }
 0x365   :  { %v1826_v15 = vsel %vm636_vm2, %v2878_v61, 0.0  ;;  %v1838_v29 = vpack.c.bf16 %v2878_v61, %v2878_v61 }
 0x366   :  { %695 = vadd.xlane.f32.xlu1 %v694_v17  ;;  %1827 = vadd.xlane.f32.xlu0 %v1826_v15 }
 0x367   :  { %2834 = vmatmul.mubr.msk.bf16.vlgmr.msra.gmra.mxu0 %vm717_vm4, %v1838_v29 }
 0x36a   :  { %701 = vadd.xlane.f32.xlu1 %v700_v1  ;;  %686 = vadd.xlane.f32.xlu0 %v685_v21 }
 0x36e   :  { %707 = vadd.xlane.f32.xlu1 %v706_v31  ;;  %692 = vadd.xlane.f32.xlu0 %v691_v43 }
 0x372   :  { %698 = vadd.xlane.f32.xlu0 %v697_v40 }
 0x376   :  { %704 = vadd.xlane.f32.xlu0 %v703_v32 }
 0x387   :  { %v1810_v47 = vpop.xlane.xlu0 %1809 }
 0x388   :  { %2879 = vrcp.f32 %v1810_v47 }
 0x38b   :  { %v1816_v41 = vpop.xlane.xlu0 %1815 }
 0x38c   :  { %2881 = vrcp.f32 %v1816_v41 }
 0x395   :  { %v2880_v2 = vpop.eup %2879 }
 0x399   :  { %v2882_v14 = vpop.eup %2881 }
 0x3ae   :  { %v1813_v13 = vpop.xlane.xlu1 %1812 }
 0x3af   :  { %2883 = vrcp.f32 %v1813_v13 }
 0x3b4   :  { %v1897_v28 = vpop.f32.mrf.mxu0 }
 0x3b5   :  { %v2352_v22 = vmul.f32 %v2880_v2, %v1897_v28 }
 0x3b6   :  { %v2799_v25 = vpop.f32.mrf.mxu0  ;;  %v1819_v20 = vpop.xlane.xlu0 %1818 }
 0x3b7   :  { %v2360_v46 = vpack.c.bf16 %v2352_v22, %v2352_v22  ;;  %2885 = vrcp.f32 %v1819_v20 }
 0x3b8   :  { %v1900_v35 = vpop.f32.mrf.mxu0 }
 0x3b9   :  { %v2382_v11 = vrot.slane %v2360_v46, %v3120_v36 }
 0x3ba   :  { %v2800_v44 = vpop.f32.mrf.mxu0  ;;  %v1822_v50 = vpop.xlane.xlu0 %1821 }
 0x3bb   :  { %v2389_v30 = vrot.slane %v2382_v11, %v3120_v36  ;;  %2887 = vrcp.f32 %v1822_v50 }
 0x3bc   :  { %v2023_v34 = vpop.f32.mrf.mxu0  ;;  %v2884_v55 = vpop.eup %2883 }
 0x3bd   :  { %2488 = vrot.lane.b32.xlu0 %v2389_v30, %s2914_s23  ;;  %v2354_v54 = vmul.f32 %v2882_v14, %v2023_v34 }
 0x3be   :  { %v2811_v18 = vpop.f32.mrf.mxu0 }
 0x3bf   :  { %v2362_v7 = vpack.c.bf16 %v2354_v54, %v2354_v54 }
 0x3c0   :  { %v2026_v42 = vpop.f32.mrf.mxu0 }
 0x3c1   :  { %v2410_v59 = vrot.slane %v2362_v7, %v3120_v36 }
 0x3c2   :  { %v2812_v45 = vpop.f32.mrf.mxu0 }
 0x3c3   :  { %v2417_v51 = vrot.slane %v2410_v59, %v3120_v36 }
 0x3c4   :  { %v2886_v9 = vpop.eup %2885 }
 0x3c8   :  { %v2888_v5 = vpop.eup %2887 }
 0x3e3   :  { %v3516_v53 = vpop.xlane.xlu1 %1824 }
 0x3e6   :  { %v1960_v52 = vpop.f32.mrf.mxu1 }
 0x3e7   :  { %v2353_v48 = vmul.f32 %v2884_v55, %v1960_v52  ;;  %v3518_v58 = vpop.xlane.xlu1 %1830 }
 0x3e8   :  { %v2805_v57 = vpop.f32.mrf.mxu1 }
 0x3e9   :  { %v2361_v62 = vpack.c.bf16 %v2353_v48, %v2353_v48 }
 0x3ea   :  { %v1963_v63 = vpop.f32.mrf.mxu1 }
 0x3eb   :  { %v2396_v49 = vrot.slane %v2361_v62, %v3120_v36  ;;  %v690_v19 = vpop.xlane.xlu1 %689 }
 0x3ec   :  { %2889 = vrcp.f32 %v690_v19  ;;  %v2806_v4 = vpop.f32.mrf.mxu1 }
 0x3ed   :  { %v2403_v60 = vrot.slane %v2396_v49, %v3120_v36 }
 0x3ee   :  { %v2086_v37 = vpop.f32.mrf.mxu1 }
 0x3ef   :  { %v2355_v3 = vmul.f32 %v2886_v9, %v2086_v37  ;;  %2490 = vrot.lane.b32.xlu1 %v2403_v60, %s2914_s23  ;;  %v696_v10 = vpop.xlane.xlu1 %695  ;;  %v3524_v33 = vpop.xlane.xlu0 %1827 }
 0x3f0   :  { %2891 = vrcp.f32 %v696_v10  ;;  %v2817_v8 = vpop.f32.mrf.mxu1 }
 0x3f1   :  { %v2363_v12 = vpack.c.bf16 %v2355_v3, %v2355_v3 }
 0x3f2   :  { %v2089_v16 = vpop.f32.mrf.mxu1  ;;  %v2149_v56 = vpop.f32.mrf.mxu0 }
 0x3f3   :  { %v2424_v61 = vrot.slane %v2363_v12, %v3120_v36  ;;  %v2356_v17 = vmul.f32 %v2888_v5, %v2149_v56  ;;  %v702_v15 = vpop.xlane.xlu1 %701  ;;  %v687_v29 = vpop.xlane.xlu0 %686  ;;  %2492 = vrot.lane.b32.xlu1 %v2417_v51, %s2914_s23 }
 0x3f4   :  { %2893 = vrcp.f32 %v702_v15  ;;  %v2818_v1 = vpop.f32.mrf.mxu1  ;;  %v2823_v21 = vpop.f32.mrf.mxu0 }
 0x3f5   :  { %v2364_v31 = vpack.c.bf16 %v2356_v17, %v2356_v17  ;;  %2895 = vrcp.f32 %v687_v29  ;;  %v2431_v43 = vrot.slane %v2424_v61, %v3120_v36 }
 0x3f6   :  { %v2152_v40 = vpop.f32.mrf.mxu0 }
 0x3f7   :  { %v2438_v32 = vrot.slane %v2364_v31, %v3120_v36  ;;  %v708_v47 = vpop.xlane.xlu1 %707  ;;  %v693_v2 = vpop.xlane.xlu0 %692  ;;  %2494 = vrot.lane.b32.xlu1 %v2431_v43, %s2914_s23 }
 0x3f8   :  { %2897 = vrcp.f32 %v708_v47  ;;  %v2824_v28 = vpop.f32.mrf.mxu0 }
 0x3f9   :  { %v2890_v22 = vpop.eup %2889  ;;  %2899 = vrcp.f32 %v693_v2  ;;  %v2445_v25 = vrot.slane %v2438_v32, %v3120_v36 }
 0x3fa   :  { %v1096_v46 = vmul.f32 %v2890_v22, %v3385_v6 }
 0x3fb   :  { %v699_v35 = vpop.xlane.xlu0 %698  ;;  %2496 = vrot.lane.b32.xlu0 %v2445_v25, %s2914_s23 }
 0x3fc   :  { %2901 = vrcp.f32 %v699_v35  ;;  %v1104_v11 = vpack.c.bf16 %v1096_v46, %v1096_v46 }
 0x3fd   :  { %v2892_v44 = vpop.eup %2891 }
 0x3fe   :  { %1113 = vst.msk [vmem:[%s3621_s3 + $0x1] sm:$0x1] %vm1111_vm5, %v1104_v11  ;;  %v1098_v30 = vmul.f32 %v2892_v44, %v3389_v39 }
 0x3ff   :  { %v705_v34 = vpop.xlane.xlu0 %704 }
 0x400   :  { %2903 = vrcp.f32 %v705_v34  ;;  %v1106_v18 = vpack.c.bf16 %v1098_v30, %v1098_v30 }
 0x401   :  { %v2894_v42 = vpop.eup %2893  ;;  %2905 = vrcp.f32 %v3516_v53 }
 0x402   :  { %v2896_v45 = vpop.eup %2895  ;;  %1115 = vst.msk [vmem:[%s3621_s3 + $0x3] sm:$0x1] %vm1111_vm5, %v1106_v18  ;;  %v1100_v6 = vmul.f32 %v2894_v42, %v3393_v26  ;;  %2907 = vrcp.f32 %v3518_v58 }
 0x403   :  { %v1095_v41 = vmul.f32 %v2896_v45, %v3383_v0  ;;  %2909 = vrcp.f32 %v3524_v33 }
 0x404   :  { %v1108_v13 = vpack.c.bf16 %v1100_v6, %v1100_v6 }
 0x405   :  { %v2898_v20 = vpop.eup %2897  ;;  %v1103_v50 = vpack.c.bf16 %v1095_v41, %v1095_v41 }
 0x406   :  { %v2900_v14 = vpop.eup %2899  ;;  %1117 = vst.msk [vmem:[%s3621_s3 + $0x5] sm:$0x1] %vm1111_vm5, %v1108_v13  ;;  %v1102_v39 = vmul.f32 %v2898_v20, %v3413_v24 }
 0x407   :  { %1112 = vst.msk [vmem:[%s3621_s3] sm:$0x1] %vm1111_vm5, %v1103_v50  ;;  %v1097_v26 = vmul.f32 %v2900_v14, %v3387_v23 }
 0x408   :  { %v1110_v54 = vpack.c.bf16 %v1102_v39, %v1102_v39 }
 0x409   :  { %v2902_v0 = vpop.eup %2901  ;;  %v1105_v55 = vpack.c.bf16 %v1097_v26, %v1097_v26 }
 0x40a   :  { %v1099_v52 = vmul.f32 %v2902_v0, %v3391_v27  ;;  %1119 = vst.msk [vmem:[%s3621_s3 + $0x7] sm:$0x1] %vm1111_vm5, %v1110_v54 }
 0x40b   :  { %1114 = vst.msk [vmem:[%s3621_s3 + $0x2] sm:$0x1] %vm1111_vm5, %v1105_v55 }
 0x40c   :  { %v1107_v24 = vpack.c.bf16 %v1099_v52, %v1099_v52 }
 0x40d   :  { %v2904_v48 = vpop.eup %2903 }
 0x40e   :  { %1116 = vst.msk [vmem:[%s3621_s3 + $0x4] sm:$0x1] %vm1111_vm5, %v1107_v24  ;;  %v1101_v23 = vmul.f32 %v2904_v48, %v3396_v38  ;;  %v2906_v57 = vpop.eup %2905 }
 0x40f   :  { %v2908_v59 = vpop.eup %2907 }
 0x410   :  { %v1109_v27 = vpack.c.bf16 %v1101_v23, %v1101_v23  ;;  %v2910_v3 = vpop.eup %2909 }
 0x412   :  { %1118 = vst.msk [vmem:[%s3621_s3 + $0x6] sm:$0x1] %vm1111_vm5, %v1109_v27 }
 0x41b   :  { %v2212_v7 = vpop.f32.mrf.mxu1 }
 0x41c   :  { %v2357_v53 = vmul.f32 %v2906_v57, %v2212_v7 }
 0x41d   :  { %v2829_v62 = vpop.f32.mrf.mxu1 }
 0x41e   :  { %v2365_v63 = vpack.c.bf16 %v2357_v53, %v2357_v53 }
 0x41f   :  { %v2215_v49 = vpop.f32.mrf.mxu1 }
 0x420   :  { %v2452_v19 = vrot.slane %v2365_v63, %v3120_v36 }
 0x421   :  { %v2830_v4 = vpop.f32.mrf.mxu1 }
 0x422   :  { %v2459_v38 = vrot.slane %v2452_v19, %v3120_v36 }
 0x423   :  { %v2338_v60 = vpop.f32.mrf.mxu1 }
 0x424   :  { %v2359_v9 = vmul.f32 %v2908_v59, %v2338_v60  ;;  %2498 = vrot.lane.b32.xlu1 %v2459_v38, %s2914_s23 }
 0x425   :  { %v2841_v37 = vpop.f32.mrf.mxu1 }
 0x426   :  { %v2367_v58 = vpack.c.bf16 %v2359_v9, %v2359_v9 }
 0x427   :  { %v2275_v10 = vpop.f32.mrf.mxu0  ;;  %v2341_v33 = vpop.f32.mrf.mxu1 }
 0x428   :  { %v2480_v8 = vrot.slane %v2367_v58, %v3120_v36  ;;  %v2358_v12 = vmul.f32 %v2910_v3, %v2275_v10 }
 0x429   :  { %v2835_v51 = vpop.f32.mrf.mxu0  ;;  %v2842_v5 = vpop.f32.mrf.mxu1 }
 0x42a   :  { %v2366_v16 = vpack.c.bf16 %v2358_v12, %v2358_v12  ;;  %v2487_v56 = vrot.slane %v2480_v8, %v3120_v36 }
 0x42b   :  { %v2278_v61 = vpop.f32.mrf.mxu0 }
 0x42c   :  { %v2466_v17 = vrot.slane %v2366_v16, %v3120_v36  ;;  %2502 = vrot.lane.b32.xlu1 %v2487_v56, %s2914_s23 }
 0x42d   :  { %v2836_v15 = vpop.f32.mrf.mxu0 }
 0x42e   :  { %v2473_v29 = vrot.slane %v2466_v17, %v3120_v36 }
 0x42f   :  { %v2489_v1 = vpop.permute.xlu0 %2488 }
 0x430   :  { %2513 = vst.msk [vmem:[%s3621_s3] sm:$0x1] %vm2512_vm6, %v2489_v1  ;;  %2500 = vrot.lane.b32.xlu0 %v2473_v29, %s2914_s23 }
 0x461   :  { %v2491_v21 = vpop.permute.xlu1 %2490 }
 0x462   :  { %2514 = vst.msk [vmem:[%s3621_s3 + $0x1] sm:$0x1] %vm2512_vm6, %v2491_v21 }
 0x465   :  { %v2493_v31 = vpop.permute.xlu1 %2492 }
 0x466   :  { %2515 = vst.msk [vmem:[%s3621_s3 + $0x2] sm:$0x1] %vm2512_vm6, %v2493_v31 }
 0x469   :  { %v2495_v36 = vpop.permute.xlu1 %2494 }
 0x46a   :  { %2516 = vst.msk [vmem:[%s3621_s3 + $0x3] sm:$0x1] %vm2512_vm6, %v2495_v36 }
 0x46d   :  { %v2497_v43 = vpop.permute.xlu0 %2496 }
 0x46e   :  { %2517 = vst.msk [vmem:[%s3621_s3 + $0x4] sm:$0x1] %vm2512_vm6, %v2497_v43 }
 0x496   :  { %v2499_v40 = vpop.permute.xlu1 %2498 }
 0x497   :  { %2518 = vst.msk [vmem:[%s3621_s3 + $0x5] sm:$0x1] %vm2512_vm6, %v2499_v40 }
 0x49e   :  { %v2503_v32 = vpop.permute.xlu1 %2502 }
 0x49f   :  { %2520 = vst.msk [vmem:[%s3621_s3 + $0x7] sm:$0x1] %vm2512_vm6, %v2503_v32 }
 0x4a2   :  { %v2501_v47 = vpop.permute.xlu0 %2500 }
 0x4a3   :  { %2519 = vst.msk [vmem:[%s3621_s3 + $0x6] sm:$0x1] %vm2512_vm6, %v2501_v47 }

// kernel: timesformer_forward.35
= control target key start
LH: loop header
LB: loop body
LE: loop exit
PB: predicated region body
PF: predicated region fallthrough
CT: control target
= control target key end

     0   :  { %s288_s1 = inlined_call_operand.vmem [shape: bf16[128,128], index: 1, kind: input, shape index: {}]   ;;  %s289_s0 = inlined_call_operand.vmem [shape: bf16[24,128], index: 0, kind: input, shape index: {}]   ;;  %s290_s2 = inlined_call_operand.vmem [shape: f32[1,128], index: 2, kind: input, shape index: {}]   ;;  %s291_s3 = inlined_call_operand.vmem [shape: bf16[24,128], index: 3, kind: output, shape index: {}]  }
   0x1   :  { %v219_v0 = vld [vmem:[%s288_s1 + $0x38] sm:$0xff]   ;;  %v220_v1 = vld [vmem:[%s288_s1 + $0x30] sm:$0xff]   ;;  %v221_v2 = vld [vmem:[%s288_s1 + $0x28] sm:$0xff]  }
   0x2   :  { %199 = vmatprep.subr.bf16.mxu0 %v219_v0  ;;  %v222_v3 = vld [vmem:[%s288_s1 + $0x20] sm:$0xff]   ;;  %v223_v5 = vld [vmem:[%s288_s1 + $0x18] sm:$0xff]   ;;  %v224_v6 = vld [vmem:[%s288_s1 + $0x10] sm:$0xff]  }
   0x3   :  { %200 = vmatpush3.bf16.msra.mxu0 %v219_v0  ;;  %v227_v4 = vld [vmem:[%s289_s0] sm:$0xff]   ;;  %v225_v7 = vld [vmem:[%s288_s1 + $0x8] sm:$0xff]  }
   0x4   :  { %201 = vmatprep.subr.bf16.mxu0 %v220_v1  ;;  %215 = vmatprep.mubr.bf16.mxu0 %v227_v4  ;;  %v226_v8 = vld [vmem:[%s288_s1] sm:$0xff]   ;;  %v228_v9 = vld [vmem:[%s289_s0 + $0x8] ss:$0 sps:$4 sm:$0xff]  }
   0x5   :  { %v167_v10 = vld [vmem:[%s290_s2] ss:$0 sm:$0xff] }
   0x7   :  { %202 = vmatpush3.bf16.msra.mxu0 %v220_v1 }
   0x8   :  { %203 = vmatprep.subr.bf16.mxu0 %v221_v2 }
   0xb   :  { %204 = vmatpush3.bf16.msra.mxu0 %v221_v2 }
   0xc   :  { %205 = vmatprep.subr.bf16.mxu0 %v222_v3 }
   0xf   :  { %206 = vmatpush3.bf16.msra.mxu0 %v222_v3 }
  0x10   :  { %207 = vmatprep.subr.bf16.mxu0 %v223_v5 }
  0x13   :  { %208 = vmatpush3.bf16.msra.mxu0 %v223_v5 }
  0x14   :  { %209 = vmatprep.subr.bf16.mxu0 %v224_v6 }
  0x17   :  { %210 = vmatpush3.bf16.msra.mxu0 %v224_v6 }
  0x18   :  { %211 = vmatprep.subr.bf16.mxu0 %v225_v7 }
  0x1b   :  { %212 = vmatpush3.bf16.msra.mxu0 %v225_v7 }
  0x1c   :  { %213 = vmatprep.subr.bf16.mxu0 %v226_v8 }
  0x1f   :  { %214 = vmatpush3.bf16.msra.mxu0 %v226_v8 }
  0x22   :  { %216 = vmatmul.mubr.bf16.vlgmr.msra.gmra.mxu0 %v228_v9 }
  0xe2   :  { %v217_v11 = vpop.f32.mrf.mxu0 }
  0xe3   :  { %v142_v12 = vadd.f32 %v217_v11, %v167_v10 }
  0xe4   :  { %v133_v13 = vpop.f32.mrf.mxu0 }
  0xe5   :  { %v183_v14 = vpack.c.bf16 %v142_v12, %v142_v12  ;;  %v134_v17 = vadd.f32 %v167_v10, %v133_v13 }
  0xe6   :  { %v218_v15 = vpop.f32.mrf.mxu0 }
  0xe7   :  { %162 = vst [vmem:[%s291_s3 + $0x8] sm:$0xf] %v183_v14 }
  0xe8   :  { %v136_v16 = vpop.f32.mrf.mxu0 }
  0xe9   :  { %v137_v18 = vadd.f32 %v167_v10, %v136_v16 }
  0xeb   :  { %v187_v19 = vpack.c.bf16 %v137_v18, %v134_v17 }
  0xed   :  { %188 = vst [vmem:[%s291_s3] sm:$0xff] %v187_v19  }

// kernel: timesformer_forward.34
= control target key start
LH: loop header
LB: loop body
LE: loop exit
PB: predicated region body
PF: predicated region fallthrough
CT: control target
= control target key end

     0   :  { %v1396_v2 = vmov 0.0   ;;  %vm1397_vm0 = vmmov 0   ;;  %vm205_vm1 = vcmask 523264   ;;  %vm390_vm2 = vcmask 36864   ;;  %s1720_s0 = inlined_call_operand.vmem [shape: bf16[4,5,384], index: 0, kind: input, shape index: {}, may-alias: {0,1,2}]   ;;  %s1721_s1 = inlined_call_operand.vmem [shape: bf16[4,5,384], index: 1, kind: input, shape index: {}, may-alias: {0,1,2}]   ;;  %s1722_s2 = inlined_call_operand.vmem [shape: bf16[4,5,384], index: 2, kind: input, shape index: {}, may-alias: {0,1,2}]   ;;  %s1723_s3 = inlined_call_operand.vmem [shape: bf16[4,5,128], index: 3, kind: output, shape index: {}]  }
   0x1   :  { %v1183_v0 = vld [vmem:[%s1721_s1 + $0x4] sm:$0xf]  ;;  %v1184_v1 = vld [vmem:[%s1721_s1 + $0x10] sm:$0xf]  ;;  %1259 = vmatprep.subr.bf16.mxu0 %v1396_v2  ;;  %1265 = vmatprep.subr.bf16.mxu1 %v1396_v2  ;;  %v26_v3 = vld [vmem:[%s1720_s0] sm:$0xf] }
   0x2   :  { %85 = vst [vmem:[#allocation3] sm:$0xf] %v1183_v0  ;;  %87 = vst [vmem:[#allocation3 + $0x4] sm:$0xf] %v1184_v1  ;;  %v28_v4 = vld [vmem:[%s1720_s0 + $0xc] sm:$0xf]  ;;  %1261 = vmatprep.mubr.msk.bf16.mxu0 %vm1397_vm0, %v1396_v2  ;;  %1267 = vmatprep.mubr.msk.bf16.mxu1 %vm1397_vm0, %v1396_v2 }
   0x3   :  { %27 = vst [vmem:[#allocation2] sm:$0xf] %v26_v3  ;;  %29 = vst [vmem:[#allocation2 + $0x4] sm:$0xf] %v28_v4  ;;  %v1185_v5 = vld [vmem:[%s1721_s1 + $0x1c] sm:$0xf] }
   0x4   :  { %v1186_v6 = vld [vmem:[%s1721_s1 + $0x28] sm:$0xf]  ;;  %v30_v7 = vld [vmem:[%s1720_s0 + $0x18] sm:$0xf]  ;;  %89 = vst [vmem:[#allocation3 + $0x8] sm:$0xf] %v1185_v5 }
   0x5   :  { %91 = vst [vmem:[#allocation3 + $0xc] sm:$0xf] %v1186_v6  ;;  %31 = vst [vmem:[#allocation2 + $0x8] sm:$0xf] %v30_v7  ;;  %v32_v8 = vld [vmem:[%s1720_s0 + $0x24] sm:$0xf] }
   0x6   :  { %33 = vst [vmem:[#allocation2 + $0xc] sm:$0xf] %v32_v8  ;;  %s1398_s0 = smov 64   ;;  %v1187_v47 = vld [vmem:[%s1722_s2 + $0x8] sm:$0xf]  ;;  %vm435_vm3 = vcmask 1041408  }
   0x7   :  { %143 = vst [vmem:[#allocation4] sm:$0xf] %v1187_v47  ;;  %v1188_v48 = vld [vmem:[%s1722_s2 + $0x14] sm:$0xf]  ;;  %vm436_vm4 = vcmask 1042432   ;;  %v1399_v50 = vmov 65535  }
   0x8   :  { %145 = vst [vmem:[#allocation4 + $0x4] sm:$0xf] %v1188_v48  ;;  %v437_v51 = vsel %vm435_vm3, 4294967295, %v1399_v50  ;;  %v1189_v54 = vld [vmem:[%s1722_s2 + $0x20] sm:$0xf]  ;;  %vm431_vm5 = vcmask 39936  }
   0x9   :  { %v1450_v9 = vld [vmem:[#allocation3] sm:$0x7]  ;;  %v194_v10 = vld [vmem:[#allocation3 + $0x4] sm:$0x7]  ;;  %v1501_v53 = vsel %vm436_vm4, %v437_v51, 0  ;;  %vm632_vm6 = vcmask 518144  }
   0xa   :  { %v210_v11 = vsel %vm205_vm1, %v1450_v9, 0  ;;  %v256_v12 = vsel %vm205_vm1, %v194_v10, 0  ;;  %v189_v13 = vld [vmem:[#allocation2] sm:$0x7]  ;;  %v1203_v14 = vcombine.low %v194_v10, %v194_v10  ;;  %v190_v16 = vld [vmem:[#allocation2 + $0x4] sm:$0x7]  ;;  %v1200_v49 = vcombine.low %v1450_v9, %v1450_v9 }
   0xb   :  { %1260 = vmatpush3.bf16.xpose.msra.mxu0 %v210_v11  ;;  %1266 = vmatpush3.bf16.xpose.msra.mxu1 %v256_v12  ;;  %v201_v15 = vmul.bf16 1040203264, %v189_v13  ;;  %v1457_v17 = vld [vmem:[#allocation3 + $0x8] sm:$0x7]  ;;  %v1462_v20 = vmul.bf16 1040203264, %v190_v16 }
   0xc   :  { %1271 = vmatprep.subr.bf16.mxu0 %v1396_v2  ;;  %1277 = vmatprep.subr.bf16.mxu1 %v1396_v2  ;;  %v1459_v18 = vld [vmem:[#allocation3 + $0xc] sm:$0x7]  ;;  %v302_v21 = vsel %vm205_vm1, %v1457_v17, 0  ;;  %v191_v23 = vld [vmem:[#allocation2 + $0x8] sm:$0x7]  ;;  %v1206_v57 = vcombine.low %v1457_v17, %v1457_v17  ;;  %vm1151_vm9 = vcmask 1042944  }
   0xd   :  { %711 = vrot.lane.b32.xlu1 %v1203_v14, %s1398_s0  ;;  %v1199_v19 = vcombine.low %v201_v15, %v201_v15  ;;  %v348_v22 = vsel %vm205_vm1, %v1459_v18, 0  ;;  %v192_v24 = vld [vmem:[#allocation2 + $0xc] sm:$0x7]  ;;  %v203_v25 = vmul.bf16 1040203264, %v191_v23  ;;  %v1202_v55 = vcombine.low %v1462_v20, %v1462_v20 }
   0xe   :  { %v204_v26 = vmul.bf16 1040203264, %v192_v24  ;;  %v1499_v52 = vld [vmem:[#allocation4] sm:$0x7]  ;;  %147 = vst [vmem:[#allocation4 + $0x8] sm:$0xf] %v1189_v54  ;;  %v1209_v60 = vcombine.low %v1459_v18, %v1459_v18 }
   0xf   :  { %v440_v56 = vand.u32 %v1501_v53, %v1499_v52  ;;  %v1190_v58 = vld [vmem:[%s1722_s2 + $0x2c] sm:$0xf]  ;;  %v1516_v59 = vld [vmem:[#allocation4 + $0x4] sm:$0x7]  ;;  %v1205_v62 = vcombine.low %v203_v25, %v203_v25  ;;  %vm633_vm7 = vsmask.f32 2304 }
  0x10   :  { %149 = vst [vmem:[#allocation4 + $0xc] sm:$0xf] %v1190_v58  ;;  %v486_v61 = vand.u32 %v1501_v53, %v1516_v59  ;;  %v1208_v63 = vcombine.low %v204_v26, %v204_v26  ;;  %vm1640_vm8 = vmand %vm632_vm6, %vm633_vm7 }
  0x11   :  { %650 = vrot.lane.b32.xlu1 %v1199_v19, %s1398_s0  ;;  %vm1684_vm10 = vmand %vm1151_vm9, %vm633_vm7 }
  0x12   :  { %1262 = vmatmul.mubr.msk.bf16.vlgmr.msra.gmra.mxu0 %vm205_vm1, %v201_v15  ;;  %1268 = vmatmul.mubr.msk.bf16.vlgmr.msra.gmra.mxu1 %vm205_vm1, %v1462_v20 }
  0x13   :  { %1272 = vmatpush3.bf16.xpose.msra.mxu0 %v302_v21  ;;  %1278 = vmatpush3.bf16.xpose.msra.mxu1 %v348_v22 }
  0x14   :  { %1273 = vmatprep.mubr.msk.bf16.mxu0 %vm1397_vm0, %v1396_v2  ;;  %1279 = vmatprep.mubr.msk.bf16.mxu1 %vm1397_vm0, %v1396_v2 }
  0x15   :  { %1283 = vmatprep.subr.bf16.mxu0 %v1396_v2  ;;  %1289 = vmatprep.subr.bf16.mxu1 %v1396_v2  ;;  %v1530_v15 = vld [vmem:[#allocation4 + $0x8] sm:$0x7] }
  0x16   :  { %v532_v17 = vand.u32 %v1501_v53, %v1530_v15 }
  0x17   :  { %v1538_v19 = vld [vmem:[#allocation4 + $0xc] sm:$0x7] }
  0x18   :  { %v578_v21 = vand.u32 %v1501_v53, %v1538_v19 }
  0x1a   :  { %1274 = vmatmul.mubr.msk.bf16.vlgmr.msra.gmra.mxu0 %vm205_vm1, %v203_v25  ;;  %1280 = vmatmul.mubr.msk.bf16.vlgmr.msra.gmra.mxu1 %vm205_vm1, %v204_v26 }
  0x1b   :  { %1285 = vmatprep.mubr.msk.bf16.mxu0 %vm1397_vm0, %v1396_v2  ;;  %1291 = vmatprep.mubr.msk.bf16.mxu1 %vm1397_vm0, %v1396_v2 }
  0x1c   :  { %1284 = vmatpush3.bf16.msra.mxu0 %v440_v56  ;;  %1290 = vmatpush3.bf16.msra.mxu1 %v486_v61 }
  0x1d   :  { %1295 = vmatprep.subr.bf16.mxu0 %v1396_v2  ;;  %1301 = vmatprep.subr.bf16.mxu1 %v1396_v2 }
  0x7f   :  { %v712_v0 = vpop.permute.xlu1 %711 }
  0x83   :  { %v651_v5 = vpop.permute.xlu1 %650 }
  0xd2   :  { %v246_v27 = vpop.f32.mrf.mxu0  ;;  %v1484_v28 = vpop.f32.mrf.mxu1 }
  0xd3   :  { %v391_v29 = vsel %vm390_vm2, %v246_v27, -inf  ;;  %v394_v32 = vsel %vm390_vm2, %v1484_v28, -inf }
  0xd4   :  { %v1269_v30 = vpop.f32.mrf.mxu1  ;;  %392 = vmax.xlane.f32.xlu0 %v391_v29  ;;  %v1263_v31 = vpop.f32.mrf.mxu0 }
  0xd5   :  { %v717_v31 = vsel %vm205_vm1, %v712_v0, 0 }
  0xd6   :  { %v249_v33 = vpop.f32.mrf.mxu0  ;;  %v295_v34 = vpop.f32.mrf.mxu1 }
  0xd8   :  { %v1270_v35 = vpop.f32.mrf.mxu1  ;;  %395 = vmax.xlane.f32.xlu0 %v394_v32  ;;  %v1264_v36 = vpop.f32.mrf.mxu0 }
  0xda   :  { %v338_v37 = vpop.f32.mrf.mxu0  ;;  %v384_v38 = vpop.f32.mrf.mxu1 }
  0xdb   :  { %v397_v39 = vsel %vm390_vm2, %v338_v37, -inf  ;;  %v400_v42 = vsel %vm390_vm2, %v384_v38, -inf }
  0xdc   :  { %v1281_v40 = vpop.f32.mrf.mxu1  ;;  %398 = vmax.xlane.f32.xlu1 %v397_v39  ;;  %v1275_v41 = vpop.f32.mrf.mxu0 }
  0xde   :  { %v341_v43 = vpop.f32.mrf.mxu0  ;;  %v387_v44 = vpop.f32.mrf.mxu1 }
  0xe0   :  { %v1282_v45 = vpop.f32.mrf.mxu1  ;;  %401 = vmax.xlane.f32.xlu1 %v400_v42  ;;  %v1276_v46 = vpop.f32.mrf.mxu0 }
  0xee   :  { %655 = vrot.lane.b32.xlu0 %v1200_v49, %s1398_s0 }
  0xf1   :  { %706 = vrot.lane.b32.xlu1 %v1202_v55, %s1398_s0 }
  0xf2   :  { %767 = vrot.lane.b32.xlu0 %v1206_v57, %s1398_s0 }
  0xf5   :  { %823 = vrot.lane.b32.xlu1 %v1209_v60, %s1398_s0 }
  0xf6   :  { %762 = vrot.lane.b32.xlu0 %v1205_v62, %s1398_s0 }
  0xf9   :  { %818 = vrot.lane.b32.xlu1 %v1208_v63, %s1398_s0 }
 0x15d   :  { %v393_v1 = vpop.xlane.xlu0 %392 }
 0x15e   :  { %v403_v3 = vsub.f32 %v246_v27, %v393_v1 }
 0x160   :  { %v407_v4 = vmul.f32 1.442695, %v403_v3 }
 0x161   :  { %v396_v6 = vpop.xlane.xlu0 %395 }
 0x162   :  { %1364 = vpow2.f32 %v407_v4  ;;  %v404_v7 = vsub.f32 %v1484_v28, %v396_v6 }
 0x164   :  { %v409_v8 = vmul.f32 1.442695, %v404_v7 }
 0x165   :  { %v399_v9 = vpop.xlane.xlu1 %398  ;;  %v656_v23 = vpop.permute.xlu0 %655 }
 0x166   :  { %1366 = vpow2.f32 %v409_v8  ;;  %v405_v10 = vsub.f32 %v338_v37, %v399_v9  ;;  %v661_v25 = vsel %vm205_vm1, %v656_v23, 0 }
 0x168   :  { %v411_v11 = vmul.f32 1.442695, %v405_v10 }
 0x169   :  { %v402_v12 = vpop.xlane.xlu1 %401  ;;  %v768_v30 = vpop.permute.xlu0 %767 }
 0x16a   :  { %1368 = vpow2.f32 %v411_v11  ;;  %v406_v13 = vsub.f32 %v384_v38, %v402_v12  ;;  %v773_v32 = vsel %vm205_vm1, %v768_v30, 0 }
 0x16c   :  { %v413_v14 = vmul.f32 1.442695, %v406_v13  ;;  %v1213_v13 = vcombine.low %v1516_v59, %v1516_v59 }
 0x16d   :  { %v707_v28 = vpop.permute.xlu1 %706  ;;  %v763_v35 = vpop.permute.xlu0 %762 }
 0x16e   :  { %1370 = vpow2.f32 %v413_v14  ;;  %v1215_v14 = vcombine.low %v1530_v15, %v1530_v15 }
 0x16f   :  { %v1532_v16 = vpop.eup %1364 }
 0x170   :  { %v427_v18 = vpack.c.bf16 %v1532_v16, %v1532_v16 }
 0x171   :  { %v824_v33 = vpop.permute.xlu1 %823 }
 0x172   :  { %1286 = vmatmul.mubr.msk.bf16.vlgmr.msra.gmra.mxu0 %vm431_vm5, %v427_v18  ;;  %v829_v34 = vsel %vm205_vm1, %v824_v33, 0  ;;  %v1211_v18 = vcombine.low %v1499_v52, %v1499_v52 }
 0x173   :  { %v1541_v20 = vpop.eup %1366  ;;  %1296 = vmatpush3.bf16.msra.mxu0 %v532_v17  ;;  %1297 = vmatprep.mubr.msk.bf16.mxu0 %vm1397_vm0, %v1396_v2  ;;  %v1217_v17 = vcombine.low %v1538_v19, %v1538_v19 }
 0x174   :  { %v428_v22 = vpack.c.bf16 %v1541_v20, %v1541_v20  ;;  %1307 = vmatprep.subr.bf16.mxu0 %v1396_v2 }
 0x175   :  { %v819_v36 = vpop.permute.xlu1 %818 }
 0x176   :  { %1292 = vmatmul.mubr.msk.bf16.vlgmr.msra.gmra.mxu1 %vm431_vm5, %v428_v22 }
 0x177   :  { %v1551_v24 = vpop.eup %1368  ;;  %1302 = vmatpush3.bf16.msra.mxu1 %v578_v21  ;;  %1303 = vmatprep.mubr.msk.bf16.mxu1 %vm1397_vm0, %v1396_v2 }
 0x178   :  { %v429_v26 = vpack.c.bf16 %v1551_v24, %v1551_v24  ;;  %1313 = vmatprep.subr.bf16.mxu1 %v1396_v2 }
 0x17a   :  { %1298 = vmatmul.mubr.msk.bf16.vlgmr.msra.gmra.mxu0 %vm431_vm5, %v429_v26 }
 0x17b   :  { %v1560_v27 = vpop.eup %1370  ;;  %1308 = vmatpush3.bf16.xpose.msra.mxu0 %v661_v25  ;;  %1309 = vmatprep.mubr.msk.bf16.mxu0 %vm1397_vm0, %v1396_v2 }
 0x17c   :  { %v430_v29 = vpack.c.bf16 %v1560_v27, %v1560_v27  ;;  %1319 = vmatprep.subr.bf16.mxu0 %v1396_v2 }
 0x17e   :  { %1304 = vmatmul.mubr.msk.bf16.vlgmr.msra.gmra.mxu1 %vm431_vm5, %v430_v29 }
 0x17f   :  { %1314 = vmatpush3.bf16.xpose.msra.mxu1 %v717_v31  ;;  %1315 = vmatprep.mubr.msk.bf16.mxu1 %vm1397_vm0, %v1396_v2 }
 0x180   :  { %1325 = vmatprep.subr.bf16.mxu1 %v1396_v2 }
 0x182   :  { %1310 = vmatmul.mubr.msk.bf16.vlgmr.msra.gmra.mxu0 %vm205_vm1, %v651_v5 }
 0x183   :  { %1320 = vmatpush3.bf16.xpose.msra.mxu0 %v773_v32  ;;  %1321 = vmatprep.mubr.msk.bf16.mxu0 %vm1397_vm0, %v1396_v2 }
 0x184   :  { %1331 = vmatprep.subr.bf16.mxu0 %v1396_v2 }
 0x186   :  { %1316 = vmatmul.mubr.msk.bf16.vlgmr.msra.gmra.mxu1 %vm205_vm1, %v707_v28 }
 0x187   :  { %1326 = vmatpush3.bf16.xpose.msra.mxu1 %v829_v34  ;;  %1327 = vmatprep.mubr.msk.bf16.mxu1 %vm1397_vm0, %v1396_v2 }
 0x188   :  { %1337 = vmatprep.subr.bf16.mxu1 %v1396_v2 }
 0x18a   :  { %1322 = vmatmul.mubr.msk.bf16.vlgmr.msra.gmra.mxu0 %vm205_vm1, %v763_v35 }
 0x18b   :  { %1333 = vmatprep.mubr.msk.bf16.mxu0 %vm1397_vm0, %v1396_v2 }
 0x18e   :  { %1328 = vmatmul.mubr.msk.bf16.vlgmr.msra.gmra.mxu1 %vm205_vm1, %v819_v36 }
 0x18f   :  { %1339 = vmatprep.mubr.msk.bf16.mxu1 %vm1397_vm0, %v1396_v2 }
 0x232   :  { %v1588_v37 = vpop.f32.mrf.mxu0 }
 0x234   :  { %v1287_v38 = vpop.f32.mrf.mxu0 }
 0x236   :  { %v479_v39 = vpop.f32.mrf.mxu0  ;;  %v1590_v40 = vpop.f32.mrf.mxu1 }
 0x238   :  { %v1288_v41 = vpop.f32.mrf.mxu0  ;;  %v1293_v42 = vpop.f32.mrf.mxu1 }
 0x23a   :  { %v525_v43 = vpop.f32.mrf.mxu1  ;;  %v1592_v44 = vpop.f32.mrf.mxu0 }
 0x23c   :  { %v1294_v45 = vpop.f32.mrf.mxu1  ;;  %v1299_v46 = vpop.f32.mrf.mxu0 }
 0x23e   :  { %v571_v47 = vpop.f32.mrf.mxu0  ;;  %v1594_v48 = vpop.f32.mrf.mxu1 }
 0x240   :  { %v1300_v49 = vpop.f32.mrf.mxu0  ;;  %v1305_v50 = vpop.f32.mrf.mxu1 }
 0x241   :  { %v418_v50 = vsel %vm390_vm2, %v1541_v20, 0.0  ;;  %v421_v20 = vsel %vm390_vm2, %v1551_v24, 0.0 }
 0x242   :  { %v617_v51 = vpop.f32.mrf.mxu1  ;;  %v697_v54 = vpop.f32.mrf.mxu0 }
 0x243   :  { %v871_v55 = vsel %vm390_vm2, %v697_v54, -inf }
 0x244   :  { %v1306_v56 = vpop.f32.mrf.mxu1  ;;  %872 = vmax.xlane.f32.xlu0 %v871_v55  ;;  %v1311_v57 = vpop.f32.mrf.mxu0  ;;  %v424_v55 = vsel %vm390_vm2, %v1560_v27, 0.0 }
 0x246   :  { %v700_v58 = vpop.f32.mrf.mxu0  ;;  %v753_v60 = vpop.f32.mrf.mxu1 }
 0x247   :  { %v874_v61 = vsel %vm390_vm2, %v753_v60, -inf }
 0x248   :  { %875 = vmax.xlane.f32.xlu1 %v874_v61  ;;  %v1312_v62 = vpop.f32.mrf.mxu0  ;;  %v1317_v63 = vpop.f32.mrf.mxu1 }
 0x24a   :  { %v756_v0 = vpop.f32.mrf.mxu1  ;;  %v809_v1 = vpop.f32.mrf.mxu0 }
 0x24b   :  { %v877_v3 = vsel %vm390_vm2, %v809_v1, -inf }
 0x24c   :  { %v1318_v4 = vpop.f32.mrf.mxu1  ;;  %878 = vmax.xlane.f32.xlu0 %v877_v3  ;;  %v1323_v5 = vpop.f32.mrf.mxu0 }
 0x24d   :  { %v638_v4 = vld [vmem:[%s1723_s3 + $0x4] sm:$0x7] }
 0x24e   :  { %v812_v6 = vpop.f32.mrf.mxu0  ;;  %v865_v7 = vpop.f32.mrf.mxu1 }
 0x24f   :  { %v880_v8 = vsel %vm390_vm2, %v865_v7, -inf }
 0x250   :  { %v1329_v9 = vpop.f32.mrf.mxu1  ;;  %881 = vmax.xlane.f32.xlu0 %v880_v8  ;;  %v1324_v10 = vpop.f32.mrf.mxu0 }
 0x252   :  { %v868_v11 = vpop.f32.mrf.mxu1 }
 0x254   :  { %v1330_v12 = vpop.f32.mrf.mxu1 }
 0x259   :  { %965 = vrot.lane.b32.xlu1 %v1213_v13, %s1398_s0 }
 0x25d   :  { %1016 = vrot.lane.b32.xlu1 %v1215_v14, %s1398_s0 }
 0x261   :  { %1067 = vrot.lane.b32.xlu1 %v1217_v17, %s1398_s0 }
 0x266   :  { %914 = vrot.lane.b32.xlu0 %v1211_v18, %s1398_s0 }
 0x2cd   :  { %v873_v21 = vpop.xlane.xlu0 %872 }
 0x2ce   :  { %v883_v22 = vsub.f32 %v697_v54, %v873_v21 }
 0x2d0   :  { %v887_v59 = vmul.f32 1.442695, %v883_v22 }
 0x2d1   :  { %v876_v23 = vpop.xlane.xlu1 %875 }
 0x2d2   :  { %1372 = vpow2.f32 %v887_v59  ;;  %v884_v25 = vsub.f32 %v753_v60, %v876_v23 }
 0x2d4   :  { %v889_v26 = vmul.f32 1.442695, %v884_v25 }
 0x2d5   :  { %v879_v15 = vpop.xlane.xlu0 %878  ;;  %v966_v28 = vpop.permute.xlu1 %965 }
 0x2d6   :  { %1374 = vpow2.f32 %v889_v26  ;;  %v885_v29 = vsub.f32 %v809_v1, %v879_v15  ;;  %v971_v19 = vand.u32 %v966_v28, %v1501_v53 }
 0x2d8   :  { %v891_v30 = vmul.f32 1.442695, %v885_v29  ;;  %1338 = vmatpush3.bf16.msra.mxu1 %v971_v19 }
 0x2d9   :  { %v882_v31 = vpop.xlane.xlu0 %881  ;;  %1349 = vmatprep.subr.bf16.mxu1 %v1396_v2  ;;  %v1017_v32 = vpop.permute.xlu1 %1016 }
 0x2da   :  { %1376 = vpow2.f32 %v891_v30  ;;  %v886_v52 = vsub.f32 %v865_v7, %v882_v31  ;;  %v1022_v41 = vand.u32 %v1017_v32, %v1501_v53 }
 0x2dc   :  { %v893_v33 = vmul.f32 1.442695, %v886_v52 }
 0x2dd   :  { %v915_v34 = vpop.permute.xlu0 %914  ;;  %v1068_v42 = vpop.permute.xlu1 %1067 }
 0x2de   :  { %1378 = vpow2.f32 %v893_v33  ;;  %v920_v35 = vand.u32 %v915_v34, %v1501_v53  ;;  %v1073_v45 = vand.u32 %v1068_v42, %v1501_v53 }
 0x2df   :  { %v1373_v36 = vpop.eup %1372 }
 0x2e0   :  { %1332 = vmatpush3.bf16.msra.mxu0 %v920_v35  ;;  %v895_v38 = vsel %vm390_vm2, %v1373_v36, 0.0  ;;  %v907_v39 = vpack.c.bf16 %v1373_v36, %v1373_v36 }
 0x2e1   :  { %896 = vadd.xlane.f32.xlu0 %v895_v38  ;;  %1343 = vmatprep.subr.bf16.mxu0 %v1396_v2 }
 0x2e3   :  { %v1375_v43 = vpop.eup %1374  ;;  %1334 = vmatmul.mubr.msk.bf16.vlgmr.msra.gmra.mxu0 %vm431_vm5, %v907_v39 }
 0x2e4   :  { %v898_v46 = vsel %vm390_vm2, %v1375_v43, 0.0  ;;  %v908_v47 = vpack.c.bf16 %v1375_v43, %v1375_v43  ;;  %1344 = vmatpush3.bf16.msra.mxu0 %v1022_v41  ;;  %1345 = vmatprep.mubr.msk.bf16.mxu0 %vm1397_vm0, %v1396_v2 }
 0x2e5   :  { %899 = vadd.xlane.f32.xlu1 %v898_v46 }
 0x2e6   :  { %1340 = vmatmul.mubr.msk.bf16.vlgmr.msra.gmra.mxu1 %vm431_vm5, %v908_v47 }
 0x2e7   :  { %v1377_v49 = vpop.eup %1376  ;;  %1350 = vmatpush3.bf16.msra.mxu1 %v1073_v45  ;;  %1351 = vmatprep.mubr.msk.bf16.mxu1 %vm1397_vm0, %v1396_v2  ;;  %v415_v2 = vsel %vm390_vm2, %v1532_v16, 0.0 }
 0x2e8   :  { %v901_v53 = vsel %vm390_vm2, %v1377_v49, 0.0  ;;  %v909_v51 = vpack.c.bf16 %v1377_v49, %v1377_v49 }
 0x2e9   :  { %419 = vadd.xlane.f32.xlu1 %v418_v50  ;;  %902 = vadd.xlane.f32.xlu0 %v901_v53 }
 0x2eb   :  { %v1379_v54 = vpop.eup %1378  ;;  %1346 = vmatmul.mubr.msk.bf16.vlgmr.msra.gmra.mxu0 %vm431_vm5, %v909_v51 }
 0x2ec   :  { %v904_v56 = vsel %vm390_vm2, %v1379_v54, 0.0  ;;  %v910_v57 = vpack.c.bf16 %v1379_v54, %v1379_v54 }
 0x2ed   :  { %425 = vadd.xlane.f32.xlu1 %v424_v55  ;;  %905 = vadd.xlane.f32.xlu0 %v904_v56 }
 0x2ee   :  { %1352 = vmatmul.mubr.msk.bf16.vlgmr.msra.gmra.mxu1 %vm431_vm5, %v910_v57 }
 0x2f1   :  { %416 = vadd.xlane.f32.xlu0 %v415_v2 }
 0x2f5   :  { %422 = vadd.xlane.f32.xlu0 %v421_v20 }
 0x36a   :  { %v897_v58 = vpop.xlane.xlu0 %896 }
 0x36e   :  { %v900_v60 = vpop.xlane.xlu1 %899 }
 0x372   :  { %v420_v61 = vpop.xlane.xlu1 %419  ;;  %v903_v62 = vpop.xlane.xlu0 %902 }
 0x373   :  { %1380 = vrcp.f32 %v420_v61 }
 0x376   :  { %v426_v27 = vpop.xlane.xlu1 %425  ;;  %v906_v63 = vpop.xlane.xlu0 %905 }
 0x377   :  { %1382 = vrcp.f32 %v426_v27 }
 0x37a   :  { %v417_v0 = vpop.xlane.xlu0 %416 }
 0x37b   :  { %1384 = vrcp.f32 %v417_v0 }
 0x37e   :  { %v423_v1 = vpop.xlane.xlu0 %422 }
 0x37f   :  { %1386 = vrcp.f32 %v423_v1 }
 0x380   :  { %v1381_v16 = vpop.eup %1380  ;;  %1388 = vrcp.f32 %v897_v58 }
 0x381   :  { %v625_v3 = vmul.f32 %v1381_v16, %v1590_v40  ;;  %v644_v40 = vld [vmem:[%s1723_s3 + $0xc] sm:$0x7]  ;;  %1390 = vrcp.f32 %v900_v60 }
 0x382   :  { %1392 = vrcp.f32 %v903_v62 }
 0x383   :  { %v629_v5 = vpack.c.bf16 %v625_v3, %v625_v3  ;;  %1394 = vrcp.f32 %v906_v63 }
 0x384   :  { %v1383_v6 = vpop.eup %1382 }
 0x385   :  { %v627_v7 = vmul.f32 %v1383_v6, %v1594_v48  ;;  %v639_v8 = vsel %vm1640_vm8, %v629_v5, %v638_v4  ;;  %v635_v48 = vld [vmem:[%s1723_s3] sm:$0x7] }
 0x386   :  { %640 = vst [vmem:[%s1723_s3 + $0x4] sm:$0x7] %v639_v8 }
 0x387   :  { %v631_v9 = vpack.c.bf16 %v627_v7, %v627_v7 }
 0x388   :  { %v1385_v10 = vpop.eup %1384 }
 0x389   :  { %v624_v11 = vmul.f32 %v1385_v10, %v1588_v37  ;;  %v645_v12 = vsel %vm1640_vm8, %v631_v9, %v644_v40  ;;  %v641_v37 = vld [vmem:[%s1723_s3 + $0x8] sm:$0x7] }
 0x38a   :  { %646 = vst [vmem:[%s1723_s3 + $0xc] sm:$0x7] %v645_v12 }
 0x38b   :  { %v628_v13 = vpack.c.bf16 %v624_v11, %v624_v11 }
 0x38c   :  { %v1387_v14 = vpop.eup %1386 }
 0x38d   :  { %v626_v17 = vmul.f32 %v1387_v14, %v1592_v44  ;;  %v636_v18 = vsel %vm1640_vm8, %v628_v13, %v635_v48  ;;  %v1389_v44 = vpop.eup %1388  ;;  %v1156_v57 = vld [vmem:[%s1723_s3 + $0x4] sm:$0x7] }
 0x38e   :  { %637 = vst [vmem:[%s1723_s3] sm:$0x7] %v636_v18  ;;  %v1391_v26 = vpop.eup %1390 }
 0x38f   :  { %v630_v21 = vpack.c.bf16 %v626_v17, %v626_v17  ;;  %v1393_v33 = vpop.eup %1392 }
 0x390   :  { %v1395_v39 = vpop.eup %1394 }
 0x391   :  { %v642_v22 = vsel %vm1640_vm8, %v630_v21, %v641_v37  ;;  %v1162_v62 = vld [vmem:[%s1723_s3 + $0xc] sm:$0x7] }
 0x392   :  { %643 = vst [vmem:[%s1723_s3 + $0x8] sm:$0x7] %v642_v22 }
 0x395   :  { %v1153_v54 = vld [vmem:[%s1723_s3] sm:$0x7] }
 0x399   :  { %v1159_v58 = vld [vmem:[%s1723_s3 + $0x8] sm:$0x7] }
 0x3a3   :  { %v956_v59 = vpop.f32.mrf.mxu0 }
 0x3a4   :  { %v1119_v23 = vmul.f32 %v1389_v44, %v956_v59 }
 0x3a5   :  { %v1335_v25 = vpop.f32.mrf.mxu0 }
 0x3a6   :  { %v1223_v15 = vpack.c.bf16 %v1119_v23, %v1119_v23  ;;  %v1007_v28 = vpop.f32.mrf.mxu1 }
 0x3a7   :  { %v1120_v29 = vmul.f32 %v1391_v26, %v1007_v28  ;;  %v959_v19 = vpop.f32.mrf.mxu0 }
 0x3a8   :  { %v1341_v30 = vpop.f32.mrf.mxu1  ;;  %1139 = vrot.lane.b32.xlu0 %v1223_v15, %s1398_s0 }
 0x3a9   :  { %v1224_v31 = vpack.c.bf16 %v1120_v29, %v1120_v29  ;;  %v1336_v52 = vpop.f32.mrf.mxu0 }
 0x3aa   :  { %v1010_v32 = vpop.f32.mrf.mxu1 }
 0x3ab   :  { %1141 = vrot.lane.b32.xlu1 %v1224_v31, %s1398_s0  ;;  %v1058_v34 = vpop.f32.mrf.mxu0 }
 0x3ac   :  { %v1121_v35 = vmul.f32 %v1393_v33, %v1058_v34  ;;  %v1342_v36 = vpop.f32.mrf.mxu1 }
 0x3ad   :  { %v1347_v38 = vpop.f32.mrf.mxu0 }
 0x3ae   :  { %v1225_v41 = vpack.c.bf16 %v1121_v35, %v1121_v35  ;;  %v1109_v42 = vpop.f32.mrf.mxu1 }
 0x3af   :  { %v1122_v43 = vmul.f32 %v1395_v39, %v1109_v42  ;;  %v1061_v45 = vpop.f32.mrf.mxu0 }
 0x3b0   :  { %v1353_v46 = vpop.f32.mrf.mxu1  ;;  %1143 = vrot.lane.b32.xlu1 %v1225_v41, %s1398_s0 }
 0x3b1   :  { %v1226_v47 = vpack.c.bf16 %v1122_v43, %v1122_v43  ;;  %v1348_v49 = vpop.f32.mrf.mxu0 }
 0x3b2   :  { %v1112_v50 = vpop.f32.mrf.mxu1 }
 0x3b4   :  { %v1354_v53 = vpop.f32.mrf.mxu1  ;;  %1145 = vrot.lane.b32.xlu1 %v1226_v47, %s1398_s0 }
 0x41a   :  { %v1140_v55 = vpop.permute.xlu0 %1139 }
 0x41b   :  { %v1154_v56 = vsel %vm1684_vm10, %v1140_v55, %v1153_v54 }
 0x41c   :  { %1155 = vst [vmem:[%s1723_s3] sm:$0x7] %v1154_v56 }
 0x41d   :  { %v1142_v2 = vpop.permute.xlu1 %1141 }
 0x41e   :  { %v1157_v20 = vsel %vm1684_vm10, %v1142_v2, %v1156_v57 }
 0x41f   :  { %1158 = vst [vmem:[%s1723_s3 + $0x4] sm:$0x7] %v1157_v20 }
 0x422   :  { %v1144_v60 = vpop.permute.xlu1 %1143 }
 0x423   :  { %v1160_v61 = vsel %vm1684_vm10, %v1144_v60, %v1159_v58 }
 0x424   :  { %1161 = vst [vmem:[%s1723_s3 + $0x8] sm:$0x7] %v1160_v61 }
 0x426   :  { %v1146_v27 = vpop.permute.xlu1 %1145 }
 0x427   :  { %v1163_v63 = vsel %vm1684_vm10, %v1146_v27, %v1162_v62 }
 0x428   :  { %1164 = vst [vmem:[%s1723_s3 + $0xc] sm:$0x7] %v1163_v63 }

// kernel: timesformer_forward.37
= control target key start
LH: loop header
LB: loop body
LE: loop exit
PB: predicated region body
PF: predicated region fallthrough
CT: control target
= control target key end

     0   :  { %v467_v1 = vmov 0   ;;  %v36_v19 = vlaneseq  ;;  %s623_s1 = inlined_call_operand.vmem [shape: bf16[128,256], index: 1, kind: input, shape index: {}]   ;;  %s624_s0 = inlined_call_operand.vmem [shape: bf16[24,128], index: 0, kind: input, shape index: {}]   ;;  %s625_s2 = inlined_call_operand.vmem [shape: f32[1,256], index: 2, kind: input, shape index: {}]   ;;  %s626_s3 = inlined_call_operand.vmem [shape: bf16[24,256], index: 3, kind: output, shape index: {}]  }
   0x1   :  { %v417_v0 = vld [vmem:[%s623_s1 + $0x74] ss:$8 sps:$4 sm:$0xff]   ;;  %168 = vmatprep.mubr.bf16.mxu0 %v467_v1  ;;  %178 = vmatprep.mubr.bf16.mxu1 %v467_v1  ;;  %v419_v2 = vld [vmem:[%s623_s1 + $0x70] ss:$8 sps:$4 sm:$0xff]   ;;  %v420_v3 = vld [vmem:[%s623_s1 + $0x64] ss:$8 sps:$4 sm:$0xff]  }
   0x2   :  { %136 = vmatprep.subr.bf16.mxu0 %v417_v0  ;;  %400 = vmatprep.subr.bf16.mxu1 %v417_v0  ;;  %v422_v4 = vld [vmem:[%s623_s1 + $0x60] ss:$8 sps:$4 sm:$0xff]   ;;  %v423_v5 = vld [vmem:[%s623_s1 + $0x54] ss:$8 sps:$4 sm:$0xff]   ;;  %v425_v6 = vld [vmem:[%s623_s1 + $0x50] ss:$8 sps:$4 sm:$0xff]  }
   0x3   :  { %137 = vmatpush1.bf16.msra.mxu0 %v419_v2  ;;  %408 = vmatpush1.bf16.msra.mxu1 %v419_v2  ;;  %v426_v7 = vld [vmem:[%s623_s1 + $0x44] ss:$8 sps:$4 sm:$0xff]   ;;  %v428_v8 = vld [vmem:[%s623_s1 + $0x40] ss:$8 sps:$4 sm:$0xff]   ;;  %v429_v9 = vld [vmem:[%s623_s1 + $0x34] ss:$8 sps:$4 sm:$0xff]  }
   0x4   :  { %138 = vmatprep.subr.bf16.mxu0 %v420_v3  ;;  %401 = vmatprep.subr.bf16.mxu1 %v420_v3  ;;  %v431_v10 = vld [vmem:[%s623_s1 + $0x30] ss:$8 sps:$4 sm:$0xff]   ;;  %v432_v11 = vld [vmem:[%s623_s1 + $0x24] ss:$8 sps:$4 sm:$0xff]   ;;  %v434_v12 = vld [vmem:[%s623_s1 + $0x20] ss:$8 sps:$4 sm:$0xff]  }
   0x5   :  { %v435_v13 = vld [vmem:[%s623_s1 + $0x14] ss:$8 sps:$4 sm:$0xff]   ;;  %v437_v14 = vld [vmem:[%s623_s1 + $0x10] ss:$8 sps:$4 sm:$0xff]   ;;  %v438_v15 = vld [vmem:[%s623_s1 + $0x4] ss:$8 sps:$4 sm:$0xff]  }
   0x6   :  { %v440_v16 = vld [vmem:[%s623_s1] ss:$8 sps:$4 sm:$0xff]   ;;  %v37_v20 = vshrl.u32 %v36_v19, 7 }
   0x7   :  { %139 = vmatpush1.bf16.msra.mxu0 %v422_v4  ;;  %409 = vmatpush1.bf16.msra.mxu1 %v422_v4  ;;  %v441_v17 = vld [vmem:[%s624_s0] sm:$0xff]   ;;  %v442_v18 = vld [vmem:[%s624_s0 + $0x8] ss:$0 sps:$4 sm:$0xff]  }
   0x8   :  { %140 = vmatprep.subr.bf16.mxu0 %v423_v5  ;;  %402 = vmatprep.subr.bf16.mxu1 %v423_v5  ;;  %v38_v21 = vsub.s32 0, %v37_v20  ;;  %v34_v22 = vld [vmem:[%s625_s2] sm:$0x3]  ;;  %v42_v23 = vsub.s32 1, %v37_v20 }
   0xa   :  { %v39_v24 = vrot.slane %v34_v22, %v38_v21  ;;  %v43_v27 = vrot.slane %v34_v22, %v42_v23 }
   0xb   :  { %141 = vmatpush1.bf16.msra.mxu0 %v425_v6  ;;  %410 = vmatpush1.bf16.msra.mxu1 %v425_v6 }
   0xc   :  { %142 = vmatprep.subr.bf16.mxu0 %v426_v7  ;;  %403 = vmatprep.subr.bf16.mxu1 %v426_v7 }
   0xf   :  { %143 = vmatpush1.bf16.msra.mxu0 %v428_v8  ;;  %411 = vmatpush1.bf16.msra.mxu1 %v428_v8 }
  0x10   :  { %144 = vmatprep.subr.bf16.mxu0 %v429_v9  ;;  %404 = vmatprep.subr.bf16.mxu1 %v429_v9 }
  0x13   :  { %145 = vmatpush1.bf16.msra.mxu0 %v431_v10  ;;  %412 = vmatpush1.bf16.msra.mxu1 %v431_v10 }
  0x14   :  { %146 = vmatprep.subr.bf16.mxu0 %v432_v11  ;;  %405 = vmatprep.subr.bf16.mxu1 %v432_v11 }
  0x17   :  { %147 = vmatpush1.bf16.msra.mxu0 %v434_v12  ;;  %413 = vmatpush1.bf16.msra.mxu1 %v434_v12 }
  0x18   :  { %148 = vmatprep.subr.bf16.mxu0 %v435_v13  ;;  %406 = vmatprep.subr.bf16.mxu1 %v435_v13 }
  0x1b   :  { %149 = vmatpush1.bf16.msra.mxu0 %v437_v14  ;;  %414 = vmatpush1.bf16.msra.mxu1 %v437_v14 }
  0x1c   :  { %150 = vmatprep.subr.bf16.mxu0 %v438_v15  ;;  %407 = vmatprep.subr.bf16.mxu1 %v438_v15 }
  0x1f   :  { %151 = vmatpush1.bf16.msra.mxu0 %v440_v16  ;;  %415 = vmatpush1.bf16.msra.mxu1 %v440_v16 }
  0x22   :  { %169 = vmatmul.mubr.bf16.vlgmr.msra.gmra.mxu0 %v441_v17  ;;  %179 = vmatmul.mubr.bf16.vlgmr.msra.gmra.mxu1 %v442_v18 }
  0xe2   :  { %v170_v25 = vpop.f32.mrf.mxu0  ;;  %v180_v26 = vpop.f32.mrf.mxu1 }
  0xe3   :  { %v545_v28 = vadd.f32 %v170_v25, %v39_v24  ;;  %v547_v29 = vadd.f32 %v180_v26, %v39_v24 }
  0xe4   :  { %v172_v30 = vpop.f32.mrf.mxu0  ;;  %v182_v31 = vpop.f32.mrf.mxu1 }
  0xe5   :  { %v550_v32 = vmul.f32 0.70710677, %v545_v28  ;;  %v553_v33 = vmul.f32 0.70710677, %v547_v29  ;;  %v555_v34 = vadd.f32 %v172_v30, %v43_v27  ;;  %v557_v35 = vadd.f32 %v182_v31, %v43_v27 }
  0xe6   :  { %v184_v36 = vpop.f32.mrf.mxu1  ;;  %v174_v44 = vpop.f32.mrf.mxu0 }
  0xe7   :  { %v199_v37 = vand.u32 2147483647, %v550_v32  ;;  %v203_v38 = vand.u32 2147483647, %v553_v33  ;;  %v562_v39 = vmul.f32 0.70710677, %v555_v34  ;;  %v569_v51 = vadd.f32 %v174_v44, %v39_v24 }
  0xe8   :  { %v565_v40 = vmul.f32 0.70710677, %v557_v35  ;;  %v185_v41 = vpop.f32.mrf.mxu1  ;;  %v176_v52 = vpop.f32.mrf.mxu0  ;;  %vm319_vm0 = vcmp.ge.f32.partialorder %v550_v32, 0.0  ;;  %vm323_vm1 = vcmp.ge.f32.partialorder %v553_v33, 0.0 }
  0xe9   :  { %v205_v42 = vmul.f32 0.3275911, %v199_v37  ;;  %v209_v43 = vmul.f32 0.3275911, %v203_v38  ;;  %v200_v45 = vand.u32 2147483647, %v562_v39  ;;  %v574_v56 = vadd.f32 %v176_v52, %v43_v27 }
  0xea   :  { %v204_v46 = vand.u32 2147483647, %v565_v40  ;;  %v572_v55 = vmul.f32 0.70710677, %v569_v51  ;;  %v283_v58 = vsub.f32 0.0, %v199_v37  ;;  %v287_v60 = vsub.f32 0.0, %v203_v38 }
  0xeb   :  { %v211_v47 = vadd.f32 1.0, %v205_v42  ;;  %v215_v48 = vadd.f32 1.0, %v209_v43  ;;  %v206_v49 = vmul.f32 0.3275911, %v200_v45  ;;  %v578_v59 = vmul.f32 0.70710677, %v574_v56 }
  0xec   :  { %v210_v50 = vmul.f32 0.3275911, %v204_v46  ;;  %v201_v57 = vand.u32 2147483647, %v572_v55  ;;  %v289_v0 = vmul.f32 %v283_v58, %v199_v37  ;;  %v293_v2 = vmul.f32 %v287_v60, %v203_v38 }
  0xed   :  { %443 = vrcp.f32 %v211_v47  ;;  %v212_v53 = vadd.f32 1.0, %v206_v49  ;;  %v202_v62 = vand.u32 2147483647, %v578_v59  ;;  %v284_v3 = vsub.f32 0.0, %v200_v45 }
  0xee   :  { %445 = vrcp.f32 %v215_v48  ;;  %v216_v54 = vadd.f32 1.0, %v210_v50  ;;  %v207_v61 = vmul.f32 0.3275911, %v201_v57  ;;  %v288_v4 = vsub.f32 0.0, %v204_v46 }
  0xef   :  { %447 = vrcp.f32 %v212_v53  ;;  %v208_v1 = vmul.f32 0.3275911, %v202_v62  ;;  %v295_v7 = vmul.f32 1.442695, %v289_v0  ;;  %v303_v10 = vmul.f32 1.442695, %v293_v2 }
  0xf0   :  { %449 = vrcp.f32 %v216_v54  ;;  %v213_v63 = vadd.f32 1.0, %v207_v61  ;;  %v290_v11 = vmul.f32 %v284_v3, %v200_v45  ;;  %v294_v13 = vmul.f32 %v288_v4, %v204_v46 }
  0xf1   :  { %v214_v5 = vadd.f32 1.0, %v208_v1  ;;  %v285_v14 = vsub.f32 0.0, %v201_v57  ;;  %v286_v25 = vsub.f32 0.0, %v202_v62  ;;  %vm320_vm2 = vcmp.ge.f32.partialorder %v562_v39, 0.0 }
  0xf2   :  { %451 = vrcp.f32 %v213_v63  ;;  %v297_v20 = vmul.f32 1.442695, %v290_v11  ;;  %v305_v23 = vmul.f32 1.442695, %v294_v13  ;;  %vm324_vm3 = vcmp.ge.f32.partialorder %v565_v40, 0.0 }
  0xf3   :  { %453 = vrcp.f32 %v214_v5  ;;  %v291_v24 = vmul.f32 %v285_v14, %v201_v57  ;;  %v292_v44 = vmul.f32 %v286_v25, %v202_v62  ;;  %vm321_vm4 = vcmp.ge.f32.partialorder %v572_v55, 0.0 }
  0xf4   :  { %455 = vpow2.f32 %v295_v7  ;;  %vm322_vm5 = vcmp.ge.f32.partialorder %v578_v59, 0.0 }
  0xf5   :  { %457 = vpow2.f32 %v303_v10  ;;  %v299_v43 = vmul.f32 1.442695, %v291_v24  ;;  %v301_v61 = vmul.f32 1.442695, %v292_v44 }
  0xf6   :  { %459 = vpow2.f32 %v297_v20 }
  0xf7   :  { %461 = vpow2.f32 %v305_v23 }
  0xf8   :  { %463 = vpow2.f32 %v299_v43 }
  0xf9   :  { %465 = vpow2.f32 %v301_v61 }
  0xfa   :  { %v444_v6 = vpop.eup %443 }
  0xfb   :  { %v446_v8 = vpop.eup %445  ;;  %v229_v9 = vmul.f32 1.0614054, %v444_v6 }
  0xfc   :  { %v233_v12 = vmul.f32 1.0614054, %v446_v8  ;;  %v448_v16 = vpop.eup %447 }
  0xfd   :  { %v235_v15 = vadd.f32 -1.4531521, %v229_v9  ;;  %v230_v19 = vmul.f32 1.0614054, %v448_v16  ;;  %v581_v21 = vpop.eup %449 }
  0xfe   :  { %v239_v17 = vadd.f32 -1.4531521, %v233_v12  ;;  %v234_v30 = vmul.f32 1.0614054, %v581_v21 }
  0xff   :  { %v241_v18 = vmul.f32 %v444_v6, %v235_v15  ;;  %v236_v27 = vadd.f32 -1.4531521, %v230_v19  ;;  %v584_v41 = vpop.eup %451 }
 0x100   :  { %v245_v22 = vmul.f32 %v446_v8, %v239_v17  ;;  %v240_v38 = vadd.f32 -1.4531521, %v234_v30  ;;  %v231_v48 = vmul.f32 1.0614054, %v584_v41  ;;  %v588_v50 = vpop.eup %453 }
 0x101   :  { %v247_v26 = vadd.f32 1.4214138, %v241_v18  ;;  %v242_v37 = vmul.f32 %v448_v16, %v236_v27  ;;  %v232_v60 = vmul.f32 1.0614054, %v588_v50  ;;  %v456_v4 = vpop.eup %455 }
 0x102   :  { %v251_v31 = vadd.f32 1.4214138, %v245_v22  ;;  %v246_v47 = vmul.f32 %v581_v21, %v240_v38  ;;  %v237_v57 = vadd.f32 -1.4531521, %v231_v48  ;;  %v458_v11 = vpop.eup %457 }
 0x103   :  { %v253_v36 = vmul.f32 %v444_v6, %v247_v26  ;;  %v248_v46 = vadd.f32 1.4214138, %v242_v37  ;;  %v238_v3 = vadd.f32 -1.4531521, %v232_v60  ;;  %v460_v25 = vpop.eup %459 }
 0x104   :  { %v257_v42 = vmul.f32 %v446_v8, %v251_v31  ;;  %v252_v54 = vadd.f32 1.4214138, %v246_v47  ;;  %v243_v1 = vmul.f32 %v584_v41, %v237_v57  ;;  %v188_v57 = vmul.f32 0.5, %v555_v34 }
 0x105   :  { %v259_v45 = vadd.f32 -0.28449672, %v253_v36  ;;  %v254_v53 = vmul.f32 %v448_v16, %v248_v46  ;;  %v244_v13 = vmul.f32 %v588_v50, %v238_v3 }
 0x106   :  { %v263_v49 = vadd.f32 -0.28449672, %v257_v42  ;;  %v258_v0 = vmul.f32 %v581_v21, %v252_v54  ;;  %v249_v10 = vadd.f32 1.4214138, %v243_v1 }
 0x107   :  { %v265_v52 = vmul.f32 %v444_v6, %v259_v45  ;;  %v260_v62 = vadd.f32 -0.28449672, %v254_v53  ;;  %v250_v20 = vadd.f32 1.4214138, %v244_v13  ;;  %v187_v53 = vmul.f32 0.5, %v545_v28 }
 0x108   :  { %v269_v58 = vmul.f32 %v446_v8, %v263_v49  ;;  %v264_v9 = vadd.f32 -0.28449672, %v258_v0  ;;  %v255_v18 = vmul.f32 %v584_v41, %v249_v10  ;;  %v192_v28 = vmul.f32 0.5, %v557_v35 }
 0x109   :  { %v271_v63 = vadd.f32 0.2548296, %v265_v52  ;;  %v266_v7 = vmul.f32 %v448_v16, %v260_v62  ;;  %v256_v27 = vmul.f32 %v588_v50, %v250_v20  ;;  %v190_v13 = vmul.f32 0.5, %v574_v56 }
 0x10a   :  { %v275_v2 = vadd.f32 0.2548296, %v269_v58  ;;  %v270_v17 = vmul.f32 %v581_v21, %v264_v9 }
 0x10b   :  { %v277_v5 = vmul.f32 %v444_v6, %v271_v63  ;;  %v272_v15 = vadd.f32 0.2548296, %v266_v7  ;;  %v261_v6 = vadd.f32 -0.28449672, %v255_v18  ;;  %v262_v42 = vadd.f32 -0.28449672, %v256_v27 }
 0x10c   :  { %v281_v12 = vmul.f32 %v446_v8, %v275_v2  ;;  %v276_v24 = vadd.f32 0.2548296, %v270_v17  ;;  %v462_v8 = vpop.eup %461 }
 0x10d   :  { %v307_v14 = vmul.f32 %v456_v4, %v277_v5  ;;  %v278_v23 = vmul.f32 %v448_v16, %v272_v15  ;;  %v267_v37 = vmul.f32 %v584_v41, %v261_v6  ;;  %v268_v46 = vmul.f32 %v588_v50, %v262_v42  ;;  %v464_v47 = vpop.eup %463 }
 0x10e   :  { %v311_v19 = vmul.f32 %v458_v11, %v281_v12  ;;  %v282_v36 = vmul.f32 %v581_v21, %v276_v24  ;;  %v466_v0 = vpop.eup %465  ;;  %v189_v12 = vmul.f32 0.5, %v569_v51 }
 0x10f   :  { %v313_v22 = vsub.f32 1.0, %v307_v14  ;;  %v308_v31 = vmul.f32 %v460_v25, %v278_v23  ;;  %v273_v45 = vadd.f32 0.2548296, %v267_v37  ;;  %v274_v32 = vadd.f32 0.2548296, %v268_v46 }
 0x110   :  { %v317_v26 = vsub.f32 1.0, %v311_v19  ;;  %v312_v16 = vmul.f32 %v462_v8, %v282_v36 }
 0x111   :  { %v325_v30 = vsub.f32 0.0, %v313_v22  ;;  %v314_v44 = vsub.f32 1.0, %v308_v31  ;;  %v279_v21 = vmul.f32 %v584_v41, %v273_v45  ;;  %v280_v62 = vmul.f32 %v588_v50, %v274_v32 }
 0x112   :  { %v329_v38 = vsub.f32 0.0, %v317_v26  ;;  %v318_v52 = vsub.f32 1.0, %v312_v16  ;;  %v191_v41 = vmul.f32 0.5, %v547_v29 }
 0x113   :  { %v331_v43 = vsel %vm319_vm0, %v313_v22, %v325_v30  ;;  %v326_v49 = vsub.f32 0.0, %v314_v44  ;;  %v309_v61 = vmul.f32 %v464_v47, %v279_v21  ;;  %v310_v34 = vmul.f32 %v466_v0, %v280_v62 }
 0x114   :  { %v335_v48 = vsel %vm323_vm1, %v317_v26, %v329_v38  ;;  %v337_v54 = vadd.f32 1.0, %v331_v43  ;;  %v330_v60 = vsub.f32 0.0, %v318_v52 }
 0x115   :  { %v332_v58 = vsel %vm320_vm2, %v314_v44, %v326_v49  ;;  %v341_v33 = vadd.f32 1.0, %v335_v48  ;;  %v315_v2 = vsub.f32 1.0, %v309_v61  ;;  %v316_v40 = vsub.f32 1.0, %v310_v34 }
 0x116   :  { %v338_v63 = vadd.f32 1.0, %v332_v58  ;;  %v336_v1 = vsel %vm324_vm3, %v318_v52, %v330_v60  ;;  %v343_v39 = vmul.f32 %v337_v54, %v187_v53 }
 0x117   :  { %v342_v4 = vadd.f32 1.0, %v336_v1  ;;  %v327_v5 = vsub.f32 0.0, %v315_v2  ;;  %v347_v7 = vmul.f32 %v341_v33, %v191_v41  ;;  %v328_v35 = vsub.f32 0.0, %v316_v40 }
 0x118   :  { %v344_v3 = vmul.f32 %v338_v63, %v188_v57 }
 0x119   :  { %v348_v10 = vmul.f32 %v342_v4, %v192_v28  ;;  %v333_v11 = vsel %vm321_vm4, %v315_v2, %v327_v5  ;;  %v334_v55 = vsel %vm322_vm5, %v316_v40, %v328_v35 }
 0x11a   :  { %v397_v9 = vpack.c.bf16 %v344_v3, %v343_v39  ;;  %v339_v50 = vadd.f32 1.0, %v333_v11  ;;  %v340_v14 = vadd.f32 1.0, %v334_v55 }
 0x11b   :  { %v399_v29 = vpack.c.bf16 %v348_v10, %v347_v7 }
 0x11c   :  { %369 = vst [vmem:[%s626_s3] sm:$0xff] %v397_v9  ;;  %v345_v15 = vmul.f32 %v339_v50, %v189_v12  ;;  %v346_v17 = vmul.f32 %v340_v14, %v190_v13 }
 0x11d   :  { %371 = vst [vmem:[%s626_s3 + $0x10] sm:$0xff] %v399_v29 }
 0x11e   :  { %v398_v18 = vpack.c.bf16 %v346_v17, %v345_v15 }
 0x120   :  { %370 = vst [vmem:[%s626_s3 + $0x8] sm:$0xff] %v398_v18 }

// kernel: timesformer_forward.38
= control target key start
LH: loop header
LB: loop body
LE: loop exit
PB: predicated region body
PF: predicated region fallthrough
CT: control target
= control target key end

     0   :  { %s448_s1 = inlined_call_operand.vmem [shape: bf16[256,128], index: 1, kind: input, shape index: {}]   ;;  %s449_s0 = inlined_call_operand.vmem [shape: bf16[24,256], index: 0, kind: input, shape index: {}]   ;;  %s450_s3 = inlined_call_operand.vmem [shape: bf16[24,128], index: 3, kind: input, shape index: {}]   ;;  %s451_s2 = inlined_call_operand.vmem [shape: f32[1,128], index: 2, kind: input, shape index: {}]   ;;  %s452_s4 = inlined_call_operand.vmem [shape: bf16[24,128], index: 4, kind: output, shape index: {}]  }
   0x1   :  { %v330_v0 = vld [vmem:[%s448_s1 + $0x78] sm:$0xff]   ;;  %v332_v2 = vld [vmem:[%s448_s1 + $0x70] sm:$0xff]   ;;  %v334_v4 = vld [vmem:[%s448_s1 + $0x68] sm:$0xff]  }
   0x2   :  { %v331_v1 = vld [vmem:[%s448_s1 + $0x38] sm:$0xff]   ;;  %286 = vmatprep.subr.bf16.mxu0 %v330_v0  ;;  %314 = vmatprep.subr.bf16.mxu1 %v330_v0  ;;  %v333_v3 = vld [vmem:[%s448_s1 + $0x30] sm:$0xff]   ;;  %v335_v5 = vld [vmem:[%s448_s1 + $0x28] sm:$0xff]  }
   0x3   :  { %287 = vmatpush3.bf16.msra.mxu0 %v331_v1  ;;  %322 = vmatpush3.bf16.msra.mxu1 %v331_v1  ;;  %v336_v6 = vld [vmem:[%s448_s1 + $0x60] sm:$0xff]   ;;  %v338_v8 = vld [vmem:[%s448_s1 + $0x58] sm:$0xff]   ;;  %v340_v10 = vld [vmem:[%s448_s1 + $0x50] sm:$0xff]  }
   0x4   :  { %288 = vmatprep.subr.bf16.mxu0 %v332_v2  ;;  %315 = vmatprep.subr.bf16.mxu1 %v332_v2  ;;  %v337_v7 = vld [vmem:[%s448_s1 + $0x20] sm:$0xff]   ;;  %v339_v9 = vld [vmem:[%s448_s1 + $0x18] sm:$0xff]   ;;  %v20_v12 = vld [vmem:[%s449_s0 + $0x10] sm:$0xff] }
   0x5   :  { %v348_v11 = vld [vmem:[%s449_s0 + $0x4] ss:$8 sps:$4 sm:$0xff]   ;;  %v254_v13 = vcombine.high %v20_v12, %v20_v12  ;;  %v341_v14 = vld [vmem:[%s448_s1 + $0x10] sm:$0xff]   ;;  %v346_v19 = vld [vmem:[%s449_s0] ss:$8 sps:$4 sm:$0xff]   ;;  %v253_v20 = vcombine.low %v20_v12, %v20_v12 }
   0x6   :  { %v342_v15 = vld [vmem:[%s448_s1 + $0x48] sm:$0xff]   ;;  %205 = vmatprep.mubr.bf16.mxu0 %v348_v11  ;;  %v344_v17 = vld [vmem:[%s448_s1 + $0x40] sm:$0xff]  }
   0x7   :  { %289 = vmatpush3.bf16.msra.mxu0 %v333_v3  ;;  %323 = vmatpush3.bf16.msra.mxu1 %v333_v3  ;;  %v343_v16 = vld [vmem:[%s448_s1 + $0x8] sm:$0xff]   ;;  %v345_v18 = vld [vmem:[%s448_s1] sm:$0xff]  }
   0x8   :  { %290 = vmatprep.subr.bf16.mxu0 %v334_v4  ;;  %316 = vmatprep.subr.bf16.mxu1 %v334_v4  ;;  %v223_v23 = vld [vmem:[%s450_s3 + $0x8] sm:$0xf]  ;;  %v278_v27 = vld [vmem:[%s450_s3] sm:$0xff]  }
   0x9   :  { %213 = vmatprep.mubr.bf16.mxu1 %v254_v13  ;;  %v226_v29 = vunpack.c.l.bf16 %v223_v23  ;;  %v250_v30 = vld [vmem:[%s451_s2] ss:$0 sm:$0xff]  ;;  %v279_v34 = vunpack.c.l.bf16 %v278_v27  ;;  %v280_v40 = vunpack.c.h.bf16 %v278_v27 }
   0xb   :  { %291 = vmatpush3.bf16.msra.mxu0 %v335_v5  ;;  %324 = vmatpush3.bf16.msra.mxu1 %v335_v5 }
   0xc   :  { %292 = vmatprep.subr.bf16.mxu0 %v336_v6  ;;  %317 = vmatprep.subr.bf16.mxu1 %v336_v6 }
   0xf   :  { %293 = vmatpush3.bf16.msra.mxu0 %v337_v7  ;;  %325 = vmatpush3.bf16.msra.mxu1 %v337_v7 }
  0x10   :  { %294 = vmatprep.subr.bf16.mxu0 %v338_v8  ;;  %318 = vmatprep.subr.bf16.mxu1 %v338_v8 }
  0x13   :  { %295 = vmatpush3.bf16.msra.mxu0 %v339_v9  ;;  %326 = vmatpush3.bf16.msra.mxu1 %v339_v9 }
  0x14   :  { %296 = vmatprep.subr.bf16.mxu0 %v340_v10  ;;  %319 = vmatprep.subr.bf16.mxu1 %v340_v10 }
  0x17   :  { %297 = vmatpush3.bf16.msra.mxu0 %v341_v14  ;;  %327 = vmatpush3.bf16.msra.mxu1 %v341_v14 }
  0x18   :  { %298 = vmatprep.subr.bf16.mxu0 %v342_v15  ;;  %320 = vmatprep.subr.bf16.mxu1 %v342_v15 }
  0x1b   :  { %299 = vmatpush3.bf16.msra.mxu0 %v343_v16  ;;  %328 = vmatpush3.bf16.msra.mxu1 %v343_v16 }
  0x1c   :  { %300 = vmatprep.subr.bf16.mxu0 %v344_v17  ;;  %321 = vmatprep.subr.bf16.mxu1 %v344_v17 }
  0x1f   :  { %301 = vmatpush3.bf16.msra.mxu0 %v345_v18  ;;  %329 = vmatpush3.bf16.msra.mxu1 %v345_v18 }
  0x22   :  { %206 = vmatmul.mubr.bf16.vlgmr.msra.gmra.mxu0 %v346_v19  ;;  %214 = vmatmul.mubr.bf16.vlgmr.msra.gmra.mxu1 %v253_v20 }
  0xe2   :  { %v302_v21 = vpop.f32.mrf.mxu0  ;;  %v308_v22 = vpop.f32.mrf.mxu1 }
  0xe4   :  { %v303_v24 = vpop.f32.mrf.mxu0  ;;  %v309_v25 = vpop.f32.mrf.mxu1 }
  0xe5   :  { %v304_v26 = vadd.f32 %v303_v24, %v302_v21  ;;  %v310_v28 = vadd.f32 %v309_v25, %v308_v22 }
  0xe6   :  { %v305_v31 = vpop.f32.mrf.mxu0  ;;  %v311_v32 = vpop.f32.mrf.mxu1 }
  0xe7   :  { %v216_v33 = vadd.f32 %v310_v28, %v250_v30  ;;  %v208_v37 = vadd.f32 %v304_v26, %v250_v30 }
  0xe8   :  { %v306_v35 = vpop.f32.mrf.mxu0  ;;  %v312_v36 = vpop.f32.mrf.mxu1 }
  0xe9   :  { %v229_v38 = vadd.f32 %v226_v29, %v216_v33  ;;  %v307_v39 = vadd.f32 %v306_v35, %v305_v31  ;;  %v227_v43 = vadd.f32 %v279_v34, %v208_v37 }
  0xeb   :  { %v276_v41 = vpack.c.bf16 %v229_v38, %v229_v38  ;;  %v211_v42 = vadd.f32 %v307_v39, %v250_v30 }
  0xed   :  { %245 = vst [vmem:[%s452_s4 + $0x8] sm:$0xf] %v276_v41  ;;  %v228_v44 = vadd.f32 %v280_v40, %v211_v42 }
  0xef   :  { %v284_v45 = vpack.c.bf16 %v228_v44, %v227_v43 }
  0xf1   :  { %285 = vst [vmem:[%s452_s4] sm:$0xff] %v284_v45  }

</bundles_post_ra>
